<compile_context>
chip_gen: v5e
topology: v5e:2x2
jax: 0.10.0
libtpu: 0.0.40
codegen_flags: <defaults>
</compile_context>

<pallas_src>
import functools

import jax
import jax.numpy as jnp
from jax.experimental import pallas as pl
from jax.experimental.pallas import tpu as pltpu


def _round_up(x, m):
    return ((x + m - 1) // m) * m


def _vmem_capacity_bytes():
    try:
        info = pltpu.get_tpu_info()
        cap = getattr(info, "vmem_capacity_bytes", None)
        if cap:
            return int(cap)
    except Exception:
        pass
    return None


def _quantize_kernel(x_ref, em2_ref, et_ref, e2_ref, q_ref, ind_ref, diff_ref, *,
                     num_inner, n_valid, needs_mask, dist_dtype):
    p = pl.program_id(0)   # parallel slot (maps to a TensorCore on multi-TC chips)
    i = pl.program_id(1)   # sequential tile index within the slot

    x = x_ref[...].astype(jnp.float32)                 # (tn, dim)
    tn, dim = x.shape
    n_embed = e2_ref.shape[1]

    # argmin_j ||x - e_j||^2 == argmin_j (||e_j||^2 - 2 x.e_j); the per-row ||x||^2
    # term is constant w.r.t. j and dropped.  The -2 scale is pre-folded into the
    # tiny resident codebook copy em2 = -2*E, so dist is one MXU matmul + one add.
    xd = x if dist_dtype == jnp.float32 else x.astype(dist_dtype)
    dist = e2_ref[...] + jnp.dot(xd, em2_ref[...],
                                 preferred_element_type=jnp.float32)   # (tn, n_embed)

    # argmin over the codebook axis (first index among ties).  The iota is a tiny
    # (1, n_embed) row that broadcasts -- no (tn, n_embed) int32 temp is materialized.
    ids = jax.lax.broadcasted_iota(jnp.int32, (1, n_embed), 1)          # (1, n_embed)
    min_d = jnp.min(dist, axis=1, keepdims=True)                        # (tn, 1)
    ind = jnp.min(jnp.where(dist <= min_d, ids, n_embed), axis=1,
                  keepdims=True)                                        # (tn, 1) int32

    # one-hot @ E^T  ->  quantized vectors (MXU gather, contraction over n_embed).
    onehot = (ids == ind).astype(jnp.float32)                           # (tn, n_embed)
    quant = jnp.dot(onehot, et_ref[...],
                    preferred_element_type=jnp.float32)                 # (tn, dim)

    q_ref[...] = quant.astype(q_ref.dtype)

    # Lane-dense index store: one (1, tn) row per step instead of a (tn, 1) column.
    # The column->row conversion is a small XLU relayout (XLU has slack here).
    ind_ref[...] = ind.reshape(1, 1, tn)

    # Squared-error partial for this tile: reduce over rows (sublane axis) only; the
    # final cross-lane collapse + mean happens once, in the wrapper.
    d = quant - x
    dsq = d * d
    if needs_mask:
        row0 = (p * num_inner + i) * tn
        rows = row0 + jax.lax.broadcasted_iota(jnp.int32, (tn, 1), 0)
        dsq = jnp.where(rows < n_valid, dsq, 0.0)
    partial = jnp.sum(dsq, axis=0, keepdims=True)                       # (1, dim)

    @pl.when(i == 0)
    def _():
        diff_ref[...] = jnp.zeros_like(diff_ref)

    # One masked (dim-lane) RMW per step; negligible next to the (tn, n_embed) traffic.
    diff_ref[0:1, 0:dim] = diff_ref[0:1, 0:dim] + partial


def quantize_forward(x, embed, *, target_tn=None, n_parallel=None,
                     use_bf16_dist=False):
    """x: (B, H, W, dim) channels-last; embed: (dim, n_embed) codebook buffer."""
    B, H, W, dim = x.shape
    d2, n_embed = embed.shape
    assert d2 == dim
    N = B * H * W

    # --- generation-aware defaults -------------------------------------------------
    cap = _vmem_capacity_bytes()
    if cap is not None and cap >= 100 * 1024 * 1024:
        # v5e / v6e: 128 MiB VMEM, single TensorCore.
        default_p, default_tn = 1, 4096
        vmem_limit, live_budget = 64 * 1024 * 1024, 40 * 1024 * 1024
    else:
        # v7x (64 MiB VMEM, 2 TensorCores) or unknown chip: stay conservative.
        default_p, default_tn = 2, 2048
        vmem_limit, live_budget = 40 * 1024 * 1024, 20 * 1024 * 1024
    P = int(n_parallel) if n_parallel else default_p
    target = int(target_tn) if target_tn else default_tn

    # --- tile selection: biggest 128-aligned row tile under the VMEM budget --------
    rows_per_slot = pl.cdiv(N, P)
    tn = _round_up(min(target, rows_per_slot), 128)
    # Rough live-VMEM guard: f32 x/quant/dsq rows + ~3 materialized (tn, n_embed)
    # f32 temporaries (dist / masked-ids / onehot).
    per_row_bytes = 4 * (4 * dim + 3 * n_embed)
    tn_cap = max(128, (live_budget // per_row_bytes) // 128 * 128)
    tn = max(128, min(tn, tn_cap))
    num_inner = pl.cdiv(rows_per_slot, tn)
    num_blocks = P * num_inner
    N_pad = num_blocks * tn

    flat = x.reshape(N, dim)
    if N_pad != N:
        flat = jnp.pad(flat, ((0, N_pad - N), (0, 0)))

    # Tiny resident codebook tensors (hoisted once; ~tens of KiB total).
    dist_dtype = jnp.bfloat16 if use_bf16_dist else jnp.float32
    embed_f32 = embed.astype(jnp.float32)
    embed_m2 = (-2.0 * embed_f32).astype(dist_dtype)               # (dim, n_embed)
    embed_t = embed_f32.T                                          # (n_embed, dim)
    e2 = jnp.sum(embed_f32 * embed_f32, axis=0, keepdims=True)     # (1, n_embed)

    diff_w = _round_up(max(dim, 128), 128)   # lane-aligned width for the diff partials

    kernel = functools.partial(_quantize_kernel, num_inner=num_inner, n_valid=N,
                               needs_mask=(N_pad != N), dist_dtype=dist_dtype)

    q, ind, diff_parts = pl.pallas_call(
        kernel,
        out_shape=(
            jax.ShapeDtypeStruct((N_pad, dim), x.dtype),
            jax.ShapeDtypeStruct((num_blocks, 1, tn), jnp.int32),   # lane-dense indices
            jax.ShapeDtypeStruct((P * 8, diff_w), jnp.float32),     # per-slot partials
        ),
        grid_spec=pltpu.PrefetchScalarGridSpec(
            num_scalar_prefetch=0,
            grid=(P, num_inner),
            in_specs=[
                pl.BlockSpec((tn, dim), lambda p, i: (p * num_inner + i, 0)),
                pl.BlockSpec((dim, n_embed), lambda p, i: (0, 0)),   # resident -2*E
                pl.BlockSpec((n_embed, dim), lambda p, i: (0, 0)),   # resident E^T
                pl.BlockSpec((1, n_embed), lambda p, i: (0, 0)),     # resident ||e||^2
            ],
            out_specs=[
                pl.BlockSpec((tn, dim), lambda p, i: (p * num_inner + i, 0)),
                pl.BlockSpec((1, 1, tn), lambda p, i: (p * num_inner + i, 0, 0)),
                pl.BlockSpec((8, diff_w), lambda p, i: (p, 0)),      # per-slot accumulator
            ],
        ),
        compiler_params=pltpu.CompilerParams(
            dimension_semantics=("parallel", "arbitrary"),
            vmem_limit_bytes=vmem_limit,
        ),
    )(flat, embed_m2, embed_t, e2)

    quantize = q[:N].reshape(B, H, W, dim)
    embed_ind = ind.reshape(-1)[:N].reshape(B, H, W)
    diff = diff_parts.sum() / jnp.float32(N * dim)
    # Straight-through estimator: the forward value is exactly `quantize`.
    return quantize, diff, embed_ind


def _reference(x, embed):
    dim = x.shape[-1]
    flat = x.reshape(-1, dim).astype(jnp.float32)
    e = embed.astype(jnp.float32)
    dist = (jnp.sum(flat * flat, axis=1, keepdims=True)
            - 2.0 * flat @ e
            + jnp.sum(e * e, axis=0, keepdims=True))
    ind = jnp.argmin(dist, axis=1)
    quant = e.T[ind].reshape(x.shape)
    diff = jnp.mean((quant - x) ** 2)
    return quant, diff, ind.reshape(x.shape[:-1]).astype(jnp.int32)


if __name__ == "__main__":
    # Module config (Quantize(dim, n_embed)): dim=32, n_embed=256; small spatial demo.
    dim, n_embed = 32, 256
    B, H, W = 2, 16, 16

    key = jax.random.PRNGKey(0)
    kx, ke = jax.random.split(key)
    x = jax.random.normal(kx, (B, H, W, dim), dtype=jnp.float32)
    embed = jax.random.normal(ke, (dim, n_embed), dtype=jnp.float32)  # deterministic buffer

    quantize, diff, embed_ind = quantize_forward(x, embed)
    jax.block_until_ready((quantize, diff, embed_ind))

    q_ref, d_ref, i_ref = _reference(x, embed)
    assert quantize.shape == (B, H, W, dim)
    assert embed_ind.shape == (B, H, W)
    assert embed_ind.dtype == jnp.int32
    assert bool(jnp.all(embed_ind == i_ref)), "index mismatch vs reference"
    assert jnp.allclose(quantize, q_ref, atol=1e-5, rtol=1e-5), "quantize mismatch"
    assert jnp.allclose(diff, d_ref, atol=1e-5, rtol=1e-5), "diff mismatch"

    print("KERNEL_OK")
</pallas_src>

<mosaic_0001>
module attributes {stable_mosaic.version = 11 : i64} {
  func.func @_quantize_kernel(%arg0: i32, %arg1: i32, %arg2: memref<256x32xf32, #tpu.memory_space<vmem>>, %arg3: memref<32x256xf32, #tpu.memory_space<vmem>>, %arg4: memref<256x32xf32, #tpu.memory_space<vmem>>, %arg5: memref<1x256xf32, #tpu.memory_space<vmem>>, %arg6: memref<256x32xf32, #tpu.memory_space<vmem>>, %arg7: memref<1x1x256xi32, #tpu.memory_space<vmem>>, %arg8: memref<8x128xf32, #tpu.memory_space<vmem>>) attributes {dimension_semantics = [#tpu.dimension_semantics<parallel>, #tpu.dimension_semantics<arbitrary>], iteration_bounds = array<i64: 2, 1>, scalar_prefetch = 0 : i64, scratch_operands = 0 : i64, tpu.core_type = #tpu.core_type<tc>, window_params = [{transform_indices = @transform_0, window_bounds = array<i64: 256, 32>}, {pipeline_mode = #tpu.pipeline_mode<synchronous>, transform_indices = @transform_1, window_bounds = array<i64: 32, 256>}, {pipeline_mode = #tpu.pipeline_mode<synchronous>, transform_indices = @transform_2, window_bounds = array<i64: 256, 32>}, {pipeline_mode = #tpu.pipeline_mode<synchronous>, transform_indices = @transform_3, window_bounds = array<i64: 1, 256>}, {transform_indices = @transform_4, window_bounds = array<i64: 256, 32>}, {transform_indices = @transform_5, window_bounds = array<i64: 1, 1, 256>}, {transform_indices = @transform_6, window_bounds = array<i64: 8, 128>}]} {
    %c0 = arith.constant 0 : index
    %c0_0 = arith.constant 0 : index
    %0 = vector.load %arg2[%c0, %c0_0] : memref<256x32xf32, #tpu.memory_space<vmem>>, vector<256x32xf32>
    %c0_1 = arith.constant 0 : index
    %c0_2 = arith.constant 0 : index
    %1 = vector.load %arg5[%c0_1, %c0_2] : memref<1x256xf32, #tpu.memory_space<vmem>>, vector<1x256xf32>
    %c0_3 = arith.constant 0 : index
    %c0_4 = arith.constant 0 : index
    %2 = vector.load %arg3[%c0_3, %c0_4] : memref<32x256xf32, #tpu.memory_space<vmem>>, vector<32x256xf32>
    %cst = arith.constant dense<0.000000e+00> : vector<256x256xf32>
    %3 = tpu.matmul %0, %2, %cst {dimension_numbers = #tpu.dot_dimension_numbers<[1], [0], [0], [1], [0, 0, 1, 1], [], []>} : vector<256x32xf32>, vector<32x256xf32>, vector<256x256xf32> -> vector<256x256xf32>
    %4 = vector.broadcast %1 : vector<1x256xf32> to vector<256x256xf32>
    %5 = arith.addf %4, %3 : vector<256x256xf32>
    %6 = tpu.iota {dimensions = array<i32: 1>} : vector<1x256xi32>
    %cst_5 = arith.constant dense<0x7F800000> : vector<256xf32>
    %7 = vector.multi_reduction <minimumf>, %5, %cst_5 [1] : vector<256x256xf32> to vector<256xf32>
    %8 = vector.shape_cast %7 : vector<256xf32> to vector<256x1xf32>
    %9 = vector.broadcast %8 : vector<256x1xf32> to vector<256x256xf32>
    %10 = arith.cmpf ole, %5, %9 : vector<256x256xf32>
    %c256_i32 = arith.constant 256 : i32
    %11 = vector.shape_cast %6 : vector<1x256xi32> to vector<1x256xi32>
    %12 = vector.broadcast %11 : vector<1x256xi32> to vector<256x256xi32>
    %13 = vector.broadcast %c256_i32 : i32 to vector<256x256xi32>
    %14 = arith.select %10, %12, %13 : vector<256x256xi1>, vector<256x256xi32>
    %cst_6 = arith.constant dense<2147483647> : vector<256xi32>
    %15 = vector.multi_reduction <minsi>, %14, %cst_6 [1] : vector<256x256xi32> to vector<256xi32>
    %16 = vector.shape_cast %15 : vector<256xi32> to vector<256x1xi32>
    %17 = vector.broadcast %6 : vector<1x256xi32> to vector<256x256xi32>
    %18 = vector.broadcast %16 : vector<256x1xi32> to vector<256x256xi32>
    %19 = arith.cmpi eq, %17, %18 : vector<256x256xi32>
    %20 = arith.extui %19 : vector<256x256xi1> to vector<256x256xi32>
    %21 = arith.sitofp %20 : vector<256x256xi32> to vector<256x256xf32>
    %c0_7 = arith.constant 0 : index
    %c0_8 = arith.constant 0 : index
    %22 = vector.load %arg4[%c0_7, %c0_8] : memref<256x32xf32, #tpu.memory_space<vmem>>, vector<256x32xf32>
    %cst_9 = arith.constant dense<0.000000e+00> : vector<256x32xf32>
    %23 = tpu.matmul %21, %22, %cst_9 {dimension_numbers = #tpu.dot_dimension_numbers<[1], [0], [0], [1], [0, 0, 1, 1], [], []>} : vector<256x256xf32>, vector<256x32xf32>, vector<256x32xf32> -> vector<256x32xf32>
    %c0_10 = arith.constant 0 : index
    %c0_11 = arith.constant 0 : index
    %24 = vector.load %arg6[%c0_10, %c0_11] : memref<256x32xf32, #tpu.memory_space<vmem>>, vector<256x32xf32>
    tpu.vector_store %arg6[%c0_10, %c0_11], %23 {strides = array<i32>} : memref<256x32xf32, #tpu.memory_space<vmem>>, vector<256x32xf32>,
    %25 = vector.shape_cast %16 : vector<256x1xi32> to vector<1x1x256xi32>
    %c0_12 = arith.constant 0 : index
    %c0_13 = arith.constant 0 : index
    %c0_14 = arith.constant 0 : index
    %26 = vector.load %arg7[%c0_12, %c0_13, %c0_14] : memref<1x1x256xi32, #tpu.memory_space<vmem>>, vector<1x1x256xi32>
    tpu.vector_store %arg7[%c0_12, %c0_13, %c0_14], %25 {strides = array<i32>} : memref<1x1x256xi32, #tpu.memory_space<vmem>>, vector<1x1x256xi32>,
    %27 = arith.subf %23, %0 : vector<256x32xf32>
    %28 = arith.mulf %27, %27 : vector<256x32xf32>
    %cst_15 = arith.constant dense<0.000000e+00> : vector<32xf32>
    %29 = vector.multi_reduction <add>, %28, %cst_15 [0] : vector<256x32xf32> to vector<32xf32>
    %30 = vector.shape_cast %29 : vector<32xf32> to vector<1x32xf32>
    %c0_i32 = arith.constant 0 : i32
    %31 = arith.cmpi eq, %arg1, %c0_i32 : i32
    %32 = arith.extui %31 : i1 to i32
    %c0_i32_16 = arith.constant 0 : i32
    %33 = arith.cmpi ne, %32, %c0_i32_16 : i32
    scf.if %33 {
      %cst_21 = arith.constant 0.000000e+00 : f32
      %37 = vector.broadcast %cst_21 : f32 to vector<8x128xf32>
      %c0_22 = arith.constant 0 : index
      %c0_23 = arith.constant 0 : index
      %38 = vector.load %arg8[%c0_22, %c0_23] : memref<8x128xf32, #tpu.memory_space<vmem>>, vector<8x128xf32>
      tpu.vector_store %arg8[%c0_22, %c0_23], %37 {strides = array<i32>} : memref<8x128xf32, #tpu.memory_space<vmem>>, vector<8x128xf32>,
    } else {
    }
    %c0_17 = arith.constant 0 : index
    %c0_18 = arith.constant 0 : index
    %34 = vector.load %arg8[%c0_17, %c0_18] : memref<8x128xf32, #tpu.memory_space<vmem>>, vector<1x32xf32>
    %35 = arith.addf %34, %30 : vector<1x32xf32>
    %c0_19 = arith.constant 0 : index
    %c0_20 = arith.constant 0 : index
    %36 = vector.load %arg8[%c0_19, %c0_20] : memref<8x128xf32, #tpu.memory_space<vmem>>, vector<1x32xf32>
    tpu.vector_store %arg8[%c0_19, %c0_20], %35 {strides = array<i32>} : memref<8x128xf32, #tpu.memory_space<vmem>>, vector<1x32xf32>,
    return
  }
  func.func @transform_0(%arg0: i32, %arg1: i32) -> (i32, i32) {
    %c1_i32 = arith.constant 1 : i32
    %0 = arith.muli %arg0, %c1_i32 : i32
    %1 = arith.addi %0, %arg1 : i32
    %c0_i32 = arith.constant 0 : i32
    %c0_i32_0 = arith.constant 0 : i32
    return %1, %c0_i32 : i32, i32
  }
  func.func @transform_1(%arg0: i32, %arg1: i32) -> (i32, i32) {
    %c0_i32 = arith.constant 0 : i32
    %c0_i32_0 = arith.constant 0 : i32
    %c0_i32_1 = arith.constant 0 : i32
    return %c0_i32, %c0_i32_0 : i32, i32
  }
  func.func @transform_2(%arg0: i32, %arg1: i32) -> (i32, i32) {
    %c0_i32 = arith.constant 0 : i32
    %c0_i32_0 = arith.constant 0 : i32
    %c0_i32_1 = arith.constant 0 : i32
    return %c0_i32, %c0_i32_0 : i32, i32
  }
  func.func @transform_3(%arg0: i32, %arg1: i32) -> (i32, i32) {
    %c0_i32 = arith.constant 0 : i32
    %c0_i32_0 = arith.constant 0 : i32
    %c0_i32_1 = arith.constant 0 : i32
    return %c0_i32, %c0_i32_0 : i32, i32
  }
  func.func @transform_4(%arg0: i32, %arg1: i32) -> (i32, i32) {
    %c1_i32 = arith.constant 1 : i32
    %0 = arith.muli %arg0, %c1_i32 : i32
    %1 = arith.addi %0, %arg1 : i32
    %c0_i32 = arith.constant 0 : i32
    %c0_i32_0 = arith.constant 0 : i32
    return %1, %c0_i32 : i32, i32
  }
  func.func @transform_5(%arg0: i32, %arg1: i32) -> (i32, i32, i32) {
    %c1_i32 = arith.constant 1 : i32
    %0 = arith.muli %arg0, %c1_i32 : i32
    %1 = arith.addi %0, %arg1 : i32
    %c0_i32 = arith.constant 0 : i32
    %c0_i32_0 = arith.constant 0 : i32
    %c0_i32_1 = arith.constant 0 : i32
    return %1, %c0_i32, %c0_i32_0 : i32, i32, i32
  }
  func.func @transform_6(%arg0: i32, %arg1: i32) -> (i32, i32) {
    %c0_i32 = arith.constant 0 : i32
    %c0_i32_0 = arith.constant 0 : i32
    return %arg0, %c0_i32 : i32, i32
  }
}

</mosaic_0001>

<bundles_post_ra>
// kernel: tpu_custom_call.1
= control target key start
LH: loop header
LB: loop body
LE: loop exit
PB: predicated region body
PF: predicated region fallthrough
CT: control target
= control target key end

     0   :  { %s5527_s0 = inlined_call_operand.vmem [shape: f32[512,32], index: 0, kind: input, shape index: {}]   ;;  %s5528_s1 = inlined_call_operand.vmem [shape: f32[32,256], index: 1, kind: input, shape index: {}]   ;;  %s5529_s2 = inlined_call_operand.vmem [shape: f32[256,32], index: 2, kind: input, shape index: {}]   ;;  %s5530_s3 = inlined_call_operand.vmem [shape: f32[1,256], index: 3, kind: input, shape index: {}]   ;;  %s5531_s4 = inlined_call_operand.vmem [shape: f32[512,32], index: 4, kind: output, shape index: {0}]   ;;  %s5532_s5 = inlined_call_operand.hbm [shape: s32[2,1,256], index: 5, kind: output, shape index: {1}]   ;;  %s5533_s6 = inlined_call_operand.hbm [shape: f32[16,128], index: 6, kind: output, shape index: {2}]  }
   0x1   :  { %5544 = sst [smem:[#allocation15_spill]] %s5527_s0 }
   0x2   :  { %12 = vsyncpa [#allocation3], 0 }
   0x3   :  { %14 = vsyncpa [#allocation3 + $0x1], 0 }
   0x4   :  { %15 = vsyncpa [#allocation5], 0 }
   0x5   :  { %17 = vsyncpa [#allocation5 + $0x1], 0  ;;  %s3509_s21 = smov 0   ;;  %s3511_s22 = smov 0  }
   0x6   :  { %s3513_s23 = smov 0   ;;  %s3515_s24 = smov 0  }
   0x7   :  { %s3517_s25 = smov 0   ;;  %s3519_s26 = smov 0  }
   0x8 LB: > { %s3020_s27 = sadd.s32 4294967295, %s3469_s26   ;;  %s3021_s28 = sadd.s32 4294967294, %s3469_s26   ;;  %s3469_s26 = sphi %s3519_s26, %s23_s26   ;;  %s3465_s25 = sphi %s3517_s25, %s5576_s25   ;;  %s3461_s24 = sphi %s3515_s24, %s5575_s24   ;;  %s3457_s23 = sphi %s3513_s23, %s5574_s23   ;;  %s3453_s22 = sphi %s3511_s22, %s5573_s22   ;;  %s3449_s21 = sphi %s3509_s21, %s5572_s21  }
   0x9   : > { %s35_s29 = sadd.s32 1, %s3465_s25  ;;  %s163_s30 = sadd.s32 1, %s3457_s23 }
   0xa   : > { %p37_p0 = scmp.ge.s32.totalorder %s35_s29, 2  ;;  %p173_p1 = scmp.ne.s32.totalorder %s3457_s23, %s3453_s22 }
   0xb   : > { %p174_p2 = scmp.eq.s32.totalorder %s3020_s27, 1  ;;  %p179_p3 = scmp.ne.s32.totalorder %s3453_s22, %s3449_s21 }
   0xc   : > { %s5578_s29 = smov (%p37_p0, %s35_s29), 0  ;;  %p180_p5 = scmp.eq.s32.totalorder %s3021_s28, 1 }
   0xd   : > { %p3549_p4 = por %p174_p2, %p173_p1  ;;  %s160_s8 = ssub.s32 %s3465_s25, %s5578_s29 }
   0xe   : > { %p3024_p6 = scmp.ge.s32.totalorder %s3469_s26, 1  ;;  %p161_p7 = scmp.eq.s32.totalorder %s160_s8, 0 }
   0xf   : > { %p3556_p8 = por %p180_p5, %p179_p3  ;;  %p244_p9 = scmp.lt.s32.totalorder %s3469_s26, 3 }
  0x10   : > { %s3562_s10 = scalar_select %p161_p7, %s3457_s23, %s163_s30  }
  0x11   : > { %p245_p10 = pnand %p3024_p6, %p244_p9 }
  0x13   : > { %248 = sbr.rel (%p245_p10) target bundleno = 1318 (0x526), region = 36 }
  0x18   : > { %v342_v0 = vld [vmem:[%s5528_s1 + $0x30] sm:$0xff]  ;;  %v343_v1 = vld [vmem:[%s5528_s1 + $0x38] sm:$0xff]  ;;  %v340_v2 = vld [vmem:[%s5528_s1 + $0x20] sm:$0xff]  ;;  %s3027_s17 = sshll.u32 %s3461_s24, 5  ;;  %vm344_vm0 = vcmask 261120   ;;  %s5547_s0 = sld [smem:[#allocation15_spill]] }
  0x19   : > { %453 = vmatpush.msra.mxu0 %v342_v0  ;;  %566 = vmatpush.msra.mxu1 %v343_v1  ;;  %v341_v3 = vld [vmem:[%s5528_s1 + $0x28] sm:$0xff]  ;;  %p288_p11 = scmp.lt.s32.totalorder %s3027_s17, 63  ;;  %v338_v4 = vld [vmem:[%s5528_s1 + $0x10] sm:$0xff]  ;;  %v339_v5 = vld [vmem:[%s5528_s1 + $0x18] sm:$0xff]  ;;  %s3226_s13 = sshll.u32 %s3461_s24, 3 }
  0x1a   : > { %v336_v6 = vld [vmem:[%s5528_s1] sm:$0xff]  ;;  %v337_v7 = vld [vmem:[%s5528_s1 + $0x8] sm:$0xff]  ;;  %s3379_s20 = scalar_lea.hbm %s5532_s5, 4 }
  0x1b   : > { %454 = vmatpush.msra.mxu0 %v340_v2  ;;  %567 = vmatpush.msra.mxu1 %v341_v3  ;;  %s5580_s17 = smov (!%p288_p11, %s3027_s17), 63  ;;  %v335_v23 = vld [vmem:[%s5530_s3] sm:$0x3] }
  0x1c   : > { %s3028_s14 = sshll.u32 %s5580_s17, 3  ;;  %v3648_v25 = vperm.slane %v335_v23, 0  ;;  %v3650_v26 = vperm.slane %v335_v23, 1  ;;  %s5398_s17 = sand.u32 1, %s3453_s22  }
  0x1d   : > { %455 = vmatpush.msra.mxu0 %v338_v4  ;;  %568 = vmatpush.msra.mxu1 %v339_v5  ;;  %s4523_s27 = scalar_lea.vmem %s5531_s4, %s3028_s14  ;;  %s3025_s30 = sshll.u32 %s5398_s17, 1 }
  0x1e   : > { %s3597_s18 = scalar_lea.vmem %s5547_s0, %s3028_s14  ;;  %s3026_s14 = sshll.u32 %s5398_s17, 3 }
  0x1f   : > { %456 = vmatpush.msra.mxu0 %v336_v6  ;;  %569 = vmatpush.msra.mxu1 %v337_v7  ;;  %v303_v8 = vld [vmem:[%s3597_s18] sm:$0xff]  ;;  %v304_v9 = vld [vmem:[%s3597_s18 + $0x8] sm:$0xff]  ;;  %v305_v10 = vld [vmem:[%s3597_s18 + $0x10] sm:$0xff]  ;;  %s5408_s28 = scalar_lea.vmem [#allocation4], %s3026_s14  ;;  %s278_s15 = scalar_lea.vmem [#allocation2], %s3025_s30 }
  0x20   : > { %3031 = vmatmul.msk.f32.vlgmr.msra.gmra.mxu0 %vm344_vm0, %v303_v8  ;;  %3063 = vmatmul.msk.f32.vlgmr.msra.gmra.mxu1 %vm344_vm0, %v303_v8  ;;  %v306_v11 = vld [vmem:[%s3597_s18 + $0x18] sm:$0xff]  ;;  %v307_v12 = vld [vmem:[%s3597_s18 + $0x20] sm:$0xff]  ;;  %v308_v13 = vld [vmem:[%s3597_s18 + $0x28] sm:$0xff]  ;;  %v5534_v8 = vlaneseq  ;;  %s2876_s16 = sshll.u32 %s278_s15, 4  ;;  %s2890_s14 = sshll.u32 %s5408_s28, 4  ;;  %s2877_s16 = int_to_ptr.vmem [resolvable:$true] %s2876_s16  ;;  %s2891_s14 = int_to_ptr.vmem [resolvable:$true] %s2890_s14 }
  0x21   : > { %v309_v14 = vld [vmem:[%s3597_s18 + $0x30] sm:$0xff]  ;;  %v310_v15 = vld [vmem:[%s3597_s18 + $0x38] sm:$0xff]  ;;  %v311_v16 = vld [vmem:[%s3597_s18 + $0x40] sm:$0xff]  ;;  %s2853_s30 = scalar_lea.sflag [#allocation3], %s5398_s17 }
  0x22   : > { %v312_v17 = vld [vmem:[%s3597_s18 + $0x48] sm:$0xff]  ;;  %v313_v18 = vld [vmem:[%s3597_s18 + $0x50] sm:$0xff]  ;;  %v314_v19 = vld [vmem:[%s3597_s18 + $0x58] sm:$0xff] }
  0x23   : > { %v315_v20 = vld [vmem:[%s3597_s18 + $0x60] sm:$0xff]  ;;  %v316_v24 = vld [vmem:[%s3597_s18 + $0x68] sm:$0xff]  ;;  %v317_v37 = vld [vmem:[%s3597_s18 + $0x70] sm:$0xff] }
  0x24   : > { %v318_v43 = vld [vmem:[%s3597_s18 + $0x78] sm:$0xff]  ;;  %v319_v49 = vld [vmem:[%s3597_s18 + $0x80] sm:$0xff]  ;;  %v320_v55 = vld [vmem:[%s3597_s18 + $0x88] sm:$0xff] }
  0x25   : > { %v321_v61 = vld [vmem:[%s3597_s18 + $0x90] sm:$0xff] }
  0x28   : > { %3032 = vmatmul.msk.f32.gmra.mxu0 %vm344_vm0, %v304_v9  ;;  %3064 = vmatmul.msk.f32.gmra.mxu1 %vm344_vm0, %v304_v9 }
  0x30   : > { %3033 = vmatmul.msk.f32.gmra.mxu0 %vm344_vm0, %v305_v10  ;;  %3065 = vmatmul.msk.f32.gmra.mxu1 %vm344_vm0, %v305_v10 }
  0x38   : > { %3034 = vmatmul.msk.f32.gmra.mxu0 %vm344_vm0, %v306_v11  ;;  %3066 = vmatmul.msk.f32.gmra.mxu1 %vm344_vm0, %v306_v11  ;;  %v3732_v11 = vand.u32 127, %v5534_v8 }
  0x40   : > { %3035 = vmatmul.msk.f32.gmra.mxu0 %vm344_vm0, %v307_v12  ;;  %3067 = vmatmul.msk.f32.gmra.mxu1 %vm344_vm0, %v307_v12  ;;  %v3735_v12 = vadd.s32 128, %v3732_v11 }
  0x48   : > { %3036 = vmatmul.msk.f32.gmra.mxu0 %vm344_vm0, %v308_v13  ;;  %3068 = vmatmul.msk.f32.gmra.mxu1 %vm344_vm0, %v308_v13 }
  0x50   : > { %3037 = vmatmul.msk.f32.gmra.mxu0 %vm344_vm0, %v309_v14  ;;  %3069 = vmatmul.msk.f32.gmra.mxu1 %vm344_vm0, %v309_v14 }
  0x58   : > { %3038 = vmatmul.msk.f32.gmra.mxu0 %vm344_vm0, %v310_v15  ;;  %3070 = vmatmul.msk.f32.gmra.mxu1 %vm344_vm0, %v310_v15 }
  0x60   : > { %3039 = vmatmul.msk.f32.gmra.mxu0 %vm344_vm0, %v311_v16  ;;  %3071 = vmatmul.msk.f32.gmra.mxu1 %vm344_vm0, %v311_v16 }
  0x68   : > { %3040 = vmatmul.msk.f32.gmra.mxu0 %vm344_vm0, %v312_v17  ;;  %3072 = vmatmul.msk.f32.gmra.mxu1 %vm344_vm0, %v312_v17 }
  0x70   : > { %3041 = vmatmul.msk.f32.gmra.mxu0 %vm344_vm0, %v313_v18  ;;  %3073 = vmatmul.msk.f32.gmra.mxu1 %vm344_vm0, %v313_v18 }
  0x78   : > { %3042 = vmatmul.msk.f32.gmra.mxu0 %vm344_vm0, %v314_v19  ;;  %3074 = vmatmul.msk.f32.gmra.mxu1 %vm344_vm0, %v314_v19 }
  0x80   : > { %3043 = vmatmul.msk.f32.gmra.mxu0 %vm344_vm0, %v315_v20  ;;  %3075 = vmatmul.msk.f32.gmra.mxu1 %vm344_vm0, %v315_v20 }
  0x88   : > { %3044 = vmatmul.msk.f32.gmra.mxu0 %vm344_vm0, %v316_v24  ;;  %3076 = vmatmul.msk.f32.gmra.mxu1 %vm344_vm0, %v316_v24 }
  0x90   : > { %3045 = vmatmul.msk.f32.gmra.mxu0 %vm344_vm0, %v317_v37  ;;  %3077 = vmatmul.msk.f32.gmra.mxu1 %vm344_vm0, %v317_v37 }
  0x98   : > { %3046 = vmatmul.msk.f32.gmra.mxu0 %vm344_vm0, %v318_v43  ;;  %3078 = vmatmul.msk.f32.gmra.mxu1 %vm344_vm0, %v318_v43 }
  0x9d   : > { %v3638_v21 = vpop.f32.mrf.mxu0  ;;  %v3640_v22 = vpop.f32.mrf.mxu1 }
  0xa0   : > { %3047 = vmatmul.msk.f32.gmra.mxu0 %vm344_vm0, %v319_v49  ;;  %3079 = vmatmul.msk.f32.gmra.mxu1 %vm344_vm0, %v319_v49 }
  0xa5   : > { %v461_v27 = vpop.f32.mrf.mxu0  ;;  %v574_v28 = vpop.f32.mrf.mxu1 }
  0xa6   : > { %v3653_v29 = vadd.f32 %v3648_v25, %v461_v27  ;;  %v3656_v30 = vadd.f32 %v3650_v26, %v574_v28 }
  0xa8   : > { %v742_v31 = vmin.f32 %v3653_v29, %v3656_v30  ;;  %3048 = vmatmul.msk.f32.gmra.mxu0 %vm344_vm0, %v320_v55  ;;  %3080 = vmatmul.msk.f32.gmra.mxu1 %vm344_vm0, %v320_v55 }
  0xaa   : > { %743 = vmin.xlane.f32.xlu0 %v742_v31 }
  0xad   : > { %v464_v32 = vpop.f32.mrf.mxu0  ;;  %v577_v33 = vpop.f32.mrf.mxu1 }
  0xae   : > { %v3661_v34 = vadd.f32 %v3648_v25, %v464_v32  ;;  %v3664_v35 = vadd.f32 %v3650_v26, %v577_v33  ;;  %v322_v32 = vld [vmem:[%s3597_s18 + $0x98] sm:$0xff] }
  0xb0   : > { %v745_v36 = vmin.f32 %v3661_v34, %v3664_v35  ;;  %3049 = vmatmul.msk.f32.gmra.mxu0 %vm344_vm0, %v321_v61  ;;  %3081 = vmatmul.msk.f32.gmra.mxu1 %vm344_vm0, %v321_v61 }
  0xb2   : > { %746 = vmin.xlane.f32.xlu0 %v745_v36 }
  0xb5   : > { %v467_v38 = vpop.f32.mrf.mxu0  ;;  %v580_v39 = vpop.f32.mrf.mxu1 }
  0xb6   : > { %v3672_v40 = vadd.f32 %v3648_v25, %v467_v38  ;;  %v3675_v41 = vadd.f32 %v3650_v26, %v580_v39 }
  0xb8   : > { %v748_v42 = vmin.f32 %v3672_v40, %v3675_v41  ;;  %3050 = vmatmul.msk.f32.gmra.mxu0 %vm344_vm0, %v322_v32  ;;  %3082 = vmatmul.msk.f32.gmra.mxu1 %vm344_vm0, %v322_v32  ;;  %v326_v32 = vld [vmem:[%s3597_s18 + $0xb8] sm:$0xff] }
  0xba   : > { %749 = vmin.xlane.f32.xlu1 %v748_v42 }
  0xbd   : > { %v470_v44 = vpop.f32.mrf.mxu0  ;;  %v583_v45 = vpop.f32.mrf.mxu1 }
  0xbe   : > { %v3683_v46 = vadd.f32 %v3648_v25, %v470_v44  ;;  %v3686_v47 = vadd.f32 %v3650_v26, %v583_v45  ;;  %v323_v44 = vld [vmem:[%s3597_s18 + $0xa0] sm:$0xff] }
  0xc0   : > { %v751_v48 = vmin.f32 %v3683_v46, %v3686_v47  ;;  %3051 = vmatmul.msk.f32.gmra.mxu0 %vm344_vm0, %v323_v44  ;;  %3083 = vmatmul.msk.f32.gmra.mxu1 %vm344_vm0, %v323_v44 }
  0xc2   : > { %752 = vmin.xlane.f32.xlu1 %v751_v48 }
  0xc5   : > { %v473_v50 = vpop.f32.mrf.mxu0  ;;  %v586_v51 = vpop.f32.mrf.mxu1 }
  0xc6   : > { %v3694_v52 = vadd.f32 %v3648_v25, %v473_v50  ;;  %v3697_v53 = vadd.f32 %v3650_v26, %v586_v51 }
  0xc8   : > { %v754_v54 = vmin.f32 %v3694_v52, %v3697_v53 }
  0xca   : > { %755 = vmin.xlane.f32.xlu2 %v754_v54 }
  0xcd   : > { %v476_v56 = vpop.f32.mrf.mxu0  ;;  %v589_v57 = vpop.f32.mrf.mxu1 }
  0xce   : > { %v3705_v58 = vadd.f32 %v3648_v25, %v476_v56  ;;  %v3708_v59 = vadd.f32 %v3650_v26, %v589_v57 }
  0xd0   : > { %v757_v60 = vmin.f32 %v3705_v58, %v3708_v59 }
  0xd2   : > { %758 = vmin.xlane.f32.xlu2 %v757_v60  ;;  %v324_v60 = vld [vmem:[%s3597_s18 + $0xa8] sm:$0xff] }
  0xd3   : > { %3052 = vmatmul.msk.f32.gmra.mxu0 %vm344_vm0, %v324_v60  ;;  %3084 = vmatmul.msk.f32.gmra.mxu1 %vm344_vm0, %v324_v60  ;;  %v327_v60 = vld [vmem:[%s3597_s18 + $0xc0] sm:$0xff] }
  0xd5   : > { %v479_v62 = vpop.f32.mrf.mxu0  ;;  %v592_v63 = vpop.f32.mrf.mxu1 }
  0xd6   : > { %v3716_v0 = vadd.f32 %v3648_v25, %v479_v62  ;;  %v3719_v1 = vadd.f32 %v3650_v26, %v592_v63 }
  0xd8   : > { %v760_v2 = vmin.f32 %v3716_v0, %v3719_v1 }
  0xda   : > { %761 = vmin.xlane.f32.xlu0 %v760_v2 }
  0xdd   : > { %v482_v3 = vpop.f32.mrf.mxu0  ;;  %v595_v4 = vpop.f32.mrf.mxu1 }
  0xde   : > { %v3724_v5 = vadd.f32 %v3648_v25, %v482_v3  ;;  %v3727_v6 = vadd.f32 %v3650_v26, %v595_v4 }
  0xe0   : > { %v763_v7 = vmin.f32 %v3724_v5, %v3727_v6 }
  0xe2   : > { %764 = vmin.xlane.f32.xlu2 %v763_v7 }
  0xe5   : > { %v485_v9 = vpop.f32.mrf.mxu0  ;;  %v598_v10 = vpop.f32.mrf.mxu1 }
  0xe6   : > { %v3752_v28 = vadd.f32 %v3648_v25, %v485_v9 }
  0xed   : > { %v488_v14 = vpop.f32.mrf.mxu0  ;;  %v601_v15 = vpop.f32.mrf.mxu1 }
  0xee   : > { %v3773_v42 = vadd.f32 %v3648_v25, %v488_v14  ;;  %v3776_v43 = vadd.f32 %v3650_v26, %v601_v15 }
  0xf0   : > { %v769_v50 = vmin.f32 %v3773_v42, %v3776_v43 }
  0xf5   : > { %v604_v31 = vpop.f32.mrf.mxu1 }
  0xf6   : > { %v3797_v57 = vadd.f32 %v3650_v26, %v604_v31 }
  0xfd   : > { %v607_v48 = vpop.f32.mrf.mxu1 }
 0x105   : > { %v610_v2 = vpop.f32.mrf.mxu1 }
 0x11d   : > { %v744_v13 = vpop.xlane.xlu0 %743 }
 0x11e   : > { %vm837_vm1 = vcmp.le.f32.partialorder %v3653_v29, %v744_v13  ;;  %vm838_vm2 = vcmp.le.f32.partialorder %v3656_v30, %v744_v13  ;;  %v3755_v29 = vadd.f32 %v3650_v26, %v598_v10  ;;  %v491_v30 = vpop.f32.mrf.mxu0  ;;  %v3818_v10 = vadd.f32 %v3650_v26, %v610_v2  ;;  %v325_v13 = vld [vmem:[%s3597_s18 + $0xb0] sm:$0xff]  ;;  %v328_v2 = vld [vmem:[%s3597_s18 + $0xc8] sm:$0xff] }
 0x11f   : > { %v901_v16 = vsel %vm837_vm1, %v3732_v11, 256  ;;  %v902_v17 = vsel %vm838_vm2, %v3735_v12, 256  ;;  %v3794_v56 = vadd.f32 %v3648_v25, %v491_v30  ;;  %3053 = vmatmul.msk.f32.gmra.mxu0 %vm344_vm0, %v325_v13  ;;  %3085 = vmatmul.msk.f32.gmra.mxu1 %vm344_vm0, %v325_v13 }
 0x120   : > { %vm979_vm3 = vcmp.lt.s32.totalorder %v901_v16, %v902_v17  ;;  %v766_v36 = vmin.f32 %v3752_v28, %v3755_v29 }
 0x121   : > { %v3741_v18 = vsel %vm979_vm3, %v901_v16, %v902_v17  ;;  %v772_v62 = vmin.f32 %v3794_v56, %v3797_v57 }
 0x122   : > { %v982_v19 = vshra.s32 %v3741_v18, 16 }
 0x124   : > { %v3744_v20 = vcvt.s32.f32 %v982_v19 }
 0x125   : > { %v747_v23 = vpop.xlane.xlu0 %746 }
 0x126   : > { %vm839_vm4 = vcmp.le.f32.partialorder %v3661_v34, %v747_v23  ;;  %vm840_vm5 = vcmp.le.f32.partialorder %v3664_v35, %v747_v23  ;;  %985 = vmin.xlane.f32.xlu1 %v3744_v20 }
 0x127   : > { %v903_v24 = vsel %vm839_vm4, %v3732_v11, 256  ;;  %v904_v27 = vsel %vm840_vm5, %v3735_v12, 256  ;;  %3054 = vmatmul.msk.f32.gmra.mxu0 %vm344_vm0, %v326_v32  ;;  %3086 = vmatmul.msk.f32.gmra.mxu1 %vm344_vm0, %v326_v32 }
 0x128   : > { %vm995_vm6 = vcmp.lt.s32.totalorder %v903_v24, %v904_v27 }
 0x129   : > { %v3758_v33 = vsel %vm995_vm6, %v903_v24, %v904_v27  ;;  %v613_v24 = vpop.f32.mrf.mxu1 }
 0x12a   : > { %v998_v34 = vshra.s32 %v3758_v33, 16 }
 0x12c   : > { %v3763_v35 = vcvt.s32.f32 %v998_v34  ;;  %v3846_v34 = vadd.f32 %v3648_v25, %v3638_v21 }
 0x12d   : > { %v750_v37 = vpop.xlane.xlu1 %749 }
 0x12e   : > { %vm841_vm7 = vcmp.le.f32.partialorder %v3672_v40, %v750_v37  ;;  %vm842_vm8 = vcmp.le.f32.partialorder %v3675_v41, %v750_v37  ;;  %1001 = vmin.xlane.f32.xlu0 %v3763_v35  ;;  %767 = vmin.xlane.f32.xlu1 %v766_v36  ;;  %v494_v41 = vpop.f32.mrf.mxu0  ;;  %v3850_v36 = vadd.f32 %v3650_v26, %v3640_v22 }
 0x12f   : > { %v905_v38 = vsel %vm841_vm7, %v3732_v11, 256  ;;  %v906_v39 = vsel %vm842_vm8, %v3735_v12, 256  ;;  %v3822_v14 = vadd.f32 %v3648_v25, %v494_v41  ;;  %3055 = vmatmul.msk.f32.gmra.mxu0 %vm344_vm0, %v327_v60  ;;  %3087 = vmatmul.msk.f32.gmra.mxu1 %vm344_vm0, %v327_v60  ;;  %v981_v60 = vand.u32 65535, %v3741_v18 }
 0x130   : > { %vm1011_vm9 = vcmp.lt.s32.totalorder %v905_v38, %v906_v39  ;;  %v739_v37 = vmin.f32 %v3846_v34, %v3850_v36 }
 0x131   : > { %v3779_v45 = vsel %vm1011_vm9, %v905_v38, %v906_v39  ;;  %v616_v39 = vpop.f32.mrf.mxu1 }
 0x132   : > { %v1014_v40 = vshra.s32 %v3779_v45, 16 }
 0x134   : > { %v3784_v49 = vcvt.s32.f32 %v1014_v40 }
 0x135   : > { %v753_v51 = vpop.xlane.xlu1 %752 }
 0x136   : > { %vm843_vm10 = vcmp.le.f32.partialorder %v3683_v46, %v753_v51  ;;  %vm844_vm11 = vcmp.le.f32.partialorder %v3686_v47, %v753_v51  ;;  %1017 = vmin.xlane.f32.xlu2 %v3784_v49  ;;  %770 = vmin.xlane.f32.xlu0 %v769_v50  ;;  %v497_v63 = vpop.f32.mrf.mxu0 }
 0x137   : > { %v907_v54 = vsel %vm843_vm10, %v3732_v11, 256  ;;  %v908_v55 = vsel %vm844_vm11, %v3735_v12, 256  ;;  %v3815_v9 = vadd.f32 %v3648_v25, %v497_v63  ;;  %3056 = vmatmul.msk.f32.gmra.mxu0 %vm344_vm0, %v328_v2  ;;  %3088 = vmatmul.msk.f32.gmra.mxu1 %vm344_vm0, %v328_v2 }
 0x138   : > { %vm1027_vm12 = vcmp.lt.s32.totalorder %v907_v54, %v908_v55 }
 0x139   : > { %v3800_v61 = vsel %vm1027_vm12, %v907_v54, %v908_v55  ;;  %v778_v16 = vmin.f32 %v3815_v9, %v3818_v10  ;;  %v3884_v55 = vadd.f32 %v3650_v26, %v616_v39  ;;  %v333_v39 = vld [vmem:[%s3597_s18 + $0xf0] sm:$0xff] }
 0x13a   : > { %v1030_v46 = vshra.s32 %v3800_v61, 16 }
 0x13c   : > { %v3805_v47 = vcvt.s32.f32 %v1030_v46 }
 0x13d   : > { %v756_v3 = vpop.xlane.xlu2 %755 }
 0x13e   : > { %vm845_vm13 = vcmp.le.f32.partialorder %v3694_v52, %v756_v3  ;;  %vm846_vm14 = vcmp.le.f32.partialorder %v3697_v53, %v756_v3  ;;  %1033 = vmin.xlane.f32.xlu1 %v3805_v47  ;;  %773 = vmin.xlane.f32.xlu2 %v772_v62  ;;  %v3825_v52 = vadd.f32 %v3650_v26, %v607_v48  ;;  %v500_v23 = vpop.f32.mrf.mxu0  ;;  %v619_v62 = vpop.f32.mrf.mxu1 }
 0x13f   : > { %v909_v4 = vsel %vm845_vm13, %v3732_v11, 256  ;;  %v910_v7 = vsel %vm846_vm14, %v3735_v12, 256  ;;  %v3867_v41 = vadd.f32 %v3648_v25, %v500_v23  ;;  %v3870_v48 = vadd.f32 %v3650_v26, %v613_v24 }
 0x140   : > { %vm1043_vm15 = vcmp.lt.s32.totalorder %v909_v4, %v910_v7  ;;  %v775_v19 = vmin.f32 %v3822_v14, %v3825_v52 }
 0x141   : > { %v3827_v53 = vsel %vm1043_vm15, %v909_v4, %v910_v7  ;;  %v781_v50 = vmin.f32 %v3867_v41, %v3870_v48  ;;  %v3896_v4 = vadd.f32 %v3650_v26, %v619_v62  ;;  %v983_v62 = vcvt.s32.f32 %v981_v60 }
 0x142   : > { %v1046_v15 = vshra.s32 %v3827_v53, 16 }
 0x144   : > { %v3834_v17 = vcvt.s32.f32 %v1046_v15 }
 0x145   : > { %v759_v27 = vpop.xlane.xlu2 %758 }
 0x146   : > { %vm847_vm1 = vcmp.le.f32.partialorder %v3705_v58, %v759_v27  ;;  %vm848_vm2 = vcmp.le.f32.partialorder %v3708_v59, %v759_v27  ;;  %1049 = vmin.xlane.f32.xlu0 %v3834_v17  ;;  %776 = vmin.xlane.f32.xlu1 %v775_v19  ;;  %v503_v22 = vpop.f32.mrf.mxu0  ;;  %v622_v13 = vpop.f32.mrf.mxu1 }
 0x147   : > { %v911_v30 = vsel %vm847_vm1, %v3732_v11, 256  ;;  %v912_v31 = vsel %vm848_vm2, %v3735_v12, 256  ;;  %779 = vmin.xlane.f32.xlu2 %v778_v16  ;;  %v3881_v54 = vadd.f32 %v3648_v25, %v503_v22  ;;  %v329_v16 = vld [vmem:[%s3597_s18 + $0xd0] sm:$0xff]  ;;  %v3907_v23 = vadd.f32 %v3650_v26, %v622_v13  ;;  %v332_v22 = vld [vmem:[%s3597_s18 + $0xe8] sm:$0xff] }
 0x148   : > { %vm1059_vm3 = vcmp.lt.s32.totalorder %v911_v30, %v912_v31  ;;  %3057 = vmatmul.msk.f32.gmra.mxu0 %vm344_vm0, %v329_v16  ;;  %3089 = vmatmul.msk.f32.gmra.mxu1 %vm344_vm0, %v329_v16 }
 0x149   : > { %v3852_v58 = vsel %vm1059_vm3, %v911_v30, %v912_v31  ;;  %v784_v63 = vmin.f32 %v3881_v54, %v3884_v55  ;;  %v330_v31 = vld [vmem:[%s3597_s18 + $0xd8] sm:$0xff] }
 0x14a   : > { %v1062_v59 = vshra.s32 %v3852_v58, 16 }
 0x14c   : > { %v3859_v38 = vcvt.s32.f32 %v1062_v59 }
 0x14d   : > { %v762_v21 = vpop.xlane.xlu0 %761 }
 0x14e   : > { %vm849_vm4 = vcmp.le.f32.partialorder %v3716_v0, %v762_v21  ;;  %vm850_vm5 = vcmp.le.f32.partialorder %v3719_v1, %v762_v21  ;;  %740 = vmin.xlane.f32.xlu1 %v739_v37  ;;  %v506_v46 = vpop.f32.mrf.mxu0  ;;  %v625_v30 = vpop.f32.mrf.mxu1  ;;  %v331_v21 = vld [vmem:[%s3597_s18 + $0xe0] sm:$0xff] }
 0x14f   : > { %v913_v44 = vsel %vm849_vm4, %v3732_v11, 256  ;;  %v914_v40 = vsel %vm850_vm5, %v3735_v12, 256  ;;  %1065 = vmin.xlane.f32.xlu2 %v3859_v38  ;;  %v3893_v3 = vadd.f32 %v3648_v25, %v506_v46  ;;  %v3918_v59 = vadd.f32 %v3650_v26, %v625_v30 }
 0x150   : > { %vm1075_vm6 = vcmp.lt.s32.totalorder %v913_v44, %v914_v40  ;;  %3058 = vmatmul.msk.f32.gmra.mxu0 %vm344_vm0, %v330_v31  ;;  %3090 = vmatmul.msk.f32.gmra.mxu1 %vm344_vm0, %v330_v31 }
 0x151   : > { %v3872_v0 = vsel %vm1075_vm6, %v913_v44, %v914_v40  ;;  %v787_v15 = vmin.f32 %v3893_v3, %v3896_v4  ;;  %v334_v40 = vld [vmem:[%s3597_s18 + $0xf8] sm:$0xff] }
 0x152   : > { %v1078_v1 = vshra.s32 %v3872_v0, 16 }
 0x154   : > { %v3877_v51 = vcvt.s32.f32 %v1078_v1 }
 0x155   : > { %v765_v44 = vpop.xlane.xlu2 %764 }
 0x156   : > { %1081 = vmin.xlane.f32.xlu0 %v3877_v51  ;;  %v509_v7 = vpop.f32.mrf.mxu0  ;;  %vm851_vm7 = vcmp.le.f32.partialorder %v3724_v5, %v765_v44  ;;  %vm852_vm8 = vcmp.le.f32.partialorder %v3727_v6, %v765_v44 }
 0x157   : > { %782 = vmin.xlane.f32.xlu2 %v781_v50  ;;  %v3904_v19 = vadd.f32 %v3648_v25, %v509_v7  ;;  %v915_v1 = vsel %vm851_vm7, %v3732_v11, 256  ;;  %v916_v50 = vsel %vm852_vm8, %v3735_v12, 256 }
 0x158   : > { %3059 = vmatmul.msk.f32.gmra.mxu0 %vm344_vm0, %v331_v21  ;;  %3091 = vmatmul.msk.f32.gmra.mxu1 %vm344_vm0, %v331_v21  ;;  %vm1091_vm9 = vcmp.lt.s32.totalorder %v915_v1, %v916_v50 }
 0x159   : > { %v790_v24 = vmin.f32 %v3904_v19, %v3907_v23  ;;  %v3945_v6 = vsel %vm1091_vm9, %v915_v1, %v916_v50 }
 0x15a   : > { %v1094_v2 = vshra.s32 %v3945_v6, 16 }
 0x15c   : > { %v3953_v18 = vcvt.s32.f32 %v1094_v2 }
 0x15e   : > { %v512_v27 = vpop.f32.mrf.mxu0 }
 0x15f   : > { %785 = vmin.xlane.f32.xlu2 %v784_v63  ;;  %v3915_v32 = vadd.f32 %v3648_v25, %v512_v27  ;;  %v997_v63 = vand.u32 65535, %v3758_v33 }
 0x160   : > { %3060 = vmatmul.msk.f32.gmra.mxu0 %vm344_vm0, %v332_v22  ;;  %3092 = vmatmul.msk.f32.gmra.mxu1 %vm344_vm0, %v332_v22 }
 0x161   : > { %v793_v37 = vmin.f32 %v3915_v32, %v3918_v59 }
 0x166   : > { %v515_v60 = vpop.f32.mrf.mxu0 }
 0x167   : > { %788 = vmin.xlane.f32.xlu2 %v787_v15  ;;  %v999_v15 = vcvt.s32.f32 %v997_v63 }
 0x168   : > { %3061 = vmatmul.msk.f32.gmra.mxu0 %vm344_vm0, %v333_v39  ;;  %3093 = vmatmul.msk.f32.gmra.mxu1 %vm344_vm0, %v333_v39 }
 0x16f   : > { %791 = vmin.xlane.f32.xlu2 %v790_v24 }
 0x170   : > { %3062 = vmatmul.msk.f32.gmra.mxu0 %vm344_vm0, %v334_v40  ;;  %3094 = vmatmul.msk.f32.gmra.mxu1 %vm344_vm0, %v334_v40 }
 0x177   : > { %794 = vmin.xlane.f32.xlu2 %v793_v37 }
 0x199   : > { %v3941_v46 = vpop.xlane.xlu1 %985 }
 0x19a   : > { %vm987_vm10 = vcmp.eq.f32.partialorder %v3744_v20, %v3941_v46 }
 0x19b   : > { %v988_v5 = vsel %vm987_vm10, %v983_v62, inf  ;;  %v628_v62 = vpop.f32.mrf.mxu1 }
 0x19c   : > { %989 = vmin.xlane.f32.xlu0 %v988_v5 }
 0x1a1   : > { %v3949_v7 = vpop.xlane.xlu0 %1001  ;;  %v768_v13 = vpop.xlane.xlu1 %767 }
 0x1a2   : > { %vm853_vm11 = vcmp.le.f32.partialorder %v3752_v28, %v768_v13  ;;  %vm854_vm12 = vcmp.le.f32.partialorder %v3755_v29, %v768_v13  ;;  %vm1003_vm13 = vcmp.eq.f32.partialorder %v3763_v35, %v3949_v7  ;;  %v1013_v28 = vand.u32 65535, %v3779_v45 }
 0x1a3   : > { %v917_v20 = vsel %vm853_vm11, %v3732_v11, 256  ;;  %v918_v16 = vsel %vm854_vm12, %v3735_v12, 256  ;;  %v1004_v33 = vsel %vm1003_vm13, %v999_v15, inf }
 0x1a4   : > { %vm1107_vm14 = vcmp.lt.s32.totalorder %v917_v20, %v918_v16  ;;  %1097 = vmin.xlane.f32.xlu0 %v3953_v18  ;;  %1005 = vmin.xlane.f32.xlu1 %v1004_v33  ;;  %v1015_v31 = vcvt.s32.f32 %v1013_v28 }
 0x1a5   : > { %v3960_v24 = vsel %vm1107_vm14, %v917_v20, %v918_v16 }
 0x1a6   : > { %v1110_v29 = vshra.s32 %v3960_v24, 16 }
 0x1a8   : > { %v3968_v35 = vcvt.s32.f32 %v1110_v29  ;;  %v631_v29 = vpop.f32.mrf.mxu1 }
 0x1a9   : > { %v3964_v27 = vpop.xlane.xlu2 %1017  ;;  %v771_v30 = vpop.xlane.xlu0 %770 }
 0x1aa   : > { %vm855_vm15 = vcmp.le.f32.partialorder %v3773_v42, %v771_v30  ;;  %vm856_vm1 = vcmp.le.f32.partialorder %v3776_v43, %v771_v30  ;;  %vm1019_vm2 = vcmp.eq.f32.partialorder %v3784_v49, %v3964_v27  ;;  %v1029_v42 = vand.u32 65535, %v3800_v61 }
 0x1ab   : > { %v919_v37 = vsel %vm855_vm15, %v3732_v11, 256  ;;  %v920_v21 = vsel %vm856_vm1, %v3735_v12, 256  ;;  %v1020_v45 = vsel %vm1019_vm2, %v1015_v31, inf }
 0x1ac   : > { %vm1123_vm3 = vcmp.lt.s32.totalorder %v919_v37, %v920_v21  ;;  %1113 = vmin.xlane.f32.xlu0 %v3968_v35  ;;  %1021 = vmin.xlane.f32.xlu1 %v1020_v45  ;;  %v1031_v40 = vcvt.s32.f32 %v1029_v42  ;;  %v4023_v42 = vadd.f32 %v3650_v26, %v628_v62 }
 0x1ad   : > { %v3975_v22 = vsel %vm1123_vm3, %v919_v37, %v920_v21  ;;  %v4016_v21 = vadd.f32 %v3648_v25, %v515_v60 }
 0x1ae   : > { %v1126_v43 = vshra.s32 %v3975_v22, 16 }
 0x1b0   : > { %v3983_v49 = vcvt.s32.f32 %v1126_v43  ;;  %v1077_v43 = vand.u32 65535, %v3872_v0 }
 0x1b1   : > { %v3979_v39 = vpop.xlane.xlu1 %1033  ;;  %v774_v44 = vpop.xlane.xlu2 %773 }
 0x1b2   : > { %vm857_vm4 = vcmp.le.f32.partialorder %v3794_v56, %v774_v44  ;;  %vm858_vm5 = vcmp.le.f32.partialorder %v3797_v57, %v774_v44  ;;  %vm1035_vm6 = vcmp.eq.f32.partialorder %v3805_v47, %v3979_v39  ;;  %v1045_v57 = vand.u32 65535, %v3827_v53 }
 0x1b3   : > { %v921_v1 = vsel %vm857_vm4, %v3732_v11, 256  ;;  %v922_v50 = vsel %vm858_vm5, %v3735_v12, 256  ;;  %v1036_v61 = vsel %vm1035_vm6, %v1031_v40, inf  ;;  %v1079_v60 = vcvt.s32.f32 %v1077_v43  ;;  %v1680_v43 = vld [vmem:[%s5529_s2 + $0x68] sm:$0xff] }
 0x1b4   : > { %vm1139_vm7 = vcmp.lt.s32.totalorder %v921_v1, %v922_v50  ;;  %1129 = vmin.xlane.f32.xlu0 %v3983_v49  ;;  %1037 = vmin.xlane.f32.xlu1 %v1036_v61  ;;  %v1047_v16 = vcvt.s32.f32 %v1045_v57  ;;  %v4049_v57 = vadd.f32 %v3650_v26, %v631_v29  ;;  %v1682_v29 = vld [vmem:[%s5529_s2 + $0x78] sm:$0xff] }
 0x1b5   : > { %v3990_v5 = vsel %vm1139_vm7, %v921_v1, %v922_v50  ;;  %3229 = vmatpush.msra.mxu2 %v1682_v29  ;;  %1699 = vmatpush.msrb.mxu0 %v1682_v29 }
 0x1b6   : > { %v1142_v56 = vshra.s32 %v3990_v5, 16 }
 0x1b8   : > { %v3998_v13 = vcvt.s32.f32 %v1142_v56 }
 0x1b9   : > { %v3994_v63 = vpop.xlane.xlu0 %1049  ;;  %v777_v47 = vpop.xlane.xlu1 %776 }
 0x1ba   : > { %vm859_vm8 = vcmp.le.f32.partialorder %v3822_v14, %v777_v47  ;;  %vm860_vm9 = vcmp.le.f32.partialorder %v3825_v52, %v777_v47  ;;  %v780_v2 = vpop.xlane.xlu2 %779  ;;  %vm1051_vm10 = vcmp.eq.f32.partialorder %v3834_v17, %v3994_v63  ;;  %v1061_v14 = vand.u32 65535, %v3852_v58  ;;  %v518_v52 = vpop.f32.mrf.mxu0 }
 0x1bb   : > { %v923_v15 = vsel %vm859_vm8, %v3732_v11, 256  ;;  %v924_v20 = vsel %vm860_vm9, %v3735_v12, 256  ;;  %v1052_v53 = vsel %vm1051_vm10, %v1047_v16, inf  ;;  %vm861_vm15 = vcmp.le.f32.partialorder %v3815_v9, %v780_v2 }
 0x1bc   : > { %vm1155_vm11 = vcmp.lt.s32.totalorder %v923_v15, %v924_v20  ;;  %1145 = vmin.xlane.f32.xlu0 %v3998_v13  ;;  %1053 = vmin.xlane.f32.xlu1 %v1052_v53  ;;  %v1063_v17 = vcvt.s32.f32 %v1061_v14  ;;  %vm862_vm1 = vcmp.le.f32.partialorder %v3818_v10, %v780_v2  ;;  %v796_v9 = vmin.f32 %v4016_v21, %v4023_v42  ;;  %v634_v10 = vpop.f32.mrf.mxu1 }
 0x1bd   : > { %v4005_v33 = vsel %vm1155_vm11, %v923_v15, %v924_v20  ;;  %v926_v40 = vsel %vm862_vm1, %v3735_v12, 256  ;;  %v4046_v56 = vadd.f32 %v3648_v25, %v518_v52  ;;  %v4066_v52 = vadd.f32 %v3650_v26, %v634_v10 }
 0x1be   : > { %v1158_v28 = vshra.s32 %v4005_v33, 16 }
 0x1c0   : > { %v4013_v37 = vcvt.s32.f32 %v1158_v28 }
 0x1c1   : > { %v741_v30 = vpop.xlane.xlu1 %740 }
 0x1c2   : > { %vm835_vm12 = vcmp.le.f32.partialorder %v3846_v34, %v741_v30  ;;  %vm836_vm13 = vcmp.le.f32.partialorder %v3850_v36, %v741_v30  ;;  %v4011_v31 = vpop.xlane.xlu2 %1065  ;;  %v521_v1 = vpop.f32.mrf.mxu0 }
 0x1c3   : > { %v899_v58 = vsel %vm835_vm12, %v3732_v11, 256  ;;  %v900_v45 = vsel %vm836_vm13, %v3735_v12, 256  ;;  %vm1067_vm14 = vcmp.eq.f32.partialorder %v3859_v38, %v4011_v31  ;;  %v925_v38 = vsel %vm861_vm15, %v3732_v11, 256 }
 0x1c4   : > { %vm963_vm2 = vcmp.lt.s32.totalorder %v899_v58, %v900_v45  ;;  %1161 = vmin.xlane.f32.xlu0 %v4013_v37  ;;  %v1068_v34 = vsel %vm1067_vm14, %v1063_v17, inf  ;;  %vm1171_vm3 = vcmp.lt.s32.totalorder %v925_v38, %v926_v40  ;;  %v637_v16 = vpop.f32.mrf.mxu1  ;;  %v4059_v53 = vadd.f32 %v3648_v25, %v521_v1  ;;  %v1695_v1 = vld [vmem:[%s5529_s2 + $0xe0] sm:$0xff] }
 0x1c5   : > { %v4028_v36 = vsel %vm963_vm2, %v899_v58, %v900_v45  ;;  %1069 = vmin.xlane.f32.xlu1 %v1068_v34  ;;  %v4051_v47 = vsel %vm1171_vm3, %v925_v38, %v926_v40  ;;  %v1697_v58 = vld [vmem:[%s5529_s2 + $0xf0] sm:$0xff]  ;;  %v1679_v40 = vld [vmem:[%s5529_s2 + $0x60] sm:$0xff] }
 0x1c6   : > { %v966_v44 = vshra.s32 %v4028_v36, 16  ;;  %v802_v34 = vmin.f32 %v4059_v53, %v4066_v52 }
 0x1c8   : > { %v4034_v50 = vcvt.s32.f32 %v966_v44  ;;  %v1696_v44 = vld [vmem:[%s5529_s2 + $0xe8] sm:$0xff] }
 0x1c9   : > { %v4038_v61 = vpop.xlane.xlu0 %1081 }
 0x1ca   : > { %v783_v62 = vpop.xlane.xlu2 %782  ;;  %969 = vmin.xlane.f32.xlu2 %v4034_v50  ;;  %vm1083_vm4 = vcmp.eq.f32.partialorder %v3877_v51, %v4038_v61  ;;  %v1174_v51 = vshra.s32 %v4051_v47, 16 }
 0x1cb   : > { %v1084_v0 = vsel %vm1083_vm4, %v1079_v60, inf  ;;  %vm863_vm5 = vcmp.le.f32.partialorder %v3867_v41, %v783_v62  ;;  %vm864_vm6 = vcmp.le.f32.partialorder %v3870_v48, %v783_v62  ;;  %v799_v41 = vmin.f32 %v4046_v56, %v4049_v57  ;;  %v524_v48 = vpop.f32.mrf.mxu0 }
 0x1cc   : > { %797 = vmin.xlane.f32.xlu0 %v796_v9  ;;  %v927_v2 = vsel %vm863_vm5, %v3732_v11, 256  ;;  %v928_v15 = vsel %vm864_vm6, %v3735_v12, 256  ;;  %v4063_v14 = vcvt.s32.f32 %v1174_v51  ;;  %v4101_v9 = vadd.f32 %v3648_v25, %v524_v48  ;;  %v1694_v51 = vld [vmem:[%s5529_s2 + $0xd8] sm:$0xff] }
 0x1cd   : > { %1085 = vmin.xlane.f32.xlu1 %v1084_v0  ;;  %vm1187_vm7 = vcmp.lt.s32.totalorder %v927_v2, %v928_v15  ;;  %v4108_v60 = vadd.f32 %v3650_v26, %v637_v16  ;;  %v640_v0 = vpop.f32.mrf.mxu1  ;;  %v1693_v16 = vld [vmem:[%s5529_s2 + $0xd0] sm:$0xff] }
 0x1ce   : > { %v4068_v28 = vsel %vm1187_vm7, %v927_v2, %v928_v15  ;;  %v1678_v15 = vld [vmem:[%s5529_s2 + $0x58] sm:$0xff] }
 0x1cf   : > { %v1190_v45 = vshra.s32 %v4068_v28, 16 }
 0x1d1   : > { %v4105_v10 = vcvt.s32.f32 %v1190_v45 }
 0x1d2   : > { %v786_v20 = vpop.xlane.xlu2 %785 }
 0x1d3   : > { %vm865_vm8 = vcmp.le.f32.partialorder %v3881_v54, %v786_v20  ;;  %vm866_vm9 = vcmp.le.f32.partialorder %v3884_v55, %v786_v20  ;;  %v1698_v54 = vld [vmem:[%s5529_s2 + $0xf8] sm:$0xff]  ;;  %v1681_v55 = vld [vmem:[%s5529_s2 + $0x70] sm:$0xff]  ;;  %v527_v62 = vpop.f32.mrf.mxu0 }
 0x1d4   : > { %800 = vmin.xlane.f32.xlu0 %v799_v41  ;;  %v929_v30 = vsel %vm865_vm8, %v3732_v11, 256  ;;  %v930_v17 = vsel %vm866_vm9, %v3735_v12, 256  ;;  %3245 = vmatpush.msra.mxu3 %v1698_v54  ;;  %v1677_v41 = vld [vmem:[%s5529_s2 + $0x50] sm:$0xff] }
 0x1d5   : > { %1177 = vmin.xlane.f32.xlu1 %v4063_v14  ;;  %1812 = vmatpush.msrb.mxu1 %v1698_v54  ;;  %vm1203_vm10 = vcmp.lt.s32.totalorder %v929_v30, %v930_v17  ;;  %v805_v54 = vmin.f32 %v4101_v9, %v4108_v60 }
 0x1d6   : > { %3230 = vmatpush.msra.mxu2 %v1681_v55  ;;  %3246 = vmatpush.msra.mxu3 %v1697_v58  ;;  %v4111_v2 = vsel %vm1203_vm10, %v929_v30, %v930_v17  ;;  %v1675_v30 = vld [vmem:[%s5529_s2 + $0x40] sm:$0xff] }
 0x1d7   : > { %1700 = vmatpush.msrb.mxu0 %v1681_v55  ;;  %1813 = vmatpush.msrb.mxu1 %v1697_v58  ;;  %v1206_v29 = vshra.s32 %v4111_v2, 16  ;;  %v1691_v17 = vld [vmem:[%s5529_s2 + $0xc0] sm:$0xff]  ;;  %v4148_v58 = vadd.f32 %v3648_v25, %v527_v62  ;;  %v1673_v62 = vld [vmem:[%s5529_s2 + $0x30] sm:$0xff] }
 0x1d8   : > { %3231 = vmatpush.msra.mxu2 %v1680_v43  ;;  %3247 = vmatpush.msra.mxu3 %v1696_v44 }
 0x1d9   : > { %1701 = vmatpush.msrb.mxu0 %v1680_v43  ;;  %1814 = vmatpush.msrb.mxu1 %v1696_v44  ;;  %v4152_v45 = vcvt.s32.f32 %v1206_v29  ;;  %v4159_v44 = vpop.f32.mrf.mxu1 }
 0x1da   : > { %v789_v38 = vpop.xlane.xlu2 %788  ;;  %3232 = vmatpush.msra.mxu2 %v1679_v40  ;;  %3248 = vmatpush.msra.mxu3 %v1695_v1 }
 0x1db   : > { %vm867_vm11 = vcmp.le.f32.partialorder %v3893_v3, %v789_v38  ;;  %vm868_vm12 = vcmp.le.f32.partialorder %v3896_v4, %v789_v38  ;;  %v1676_v3 = vld [vmem:[%s5529_s2 + $0x48] sm:$0xff]  ;;  %1702 = vmatpush.msrb.mxu0 %v1679_v40  ;;  %1815 = vmatpush.msrb.mxu1 %v1695_v1  ;;  %v4157_v43 = vpop.f32.mrf.mxu0  ;;  %v1674_v40 = vld [vmem:[%s5529_s2 + $0x38] sm:$0xff] }
 0x1dc   : > { %803 = vmin.xlane.f32.xlu0 %v802_v34  ;;  %v931_v48 = vsel %vm867_vm11, %v3732_v11, 256  ;;  %v932_v20 = vsel %vm868_vm12, %v3735_v12, 256  ;;  %3233 = vmatpush.msra.mxu2 %v1678_v15  ;;  %v1692_v4 = vld [vmem:[%s5529_s2 + $0xc8] sm:$0xff]  ;;  %v4155_v34 = vadd.f32 %v3650_v26, %v640_v0  ;;  %v1690_v1 = vld [vmem:[%s5529_s2 + $0xb8] sm:$0xff] }
 0x1dd   : > { %1193 = vmin.xlane.f32.xlu1 %v4105_v10  ;;  %3249 = vmatpush.msra.mxu3 %v1694_v51  ;;  %vm1219_vm13 = vcmp.lt.s32.totalorder %v931_v48, %v932_v20 }
 0x1de   : > { %3234 = vmatpush.msra.mxu2 %v1677_v41  ;;  %1703 = vmatpush.msrb.mxu0 %v1678_v15  ;;  %v4162_v38 = vsel %vm1219_vm13, %v931_v48, %v932_v20  ;;  %v808_v48 = vmin.f32 %v4148_v58, %v4155_v34  ;;  %v1671_v20 = vld [vmem:[%s5529_s2 + $0x20] sm:$0xff] }
 0x1df   : > { %3250 = vmatpush.msra.mxu3 %v1693_v16  ;;  %1816 = vmatpush.msrb.mxu1 %v1694_v51  ;;  %v1689_v51 = vld [vmem:[%s5529_s2 + $0xb0] sm:$0xff] }
 0x1e0   : > { %3235 = vmatpush.msra.mxu2 %v1676_v3  ;;  %1704 = vmatpush.msrb.mxu0 %v1677_v41  ;;  %v1222_v41 = vshra.s32 %v4162_v38, 16 }
 0x1e1   : > { %3251 = vmatpush.msra.mxu3 %v1692_v4  ;;  %1817 = vmatpush.msrb.mxu1 %v1693_v16  ;;  %v1687_v16 = vld [vmem:[%s5529_s2 + $0xa0] sm:$0xff] }
 0x1e2   : > { %v792_v55 = vpop.xlane.xlu2 %791  ;;  %3236 = vmatpush.msra.mxu2 %v1675_v30  ;;  %1705 = vmatpush.msrb.mxu0 %v1676_v3  ;;  %v4198_v29 = vcvt.s32.f32 %v1222_v41  ;;  %v1683_v41 = vld [vmem:[%s5529_s2 + $0x80] sm:$0xff] }
 0x1e3   : > { %vm869_vm14 = vcmp.le.f32.partialorder %v3904_v19, %v792_v55  ;;  %vm870_vm15 = vcmp.le.f32.partialorder %v3907_v23, %v792_v55  ;;  %3252 = vmatpush.msra.mxu3 %v1691_v17  ;;  %v1672_v19 = vld [vmem:[%s5529_s2 + $0x28] sm:$0xff]  ;;  %1818 = vmatpush.msrb.mxu1 %v1692_v4  ;;  %v533_v3 = vpop.f32.mrf.mxu0  ;;  %v646_v4 = vpop.f32.mrf.mxu1  ;;  %v1670_v55 = vld [vmem:[%s5529_s2 + $0x18] sm:$0xff] }
 0x1e4   : > { %806 = vmin.xlane.f32.xlu0 %v805_v54  ;;  %v933_v0 = vsel %vm869_vm14, %v3732_v11, 256  ;;  %v934_v15 = vsel %vm870_vm15, %v3735_v12, 256  ;;  %3237 = vmatpush.msra.mxu2 %v1674_v40  ;;  %v1688_v23 = vld [vmem:[%s5529_s2 + $0xa8] sm:$0xff] }
 0x1e5   : > { %1209 = vmin.xlane.f32.xlu1 %v4152_v45  ;;  %3253 = vmatpush.msra.mxu3 %v1690_v1  ;;  %vm1235_vm1 = vcmp.lt.s32.totalorder %v933_v0, %v934_v15 }
 0x1e6   : > { %3238 = vmatpush.msra.mxu2 %v1673_v62  ;;  %1706 = vmatpush.msrb.mxu0 %v1675_v30  ;;  %v4200_v54 = vsel %vm1235_vm1, %v933_v0, %v934_v15  ;;  %v1686_v30 = vld [vmem:[%s5529_s2 + $0x98] sm:$0xff]  ;;  %v1685_v0 = vld [vmem:[%s5529_s2 + $0x90] sm:$0xff]  ;;  %v1684_v15 = vld [vmem:[%s5529_s2 + $0x88] sm:$0xff] }
 0x1e7   : > { %3254 = vmatpush.msra.mxu3 %v1689_v51  ;;  %1819 = vmatpush.msrb.mxu1 %v1691_v17  ;;  %v1238_v17 = vshra.s32 %v4200_v54, 16 }
 0x1e8   : > { %3239 = vmatpush.msra.mxu2 %v1672_v19  ;;  %1707 = vmatpush.msrb.mxu0 %v1674_v40  ;;  %v1669_v40 = vld [vmem:[%s5529_s2 + $0x10] sm:$0xff] }
 0x1e9   : > { %3255 = vmatpush.msra.mxu3 %v1688_v23  ;;  %1820 = vmatpush.msrb.mxu1 %v1690_v1  ;;  %v1668_v1 = vld [vmem:[%s5529_s2 + $0x8] sm:$0xff] }
 0x1ea   : > { %3240 = vmatpush.msra.mxu2 %v1671_v20  ;;  %1708 = vmatpush.msrb.mxu0 %v1673_v62  ;;  %v4222_v62 = vcvt.s32.f32 %v1238_v17 }
 0x1eb   : > { %3256 = vmatpush.msra.mxu3 %v1687_v16  ;;  %1821 = vmatpush.msrb.mxu1 %v1689_v51  ;;  %v1667_v51 = vld [vmem:[%s5529_s2] sm:$0xff]  ;;  %v649_v17 = vpop.f32.mrf.mxu1 }
 0x1ec   : > { %809 = vmin.xlane.f32.xlu0 %v808_v48  ;;  %3241 = vmatpush.msra.mxu2 %v1670_v55  ;;  %v4233_v48 = vadd.f32 %v3648_v25, %v4157_v43  ;;  %v4242_v43 = vadd.f32 %v3648_v25, %v533_v3 }
 0x1ed   : > { %1225 = vmin.xlane.f32.xlu1 %v4198_v29  ;;  %3257 = vmatpush.msra.mxu3 %v1686_v30 }
 0x1ee   : > { %3242 = vmatpush.msra.mxu2 %v1669_v40  ;;  %1709 = vmatpush.msrb.mxu0 %v1672_v19  ;;  %v4237_v19 = vadd.f32 %v3650_v26, %v4159_v44  ;;  %v4245_v44 = vadd.f32 %v3650_v26, %v646_v4 }
 0x1ef   : > { %3258 = vmatpush.msra.mxu3 %v1685_v0  ;;  %1822 = vmatpush.msrb.mxu1 %v1688_v23  ;;  %v536_v23 = vpop.f32.mrf.mxu0 }
 0x1f0   : > { %3243 = vmatpush.msra.mxu2 %v1668_v1  ;;  %1710 = vmatpush.msrb.mxu0 %v1671_v20  ;;  %v811_v20 = vmin.f32 %v4233_v48, %v4237_v19 }
 0x1f1   : > { %3259 = vmatpush.msra.mxu3 %v1684_v15  ;;  %1823 = vmatpush.msrb.mxu1 %v1687_v16  ;;  %v814_v16 = vmin.f32 %v4242_v43, %v4245_v44 }
 0x1f2   : > { %3244 = vmatpush.msra.mxu2 %v1667_v51  ;;  %1711 = vmatpush.msrb.mxu0 %v1670_v55 }
 0x1f3   : > { %3260 = vmatpush.msra.mxu3 %v1683_v41  ;;  %1824 = vmatpush.msrb.mxu1 %v1686_v30  ;;  %v652_v55 = vpop.f32.mrf.mxu1 }
 0x1f4   : > { %1712 = vmatpush.msrb.mxu0 %v1669_v40  ;;  %v4250_v40 = vadd.f32 %v3648_v25, %v536_v23 }
 0x1f5   : > { %1241 = vmin.xlane.f32.xlu1 %v4222_v62  ;;  %1825 = vmatpush.msrb.mxu1 %v1685_v0  ;;  %v4253_v0 = vadd.f32 %v3650_v26, %v649_v17 }
 0x1f6   : > { %1713 = vmatpush.msrb.mxu0 %v1668_v1  ;;  %v992_v1 = vcvt.f32.s32 %v3941_v46  ;;  %v1008_v46 = vcvt.f32.s32 %v3949_v7 }
 0x1f7   : > { %1826 = vmatpush.msrb.mxu1 %v1684_v15  ;;  %v539_v30 = vpop.f32.mrf.mxu0  ;;  %5548 = vst [vmem:[#allocation8_spill] sm:$0xff] %v4253_v0  ;;  %v817_v3 = vmin.f32 %v4250_v40, %v4253_v0  ;;  %v1093_v0 = vand.u32 65535, %v3945_v6 }
 0x1f8   : > { %1714 = vmatpush.msrb.mxu0 %v1667_v51  ;;  %v4259_v51 = vadd.f32 %v3650_v26, %v652_v55  ;;  %v993_v23 = vshll.u32 %v992_v1, 16 }
 0x1f9   : > { %1827 = vmatpush.msrb.mxu1 %v1683_v41  ;;  %v4262_v41 = vadd.f32 %v3648_v25, %v539_v30 }
 0x1fa   : > { %5549 = vst [vmem:[#allocation9_spill] sm:$0xff] %v4259_v51 }
 0x1fb   : > { %v655_v4 = vpop.f32.mrf.mxu1  ;;  %5550 = vst [vmem:[#allocation10_spill] sm:$0xff] %v4262_v41  ;;  %v820_v17 = vmin.f32 %v4262_v41, %v4259_v51  ;;  %v1109_v41 = vand.u32 65535, %v3960_v24 }
 0x1fc   : > { %v4275_v55 = vadd.f32 %v3650_v26, %v655_v4 }
 0x1fd   : > { %812 = vmin.xlane.f32.xlu1 %v811_v20 }
 0x1fe   : > { %5551 = vst [vmem:[#allocation11_spill] sm:$0xff] %v4275_v55 }
 0x1ff   : > { %v542_v15 = vpop.f32.mrf.mxu0 }
 0x200   : > { %v4278_v30 = vadd.f32 %v3648_v25, %v542_v15 }
 0x202   : > { %5552 = vst [vmem:[#allocation12_spill] sm:$0xff] %v4278_v30  ;;  %v823_v15 = vmin.f32 %v4278_v30, %v4275_v55  ;;  %v1125_v55 = vand.u32 65535, %v3975_v22  ;;  %v1040_v30 = vcvt.f32.s32 %v3979_v39 }
 0x205   : > { %815 = vmin.xlane.f32.xlu1 %v814_v16 }
 0x207   : > { %v545_v1 = vpop.f32.mrf.mxu0 }
 0x20d   : > { %818 = vmin.xlane.f32.xlu1 %v817_v3  ;;  %v658_v3 = vpop.f32.mrf.mxu1 }
 0x20f   : > { %v990_v20 = vpop.xlane.xlu0 %989 }
 0x210   : > { %v991_v16 = vcvt.f32.s32 %v990_v20  ;;  %v5538_v20 = vmov 1.0  }
 0x212   : > { %v4264_v8 = vadd.s32 %v993_v23, %v991_v16  ;;  %v1095_v23 = vcvt.s32.f32 %v1093_v0  ;;  %v1009_v16 = vshll.u32 %v1008_v46, 16  ;;  %v4300_v0 = vadd.f32 %v3648_v25, %v545_v1 }
 0x213   : > { %v5555_v46 = vmov 1.0  }
 0x214   : > { %vm1477_vm2 = vcmp.eq.s32.totalorder %v3732_v11, %v4264_v8  ;;  %vm1478_vm3 = vcmp.eq.s32.totalorder %v3735_v12, %v4264_v8  ;;  %5554 = vst [vmem:[#allocation14_spill] sm:$0xff] %v4300_v0 }
 0x215   : > { %821 = vmin.xlane.f32.xlu1 %v820_v17  ;;  %3160 = vmatmul.msk.f32.vlgmr.msra.gmra.mxu2 %vm1477_vm2, %v5538_v20 }
 0x216   : > { %3192 = vmatmul.msk.f32.vlgmr.msra.gmra.mxu3 %vm1478_vm3, %v5538_v20  ;;  %v1024_v20 = vcvt.f32.s32 %v3964_v27 }
 0x217   : > { %v4282_v6 = vpop.xlane.xlu0 %1097  ;;  %v1006_v7 = vpop.xlane.xlu1 %1005 }
 0x218   : > { %v1007_v17 = vcvt.f32.s32 %v1006_v7  ;;  %vm1099_vm4 = vcmp.eq.f32.partialorder %v3953_v18, %v4282_v6  ;;  %v4297_v18 = vadd.f32 %v3650_v26, %v658_v3  ;;  %v1111_v7 = vcvt.s32.f32 %v1109_v41  ;;  %v548_v3 = vpop.f32.mrf.mxu0 }
 0x219   : > { %v1100_v4 = vsel %vm1099_vm4, %v1095_v23, inf  ;;  %v1025_v23 = vshll.u32 %v1024_v20, 16  ;;  %v4322_v41 = vadd.f32 %v3648_v25, %v548_v3  ;;  %v1127_v20 = vcvt.s32.f32 %v1125_v55 }
 0x21a   : > { %v4286_v51 = vadd.s32 %v1009_v16, %v1007_v17  ;;  %1101 = vmin.xlane.f32.xlu2 %v1100_v4  ;;  %5553 = vst [vmem:[#allocation13_spill] sm:$0xff] %v4297_v18  ;;  %v661_v4 = vpop.f32.mrf.mxu1  ;;  %v826_v1 = vmin.f32 %v4300_v0, %v4297_v18  ;;  %v1056_v18 = vcvt.f32.s32 %v3994_v63  ;;  %v795_v0 = vpop.xlane.xlu2 %794 }
 0x21b   : > { %vm871_vm13 = vcmp.le.f32.partialorder %v3915_v32, %v795_v0  ;;  %vm872_vm14 = vcmp.le.f32.partialorder %v3918_v59, %v795_v0  ;;  %v1072_v59 = vcvt.f32.s32 %v4011_v31 }
 0x21c   : > { %vm1479_vm5 = vcmp.eq.s32.totalorder %v3732_v11, %v4286_v51  ;;  %vm1480_vm6 = vcmp.eq.s32.totalorder %v3735_v12, %v4286_v51 }
 0x21d   : > { %824 = vmin.xlane.f32.xlu1 %v823_v15  ;;  %3161 = vmatmul.msk.f32.gmra.mxu2 %vm1479_vm5, %v5555_v46 }
 0x21e   : > { %3193 = vmatmul.msk.f32.gmra.mxu3 %vm1480_vm6, %v5555_v46 }
 0x21f   : > { %v4304_v24 = vpop.xlane.xlu0 %1113  ;;  %v1022_v27 = vpop.xlane.xlu1 %1021 }
 0x220   : > { %v1023_v16 = vcvt.f32.s32 %v1022_v27  ;;  %vm1115_vm7 = vcmp.eq.f32.partialorder %v3968_v35, %v4304_v24  ;;  %v4319_v35 = vadd.f32 %v3650_v26, %v661_v4  ;;  %v1041_v27 = vshll.u32 %v1040_v30, 16  ;;  %v551_v3 = vpop.f32.mrf.mxu0 }
 0x221   : > { %v1116_v17 = vsel %vm1115_vm7, %v1111_v7, inf  ;;  %v4344_v55 = vadd.f32 %v3648_v25, %v551_v3  ;;  %v965_v3 = vand.u32 65535, %v4028_v36 }
 0x222   : > { %v4308_v15 = vadd.s32 %v1025_v23, %v1023_v16  ;;  %1117 = vmin.xlane.f32.xlu2 %v1116_v17  ;;  %v829_v17 = vmin.f32 %v4322_v41, %v4319_v35  ;;  %v664_v4 = vpop.f32.mrf.mxu1 }
 0x224   : > { %vm1481_vm8 = vcmp.eq.s32.totalorder %v3732_v11, %v4308_v15  ;;  %vm1482_vm9 = vcmp.eq.s32.totalorder %v3735_v12, %v4308_v15 }
 0x225   : > { %827 = vmin.xlane.f32.xlu1 %v826_v1  ;;  %3162 = vmatmul.msk.f32.gmra.mxu2 %vm1481_vm8, %v5555_v46  ;;  %v1141_v1 = vand.u32 65535, %v3990_v5 }
 0x226   : > { %3194 = vmatmul.msk.f32.gmra.mxu3 %vm1482_vm9, %v5555_v46 }
 0x227   : > { %v4326_v22 = vpop.xlane.xlu0 %1129  ;;  %v1038_v39 = vpop.xlane.xlu1 %1037  ;;  %v1143_v63 = vcvt.s32.f32 %v1141_v1 }
 0x228   : > { %v1039_v7 = vcvt.f32.s32 %v1038_v39  ;;  %vm1131_vm10 = vcmp.eq.f32.partialorder %v3983_v49, %v4326_v22  ;;  %v4341_v49 = vadd.f32 %v3650_v26, %v664_v4  ;;  %v1057_v39 = vshll.u32 %v1056_v18, 16 }
 0x229   : > { %v1132_v23 = vsel %vm1131_vm10, %v1127_v20, inf }
 0x22a   : > { %v4330_v16 = vadd.s32 %v1041_v27, %v1039_v7  ;;  %1133 = vmin.xlane.f32.xlu2 %v1132_v23  ;;  %v832_v25 = vmin.f32 %v4344_v55, %v4341_v49  ;;  %v935_v27 = vsel %vm871_vm13, %v3732_v11, 256  ;;  %v936_v7 = vsel %vm872_vm14, %v3735_v12, 256 }
 0x22b   : > { %v1157_v23 = vand.u32 65535, %v4005_v33  ;;  %vm1251_vm1 = vcmp.lt.s32.totalorder %v935_v27, %v936_v7 }
 0x22c   : > { %vm1483_vm11 = vcmp.eq.s32.totalorder %v3732_v11, %v4330_v16  ;;  %vm1484_vm12 = vcmp.eq.s32.totalorder %v3735_v12, %v4330_v16  ;;  %v4372_v0 = vsel %vm1251_vm1, %v935_v27, %v936_v7 }
 0x22d   : > { %830 = vmin.xlane.f32.xlu1 %v829_v17  ;;  %3163 = vmatmul.msk.f32.gmra.mxu2 %vm1483_vm11, %v5555_v46  ;;  %v1159_v18 = vcvt.s32.f32 %v1157_v23  ;;  %v1073_v17 = vshll.u32 %v1072_v59, 16 }
 0x22e   : > { %3195 = vmatmul.msk.f32.gmra.mxu3 %vm1484_vm12, %v5555_v46 }
 0x22f   : > { %v4348_v5 = vpop.xlane.xlu0 %1145  ;;  %v1054_v30 = vpop.xlane.xlu1 %1053 }
 0x230   : > { %vm1147_vm15 = vcmp.eq.f32.partialorder %v3998_v13, %v4348_v5  ;;  %v1055_v20 = vcvt.f32.s32 %v1054_v30  ;;  %v1088_v30 = vcvt.f32.s32 %v4038_v61 }
 0x231   : > { %v1148_v26 = vsel %vm1147_vm15, %v1143_v63, inf  ;;  %v1254_v63 = vshra.s32 %v4372_v0, 16 }
 0x232   : > { %1149 = vmin.xlane.f32.xlu2 %v1148_v26  ;;  %v4359_v32 = vadd.s32 %v1057_v39, %v1055_v20  ;;  %v967_v39 = vcvt.s32.f32 %v965_v3 }
 0x233   : > { %v4386_v20 = vcvt.s32.f32 %v1254_v63  ;;  %v1189_v63 = vand.u32 65535, %v4068_v28 }
 0x234   : > { %vm1485_vm2 = vcmp.eq.s32.totalorder %v3732_v11, %v4359_v32  ;;  %vm1486_vm3 = vcmp.eq.s32.totalorder %v3735_v12, %v4359_v32 }
 0x235   : > { %833 = vmin.xlane.f32.xlu1 %v832_v25  ;;  %3164 = vmatmul.msk.f32.gmra.mxu2 %vm1485_vm2, %v5555_v46  ;;  %v1089_v25 = vshll.u32 %v1088_v30, 16 }
 0x236   : > { %3196 = vmatmul.msk.f32.gmra.mxu3 %vm1486_vm3, %v5555_v46 }
 0x237   : > { %v4362_v13 = vpop.xlane.xlu0 %1161 }
 0x238   : > { %vm1163_vm4 = vcmp.eq.f32.partialorder %v4013_v37, %v4362_v13  ;;  %v1070_v33 = vpop.xlane.xlu1 %1069 }
 0x239   : > { %v1164_v31 = vsel %vm1163_vm4, %v1159_v18, inf  ;;  %v1071_v4 = vcvt.f32.s32 %v1070_v33  ;;  %v1173_v18 = vand.u32 65535, %v4051_v47 }
 0x23a   : > { %1165 = vmin.xlane.f32.xlu2 %v1164_v31 }
 0x23b   : > { %v4375_v1 = vadd.s32 %v1073_v17, %v1071_v4  ;;  %v1175_v4 = vcvt.s32.f32 %v1173_v18 }
 0x23d   : > { %v4379_v37 = vpop.xlane.xlu2 %969  ;;  %vm1487_vm5 = vcmp.eq.s32.totalorder %v3732_v11, %v4375_v1  ;;  %vm1488_vm6 = vcmp.eq.s32.totalorder %v3735_v12, %v4375_v1 }
 0x23e   : > { %3165 = vmatmul.msk.f32.gmra.mxu2 %vm1487_vm5, %v5555_v46  ;;  %3197 = vmatmul.msk.f32.gmra.mxu3 %vm1488_vm6, %v5555_v46  ;;  %vm971_vm9 = vcmp.eq.f32.partialorder %v4034_v50, %v4379_v37 }
 0x23f   : > { %v798_v26 = vpop.xlane.xlu0 %797  ;;  %v972_v23 = vsel %vm971_vm9, %v967_v39, inf }
 0x240   : > { %vm873_vm7 = vcmp.le.f32.partialorder %v4016_v21, %v798_v26  ;;  %v1086_v36 = vpop.xlane.xlu1 %1085  ;;  %vm874_vm8 = vcmp.le.f32.partialorder %v4023_v42, %v798_v26  ;;  %973 = vmin.xlane.f32.xlu0 %v972_v23 }
 0x241   : > { %v937_v61 = vsel %vm873_vm7, %v3732_v11, 256  ;;  %v1087_v27 = vcvt.f32.s32 %v1086_v36  ;;  %v938_v7 = vsel %vm874_vm8, %v3735_v12, 256 }
 0x242   : > { %1257 = vmin.xlane.f32.xlu2 %v4386_v20  ;;  %vm1267_vm10 = vcmp.lt.s32.totalorder %v937_v61, %v938_v7 }
 0x243   : > { %v4396_v21 = vadd.s32 %v1089_v25, %v1087_v27  ;;  %v4398_v59 = vsel %vm1267_vm10, %v937_v61, %v938_v7  ;;  %v1191_v61 = vcvt.s32.f32 %v1189_v63 }
 0x244   : > { %v1270_v42 = vshra.s32 %v4398_v59, 16 }
 0x245   : > { %vm1489_vm11 = vcmp.eq.s32.totalorder %v3732_v11, %v4396_v21  ;;  %vm1490_vm12 = vcmp.eq.s32.totalorder %v3735_v12, %v4396_v21 }
 0x246   : > { %3166 = vmatmul.msk.f32.gmra.mxu2 %vm1489_vm11, %v5555_v46  ;;  %3198 = vmatmul.msk.f32.gmra.mxu3 %vm1490_vm12, %v5555_v46  ;;  %v4414_v17 = vcvt.s32.f32 %v1270_v42 }
 0x247   : > { %v801_v33 = vpop.xlane.xlu0 %800 }
 0x248   : > { %vm875_vm13 = vcmp.le.f32.partialorder %v4046_v56, %v801_v33  ;;  %vm876_vm14 = vcmp.le.f32.partialorder %v4049_v57, %v801_v33  ;;  %v4410_v50 = vpop.xlane.xlu1 %1177 }
 0x249   : > { %v939_v31 = vsel %vm875_vm13, %v3732_v11, 256  ;;  %v940_v47 = vsel %vm876_vm14, %v3735_v12, 256  ;;  %vm1179_vm1 = vcmp.eq.f32.partialorder %v4063_v14, %v4410_v50 }
 0x24a   : > { %vm1283_vm15 = vcmp.lt.s32.totalorder %v939_v31, %v940_v47  ;;  %1273 = vmin.xlane.f32.xlu2 %v4414_v17  ;;  %v1180_v56 = vsel %vm1179_vm1, %v1175_v4, inf }
 0x24b   : > { %v4419_v57 = vsel %vm1283_vm15, %v939_v31, %v940_v47  ;;  %1181 = vmin.xlane.f32.xlu0 %v1180_v56 }
 0x24c   : > { %v1286_v3 = vshra.s32 %v4419_v57, 16 }
 0x24e   : > { %v4429_v36 = vcvt.s32.f32 %v1286_v3 }
 0x24f   : > { %v804_v30 = vpop.xlane.xlu0 %803 }
 0x250   : > { %vm877_vm2 = vcmp.le.f32.partialorder %v4059_v53, %v804_v30  ;;  %vm878_vm3 = vcmp.le.f32.partialorder %v4066_v52, %v804_v30  ;;  %v4425_v26 = vpop.xlane.xlu1 %1193  ;;  %v1205_v52 = vand.u32 65535, %v4111_v2 }
 0x251   : > { %v941_v39 = vsel %vm877_vm2, %v3732_v11, 256  ;;  %v942_v14 = vsel %vm878_vm3, %v3735_v12, 256  ;;  %vm1195_vm5 = vcmp.eq.f32.partialorder %v4105_v10, %v4425_v26 }
 0x252   : > { %vm1299_vm4 = vcmp.lt.s32.totalorder %v941_v39, %v942_v14  ;;  %1289 = vmin.xlane.f32.xlu2 %v4429_v36  ;;  %v1196_v28 = vsel %vm1195_vm5, %v1191_v61, inf  ;;  %v1207_v18 = vcvt.s32.f32 %v1205_v52 }
 0x253   : > { %v4434_v25 = vsel %vm1299_vm4, %v941_v39, %v942_v14  ;;  %1197 = vmin.xlane.f32.xlu0 %v1196_v28 }
 0x254   : > { %v1302_v53 = vshra.s32 %v4434_v25, 16 }
 0x256   : > { %v4444_v42 = vcvt.s32.f32 %v1302_v53 }
 0x257   : > { %v807_v27 = vpop.xlane.xlu0 %806 }
 0x258   : > { %vm879_vm6 = vcmp.le.f32.partialorder %v4101_v9, %v807_v27  ;;  %vm880_vm7 = vcmp.le.f32.partialorder %v4108_v60, %v807_v27  ;;  %v4440_v7 = vpop.xlane.xlu1 %1209  ;;  %v1221_v60 = vand.u32 65535, %v4162_v38 }
 0x259   : > { %v943_v23 = vsel %vm879_vm6, %v3732_v11, 256  ;;  %v944_v10 = vsel %vm880_vm7, %v3735_v12, 256  ;;  %vm1211_vm9 = vcmp.eq.f32.partialorder %v4152_v45, %v4440_v7 }
 0x25a   : > { %vm1315_vm8 = vcmp.lt.s32.totalorder %v943_v23, %v944_v10  ;;  %1305 = vmin.xlane.f32.xlu2 %v4444_v42  ;;  %v1212_v2 = vsel %vm1211_vm9, %v1207_v18, inf  ;;  %v1223_v3 = vcvt.s32.f32 %v1221_v60 }
 0x25b   : > { %v4449_v33 = vsel %vm1315_vm8, %v943_v23, %v944_v10  ;;  %1213 = vmin.xlane.f32.xlu0 %v1212_v2 }
 0x25c   : > { %v1318_v9 = vshra.s32 %v4449_v33, 16 }
 0x25e   : > { %v4459_v56 = vcvt.s32.f32 %v1318_v9  ;;  %v5556_v9 = vld [vmem:[#allocation8_spill] sm:$0xff] }
 0x25f   : > { %v810_v31 = vpop.xlane.xlu0 %809 }
 0x260   : > { %vm881_vm10 = vcmp.le.f32.partialorder %v4148_v58, %v810_v31  ;;  %vm882_vm11 = vcmp.le.f32.partialorder %v4155_v34, %v810_v31  ;;  %v4455_v47 = vpop.xlane.xlu1 %1225  ;;  %v1237_v58 = vand.u32 65535, %v4200_v54 }
 0x261   : > { %v945_v4 = vsel %vm881_vm10, %v3732_v11, 256  ;;  %v946_v45 = vsel %vm882_vm11, %v3735_v12, 256  ;;  %vm1227_vm13 = vcmp.eq.f32.partialorder %v4198_v29, %v4455_v47 }
 0x262   : > { %vm1331_vm12 = vcmp.lt.s32.totalorder %v945_v4, %v946_v45  ;;  %1321 = vmin.xlane.f32.xlu2 %v4459_v56  ;;  %v1228_v38 = vsel %vm1227_vm13, %v1223_v3, inf  ;;  %v1239_v39 = vcvt.s32.f32 %v1237_v58 }
 0x263   : > { %v4464_v63 = vsel %vm1331_vm12, %v945_v4, %v946_v45  ;;  %1229 = vmin.xlane.f32.xlu0 %v1228_v38  ;;  %v1104_v45 = vcvt.f32.s32 %v4282_v6 }
 0x264   : > { %v1334_v34 = vshra.s32 %v4464_v63, 16 }
 0x265   : > { %v1105_v3 = vshll.u32 %v1104_v45, 16 }
 0x266   : > { %v4470_v14 = vcvt.s32.f32 %v1334_v34  ;;  %v1120_v34 = vcvt.f32.s32 %v4304_v24 }
 0x268   : > { %v4468_v30 = vpop.xlane.xlu1 %1241 }
 0x269   : > { %vm1243_vm14 = vcmp.eq.f32.partialorder %v4222_v62, %v4468_v30 }
 0x26a   : > { %v1244_v61 = vsel %vm1243_vm14, %v1239_v39, inf  ;;  %1337 = vmin.xlane.f32.xlu2 %v4470_v14  ;;  %v1121_v39 = vshll.u32 %v1120_v34, 16 }
 0x26b   : > { %1245 = vmin.xlane.f32.xlu0 %v1244_v61 }
 0x270   : > { %v813_v29 = vpop.xlane.xlu1 %812 }
 0x271   : > { %vm883_vm15 = vcmp.le.f32.partialorder %v4233_v48, %v813_v29  ;;  %vm884_vm1 = vcmp.le.f32.partialorder %v4237_v19, %v813_v29 }
 0x272   : > { %v947_v54 = vsel %vm883_vm15, %v3732_v11, 256  ;;  %v948_v28 = vsel %vm884_vm1, %v3735_v12, 256 }
 0x273   : > { %vm1347_vm2 = vcmp.lt.s32.totalorder %v947_v54, %v948_v28 }
 0x274   : > { %v4479_v53 = vsel %vm1347_vm2, %v947_v54, %v948_v28 }
 0x275   : > { %v1350_v52 = vshra.s32 %v4479_v53, 16 }
 0x277   : > { %v4482_v27 = vcvt.s32.f32 %v1350_v52  ;;  %v1136_v52 = vcvt.f32.s32 %v4326_v22 }
 0x278   : > { %v816_v62 = vpop.xlane.xlu1 %815 }
 0x279   : > { %vm885_vm3 = vcmp.le.f32.partialorder %v4242_v43, %v816_v62  ;;  %vm886_vm4 = vcmp.le.f32.partialorder %v4245_v44, %v816_v62  ;;  %1353 = vmin.xlane.f32.xlu2 %v4482_v27 }
 0x27a   : > { %v949_v48 = vsel %vm885_vm3, %v3732_v11, 256  ;;  %v950_v19 = vsel %vm886_vm4, %v3735_v12, 256 }
 0x27b   : > { %vm1363_vm5 = vcmp.lt.s32.totalorder %v949_v48, %v950_v19 }
 0x27c   : > { %v4489_v23 = vsel %vm1363_vm5, %v949_v48, %v950_v19  ;;  %v1137_v48 = vshll.u32 %v1136_v52, 16  ;;  %v976_v52 = vcvt.f32.s32 %v4379_v37 }
 0x27d   : > { %v1366_v10 = vshra.s32 %v4489_v23, 16 }
 0x27f   : > { %v4492_v18 = vcvt.s32.f32 %v1366_v10 }
 0x280   : > { %v819_v2 = vpop.xlane.xlu1 %818 }
 0x281   : > { %vm887_vm6 = vcmp.le.f32.partialorder %v4250_v40, %v819_v2  ;;  %vm888_vm7 = vcmp.le.f32.partialorder %v5556_v9, %v819_v2  ;;  %1369 = vmin.xlane.f32.xlu2 %v4492_v18  ;;  %v1152_v9 = vcvt.f32.s32 %v4348_v5 }
 0x282   : > { %v951_v43 = vsel %vm887_vm6, %v3732_v11, 256  ;;  %v952_v44 = vsel %vm888_vm7, %v3735_v12, 256 }
 0x283   : > { %vm1379_vm8 = vcmp.lt.s32.totalorder %v951_v43, %v952_v44  ;;  %v1153_v45 = vshll.u32 %v1152_v9, 16 }
 0x284   : > { %v4499_v60 = vsel %vm1379_vm8, %v951_v43, %v952_v44 }
 0x285   : > { %v1382_v31 = vshra.s32 %v4499_v60, 16 }
 0x287   : > { %v4502_v4 = vcvt.s32.f32 %v1382_v31 }
 0x289   : > { %1385 = vmin.xlane.f32.xlu1 %v4502_v4 }
 0x28d   : > { %v1102_v40 = vpop.xlane.xlu2 %1101 }
 0x28e   : > { %v1103_v38 = vcvt.f32.s32 %v1102_v40  ;;  %v1168_v40 = vcvt.f32.s32 %v4362_v13 }
 0x290   : > { %v4506_v58 = vadd.s32 %v1105_v3, %v1103_v38 }
 0x292   : > { %vm1491_vm9 = vcmp.eq.s32.totalorder %v3732_v11, %v4506_v58  ;;  %vm1492_vm10 = vcmp.eq.s32.totalorder %v3735_v12, %v4506_v58 }
 0x293   : > { %3167 = vmatmul.msk.f32.gmra.mxu2 %vm1491_vm9, %v5555_v46  ;;  %3199 = vmatmul.msk.f32.gmra.mxu3 %vm1492_vm10, %v5555_v46 }
 0x295   : > { %v1118_v6 = vpop.xlane.xlu2 %1117 }
 0x296   : > { %v1119_v61 = vcvt.f32.s32 %v1118_v6 }
 0x298   : > { %v4515_v29 = vadd.s32 %v1121_v39, %v1119_v61  ;;  %v1719_v54 = vpop.f32.mrf.mxu2  ;;  %v1169_v39 = vshll.u32 %v1168_v40, 16 }
 0x299   : > { %v1832_v28 = vpop.f32.mrf.mxu3 }
 0x29a   : > { %v4525_v24 = vadd.f32 %v1832_v28, %v1719_v54  ;;  %vm1493_vm11 = vcmp.eq.s32.totalorder %v3732_v11, %v4515_v29  ;;  %vm1494_vm12 = vcmp.eq.s32.totalorder %v3735_v12, %v4515_v29 }
 0x29b   : > { %3168 = vmatmul.msk.f32.gmra.mxu2 %vm1493_vm11, %v5555_v46  ;;  %3200 = vmatmul.msk.f32.gmra.mxu3 %vm1494_vm12, %v5555_v46 }
 0x29c   : > { %1926 = vst.msk [vmem:[%s4523_s27 + $0x8] sm:$0xff] %vm344_vm0, %v4525_v24 }
 0x29d   : > { %v1134_v62 = vpop.xlane.xlu2 %1133 }
 0x29e   : > { %v1135_v22 = vcvt.f32.s32 %v1134_v62 }
 0x2a0   : > { %v4536_v19 = vadd.s32 %v1137_v48, %v1135_v22  ;;  %v1722_v10 = vpop.f32.mrf.mxu2  ;;  %v977_v48 = vshll.u32 %v976_v52, 16  ;;  %v1969_v52 = vperm.slane %v4264_v8, 4 }
 0x2a1   : > { %v1835_v2 = vpop.f32.mrf.mxu3 }
 0x2a2   : > { %v4539_v43 = vadd.f32 %v1835_v2, %v1722_v10  ;;  %vm1495_vm13 = vcmp.eq.s32.totalorder %v3732_v11, %v4536_v19  ;;  %vm1496_vm14 = vcmp.eq.s32.totalorder %v3735_v12, %v4536_v19 }
 0x2a3   : > { %3169 = vmatmul.msk.f32.gmra.mxu2 %vm1495_vm13, %v5555_v46  ;;  %3201 = vmatmul.msk.f32.gmra.mxu3 %vm1496_vm14, %v5555_v46 }
 0x2a4   : > { %1927 = vst.msk [vmem:[%s4523_s27 + $0x10] sm:$0xff] %vm344_vm0, %v4539_v43 }
 0x2a5   : > { %v1150_v44 = vpop.xlane.xlu2 %1149 }
 0x2a6   : > { %v1151_v31 = vcvt.f32.s32 %v1150_v44 }
 0x2a8   : > { %v4550_v5 = vadd.s32 %v1153_v45, %v1151_v31  ;;  %v1725_v3 = vpop.f32.mrf.mxu2 }
 0x2a9   : > { %v1838_v38 = vpop.f32.mrf.mxu3 }
 0x2aa   : > { %v4553_v34 = vadd.f32 %v1838_v38, %v1725_v3  ;;  %vm1497_vm15 = vcmp.eq.s32.totalorder %v3732_v11, %v4550_v5  ;;  %vm1498_vm1 = vcmp.eq.s32.totalorder %v3735_v12, %v4550_v5 }
 0x2ab   : > { %3170 = vmatmul.msk.f32.gmra.mxu2 %vm1497_vm15, %v5555_v46  ;;  %3202 = vmatmul.msk.f32.gmra.mxu3 %vm1498_vm1, %v5555_v46 }
 0x2ac   : > { %1928 = vst.msk [vmem:[%s4523_s27 + $0x18] sm:$0xff] %vm344_vm0, %v4553_v34 }
 0x2ad   : > { %v1166_v6 = vpop.xlane.xlu2 %1165 }
 0x2ae   : > { %v1167_v13 = vcvt.f32.s32 %v1166_v6  ;;  %v1965_v6 = vperm.slane %v4264_v8, 0 }
 0x2b0   : > { %v4564_v61 = vadd.s32 %v1169_v39, %v1167_v13  ;;  %v1728_v54 = vpop.f32.mrf.mxu2  ;;  %v1966_v39 = vperm.slane %v4264_v8, 1 }
 0x2b1   : > { %v1841_v28 = vpop.f32.mrf.mxu3 }
 0x2b2   : > { %v4567_v62 = vadd.f32 %v1841_v28, %v1728_v54  ;;  %vm1499_vm2 = vcmp.eq.s32.totalorder %v3732_v11, %v4564_v61  ;;  %vm1500_vm3 = vcmp.eq.s32.totalorder %v3735_v12, %v4564_v61  ;;  %v1967_v54 = vperm.slane %v4264_v8, 2 }
 0x2b3   : > { %3171 = vmatmul.msk.f32.gmra.mxu2 %vm1499_vm2, %v5555_v46  ;;  %3203 = vmatmul.msk.f32.gmra.mxu3 %vm1500_vm3, %v5555_v46  ;;  %v974_v22 = vpop.xlane.xlu0 %973  ;;  %v1968_v28 = vperm.slane %v4264_v8, 3 }
 0x2b4   : > { %1929 = vst.msk [vmem:[%s4523_s27 + $0x20] sm:$0xff] %vm344_vm0, %v4567_v62  ;;  %v975_v10 = vcvt.f32.s32 %v974_v22  ;;  %v1970_v22 = vperm.slane %v4264_v8, 5 }
 0x2b6   : > { %v4578_v2 = vadd.s32 %v977_v48, %v975_v10  ;;  %v1971_v48 = vperm.slane %v4264_v8, 6  ;;  %v1972_v10 = vperm.slane %v4264_v8, 7  ;;  %v1978_v8 = vperm.slane %v4286_v51, 5 }
 0x2b8   : > { %v1957_v37 = vperm.slane %v4578_v2, 0  ;;  %v1958_v9 = vperm.slane %v4578_v2, 1  ;;  %v1959_v44 = vperm.slane %v4578_v2, 2  ;;  %v1960_v31 = vperm.slane %v4578_v2, 3 }
 0x2b9   : > { %v1961_v45 = vperm.slane %v4578_v2, 4  ;;  %v1962_v40 = vperm.slane %v4578_v2, 5  ;;  %v1963_v3 = vperm.slane %v4578_v2, 6  ;;  %v1964_v38 = vperm.slane %v4578_v2, 7 }
 0x2ba   : > { %2213 = vst [vmem:[#allocation1] ss:$9 sm:$0xff] %v1957_v37  ;;  %v1973_v37 = vperm.slane %v4286_v51, 0  ;;  %vm1475_vm5 = vcmp.eq.s32.totalorder %v3732_v11, %v4578_v2  ;;  %vm1476_vm6 = vcmp.eq.s32.totalorder %v3735_v12, %v4578_v2  ;;  %v1993_v2 = vperm.slane %v4330_v16, 4 }
 0x2bb   : > { %2215 = vst [vmem:[#allocation1 + $0x1] ss:$9 sm:$0xff] %v1958_v9  ;;  %v1974_v9 = vperm.slane %v4286_v51, 1  ;;  %3159 = vmatmul.msk.f32.vlgmr.msrb.gmra.mxu0 %vm1475_vm5, %v5555_v46  ;;  %3191 = vmatmul.msk.f32.vlgmr.msrb.gmra.mxu1 %vm1476_vm6, %v5555_v46 }
 0x2bc   : > { %2217 = vst [vmem:[#allocation1 + $0x2] ss:$9 sm:$0xff] %v1959_v44 }
 0x2bd   : > { %2219 = vst [vmem:[#allocation1 + $0x3] ss:$9 sm:$0xff] %v1960_v31  ;;  %v1975_v31 = vperm.slane %v4286_v51, 2 }
 0x2be   : > { %2221 = vst [vmem:[#allocation1 + $0x4] ss:$9 sm:$0xff] %v1961_v45  ;;  %v1976_v45 = vperm.slane %v4286_v51, 3 }
 0x2bf   : > { %2223 = vst [vmem:[#allocation1 + $0x5] ss:$9 sm:$0xff] %v1962_v40  ;;  %v1977_v40 = vperm.slane %v4286_v51, 4 }
 0x2c0   : > { %2225 = vst [vmem:[#allocation1 + $0x6] ss:$9 sm:$0xff] %v1963_v3  ;;  %v1979_v3 = vperm.slane %v4286_v51, 6 }
 0x2c1   : > { %2227 = vst [vmem:[#allocation1 + $0x7] ss:$9 sm:$0xff] %v1964_v38  ;;  %v1980_v38 = vperm.slane %v4286_v51, 7  ;;  %v1986_v51 = vperm.slane %v4308_v15, 5 }
 0x2c8   : > { %v4590_v13 = vld [vmem:[#allocation1] sm:$0xff] }
 0x2c9   : > { %2229 = vst [vmem:[#allocation1] ss:$9 sm:$0xff] %v1965_v6  ;;  %v1981_v6 = vperm.slane %v4308_v15, 0 }
 0x2ca   : > { %2230 = vst [vmem:[#allocation1 + $0x1] ss:$9 sm:$0xff] %v1966_v39  ;;  %v1982_v39 = vperm.slane %v4308_v15, 1 }
 0x2cb   : > { %2231 = vst [vmem:[#allocation1 + $0x2] ss:$9 sm:$0xff] %v1967_v54 }
 0x2cc   : > { %2232 = vst [vmem:[#allocation1 + $0x3] ss:$9 sm:$0xff] %v1968_v28  ;;  %v1983_v28 = vperm.slane %v4308_v15, 2 }
 0x2cd   : > { %2233 = vst [vmem:[#allocation1 + $0x4] ss:$9 sm:$0xff] %v1969_v52  ;;  %v1984_v52 = vperm.slane %v4308_v15, 3 }
 0x2ce   : > { %2234 = vst [vmem:[#allocation1 + $0x5] ss:$9 sm:$0xff] %v1970_v22  ;;  %v1985_v22 = vperm.slane %v4308_v15, 4 }
 0x2cf   : > { %2235 = vst [vmem:[#allocation1 + $0x6] ss:$9 sm:$0xff] %v1971_v48  ;;  %v1987_v48 = vperm.slane %v4308_v15, 6 }
 0x2d0   : > { %2236 = vst [vmem:[#allocation1 + $0x7] ss:$9 sm:$0xff] %v1972_v10  ;;  %v1988_v10 = vperm.slane %v4308_v15, 7  ;;  %v1989_v15 = vperm.slane %v4330_v16, 0 }
 0x2d7   : > { %v4600_v44 = vld [vmem:[#allocation1] sm:$0xff] }
 0x2d8   : > { %2238 = vst [vmem:[#allocation1] ss:$9 sm:$0xff] %v1973_v37  ;;  %v1253_v37 = vand.u32 65535, %v4372_v0  ;;  %v1990_v0 = vperm.slane %v4330_v16, 1 }
 0x2d9   : > { %2239 = vst [vmem:[#allocation1 + $0x1] ss:$9 sm:$0xff] %v1974_v9  ;;  %v4619_v9 = vpop.xlane.xlu2 %1257 }
 0x2da   : > { %2240 = vst [vmem:[#allocation1 + $0x2] ss:$9 sm:$0xff] %v1975_v31  ;;  %v1255_v31 = vcvt.s32.f32 %v1253_v37  ;;  %vm1259_vm4 = vcmp.eq.f32.partialorder %v4386_v20, %v4619_v9  ;;  %v1991_v20 = vperm.slane %v4330_v16, 2 }
 0x2db   : > { %2241 = vst [vmem:[#allocation1 + $0x3] ss:$9 sm:$0xff] %v1976_v45 }
 0x2dc   : > { %2242 = vst [vmem:[#allocation1 + $0x4] ss:$9 sm:$0xff] %v1977_v40  ;;  %v1260_v45 = vsel %vm1259_vm4, %v1255_v31, inf }
 0x2dd   : > { %2243 = vst [vmem:[#allocation1 + $0x5] ss:$9 sm:$0xff] %v1978_v8  ;;  %1261 = vmin.xlane.f32.xlu0 %v1260_v45  ;;  %v1992_v8 = vperm.slane %v4330_v16, 3 }
 0x2de   : > { %2244 = vst [vmem:[#allocation1 + $0x6] ss:$9 sm:$0xff] %v1979_v3  ;;  %v1731_v3 = vpop.f32.mrf.mxu2 }
 0x2df   : > { %2245 = vst [vmem:[#allocation1 + $0x7] ss:$9 sm:$0xff] %v1980_v38  ;;  %v1844_v38 = vpop.f32.mrf.mxu3 }
 0x2e1   : > { %v4643_v37 = vpop.xlane.xlu2 %1273 }
 0x2e2   : > { %vm1275_vm7 = vcmp.eq.f32.partialorder %v4414_v17, %v4643_v37  ;;  %v2000_v17 = vperm.slane %v4359_v32, 3 }
 0x2e6   : > { %v4610_v54 = vld [vmem:[#allocation1] sm:$0xff] }
 0x2e7   : > { %2247 = vst [vmem:[#allocation1] ss:$9 sm:$0xff] %v1981_v6  ;;  %v1994_v6 = vperm.slane %v4330_v16, 5 }
 0x2e8   : > { %2248 = vst [vmem:[#allocation1 + $0x1] ss:$9 sm:$0xff] %v1982_v39  ;;  %v1182_v39 = vpop.xlane.xlu0 %1181 }
 0x2e9   : > { %2249 = vst [vmem:[#allocation1 + $0x2] ss:$9 sm:$0xff] %v1983_v28  ;;  %v1995_v28 = vperm.slane %v4330_v16, 6 }
 0x2ea   : > { %2250 = vst [vmem:[#allocation1 + $0x3] ss:$9 sm:$0xff] %v1984_v52  ;;  %v1184_v52 = vcvt.f32.s32 %v4410_v50 }
 0x2eb   : > { %2251 = vst [vmem:[#allocation1 + $0x4] ss:$9 sm:$0xff] %v1985_v22  ;;  %v4639_v22 = vadd.f32 %v1844_v38, %v1731_v3  ;;  %v1734_v3 = vpop.f32.mrf.mxu2  ;;  %v1847_v38 = vpop.f32.mrf.mxu3 }
 0x2ec   : > { %2252 = vst [vmem:[#allocation1 + $0x5] ss:$9 sm:$0xff] %v1986_v51  ;;  %v1996_v51 = vperm.slane %v4330_v16, 7  ;;  %v1185_v31 = vshll.u32 %v1184_v52, 16  ;;  %v1997_v16 = vperm.slane %v4359_v32, 0 }
 0x2ed   : > { %2253 = vst [vmem:[#allocation1 + $0x6] ss:$9 sm:$0xff] %v1987_v48  ;;  %v1269_v48 = vand.u32 65535, %v4398_v59  ;;  %v1998_v59 = vperm.slane %v4359_v32, 1 }
 0x2ee   : > { %2254 = vst [vmem:[#allocation1 + $0x7] ss:$9 sm:$0xff] %v1988_v10  ;;  %v1183_v10 = vcvt.f32.s32 %v1182_v39  ;;  %v5558_v39 = vld [vmem:[#allocation9_spill] sm:$0xff] }
 0x2ef   : > { %1930 = vst.msk [vmem:[%s4523_s27 + $0x28] sm:$0xff] %vm344_vm0, %v4639_v22  ;;  %v1271_v45 = vcvt.s32.f32 %v1269_v48  ;;  %v1200_v48 = vcvt.f32.s32 %v4425_v26 }
 0x2f0   : > { %v1198_v52 = vpop.xlane.xlu0 %1197 }
 0x2f1   : > { %v1276_v50 = vsel %vm1275_vm7, %v1271_v45, inf }
 0x2f2   : > { %1277 = vmin.xlane.f32.xlu0 %v1276_v50 }
 0x2f5   : > { %v4631_v40 = vld [vmem:[#allocation1] sm:$0xff] }
 0x2f6   : > { %2256 = vst [vmem:[#allocation1] ss:$9 sm:$0xff] %v1989_v15  ;;  %v4648_v15 = vadd.s32 %v1185_v31, %v1183_v10  ;;  %v4670_v10 = vadd.f32 %v1847_v38, %v1734_v3  ;;  %v2004_v31 = vperm.slane %v4359_v32, 7  ;;  %v2006_v38 = vperm.slane %v4375_v1, 1 }
 0x2f7   : > { %2257 = vst [vmem:[#allocation1 + $0x1] ss:$9 sm:$0xff] %v1990_v0  ;;  %v822_v0 = vpop.xlane.xlu1 %821 }
 0x2f8   : > { %2258 = vst [vmem:[#allocation1 + $0x2] ss:$9 sm:$0xff] %v1991_v20  ;;  %vm1501_vm8 = vcmp.eq.s32.totalorder %v3732_v11, %v4648_v15  ;;  %vm1502_vm9 = vcmp.eq.s32.totalorder %v3735_v12, %v4648_v15  ;;  %vm890_vm11 = vcmp.le.f32.partialorder %v5558_v39, %v822_v0 }
 0x2f9   : > { %2259 = vst [vmem:[#allocation1 + $0x3] ss:$9 sm:$0xff] %v1992_v8  ;;  %v1999_v8 = vperm.slane %v4359_v32, 2  ;;  %3172 = vmatmul.msk.f32.gmra.mxu2 %vm1501_vm8, %v5555_v46  ;;  %3204 = vmatmul.msk.f32.gmra.mxu3 %vm1502_vm9, %v5555_v46  ;;  %v954_v50 = vsel %vm890_vm11, %v3735_v12, 256 }
 0x2fa   : > { %2260 = vst [vmem:[#allocation1 + $0x4] ss:$9 sm:$0xff] %v1993_v2  ;;  %v2001_v2 = vperm.slane %v4359_v32, 4 }
 0x2fb   : > { %2261 = vst [vmem:[#allocation1 + $0x5] ss:$9 sm:$0xff] %v1994_v6  ;;  %v5557_v6 = vld [vmem:[#allocation10_spill] sm:$0xff] }
 0x2fc   : > { %2262 = vst [vmem:[#allocation1 + $0x6] ss:$9 sm:$0xff] %v1995_v28  ;;  %vm889_vm10 = vcmp.le.f32.partialorder %v5557_v6, %v822_v0  ;;  %v2002_v28 = vperm.slane %v4359_v32, 5  ;;  %v4676_v0 = vpop.xlane.xlu2 %1289 }
 0x2fd   : > { %2263 = vst [vmem:[#allocation1 + $0x7] ss:$9 sm:$0xff] %v1996_v51  ;;  %v2003_v51 = vperm.slane %v4359_v32, 6  ;;  %v953_v45 = vsel %vm889_vm10, %v3732_v11, 256  ;;  %vm1291_vm13 = vcmp.eq.f32.partialorder %v4429_v36, %v4676_v0  ;;  %v2007_v36 = vperm.slane %v4375_v1, 2 }
 0x2fe   : > { %vm1395_vm12 = vcmp.lt.s32.totalorder %v953_v45, %v954_v50  ;;  %1931 = vst.msk [vmem:[%s4523_s27 + $0x30] sm:$0xff] %vm344_vm0, %v4670_v10 }
 0x2ff   : > { %v4685_v3 = vsel %vm1395_vm12, %v953_v45, %v954_v50  ;;  %v5561_v45 = vld [vmem:[#allocation11_spill] sm:$0xff]  ;;  %v2010_v50 = vperm.slane %v4375_v1, 5 }
 0x300   : > { %v1398_v39 = vshra.s32 %v4685_v3, 16 }
 0x304   : > { %v4654_v20 = vld [vmem:[#allocation1] sm:$0xff] }
 0x305   : > { %2265 = vst [vmem:[#allocation1] ss:$9 sm:$0xff] %v1997_v16  ;;  %v1285_v16 = vand.u32 65535, %v4419_v57  ;;  %v2005_v57 = vperm.slane %v4375_v1, 0 }
 0x306   : > { %2266 = vst [vmem:[#allocation1 + $0x1] ss:$9 sm:$0xff] %v1998_v59  ;;  %v1199_v59 = vcvt.f32.s32 %v1198_v52  ;;  %v1737_v52 = vpop.f32.mrf.mxu2 }
 0x307   : > { %2267 = vst [vmem:[#allocation1 + $0x2] ss:$9 sm:$0xff] %v1999_v8  ;;  %v1201_v8 = vshll.u32 %v1200_v48, 16  ;;  %v1287_v26 = vcvt.s32.f32 %v1285_v16  ;;  %v2009_v48 = vperm.slane %v4375_v1, 4  ;;  %v1214_v16 = vpop.xlane.xlu0 %1213 }
 0x308   : > { %2268 = vst [vmem:[#allocation1 + $0x3] ss:$9 sm:$0xff] %v2000_v17 }
 0x309   : > { %2269 = vst [vmem:[#allocation1 + $0x4] ss:$9 sm:$0xff] %v2001_v2  ;;  %v4681_v17 = vadd.s32 %v1201_v8, %v1199_v59  ;;  %v1292_v32 = vsel %vm1291_vm13, %v1287_v26, inf  ;;  %v825_v2 = vpop.xlane.xlu1 %824  ;;  %v4704_v59 = vcvt.s32.f32 %v1398_v39  ;;  %v2011_v8 = vperm.slane %v4375_v1, 6 }
 0x30a   : > { %2270 = vst [vmem:[#allocation1 + $0x5] ss:$9 sm:$0xff] %v2002_v28  ;;  %1293 = vmin.xlane.f32.xlu0 %v1292_v32  ;;  %v2008_v28 = vperm.slane %v4375_v1, 3  ;;  %vm892_vm2 = vcmp.le.f32.partialorder %v5561_v45, %v825_v2  ;;  %v1216_v26 = vcvt.f32.s32 %v4440_v7  ;;  %v1215_v39 = vcvt.f32.s32 %v1214_v16 }
 0x30b   : > { %2271 = vst [vmem:[#allocation1 + $0x6] ss:$9 sm:$0xff] %v2003_v51  ;;  %vm1503_vm14 = vcmp.eq.s32.totalorder %v3732_v11, %v4681_v17  ;;  %vm1504_vm15 = vcmp.eq.s32.totalorder %v3735_v12, %v4681_v17  ;;  %v1850_v51 = vpop.f32.mrf.mxu3 }
 0x30c   : > { %2272 = vst [vmem:[#allocation1 + $0x7] ss:$9 sm:$0xff] %v2004_v31  ;;  %3173 = vmatmul.msk.f32.gmra.mxu2 %vm1503_vm14, %v5555_v46  ;;  %3205 = vmatmul.msk.f32.gmra.mxu3 %vm1504_vm15, %v5555_v46  ;;  %v5560_v31 = vld [vmem:[#allocation12_spill] sm:$0xff]  ;;  %v4708_v32 = vadd.f32 %v1850_v51, %v1737_v52  ;;  %v1217_v7 = vshll.u32 %v1216_v26, 16  ;;  %v2017_v26 = vperm.slane %v4396_v21, 4 }
 0x30d   : > { %vm891_vm1 = vcmp.le.f32.partialorder %v5560_v31, %v825_v2  ;;  %v956_v2 = vsel %vm892_vm2, %v3735_v12, 256  ;;  %v2014_v31 = vperm.slane %v4396_v21, 1 }
 0x30e   : > { %1932 = vst.msk [vmem:[%s4523_s27 + $0x38] sm:$0xff] %vm344_vm0, %v4708_v32  ;;  %v4720_v52 = vadd.s32 %v1217_v7, %v1215_v39  ;;  %v2019_v7 = vperm.slane %v4396_v21, 6 }
 0x310   : > { %vm1505_vm5 = vcmp.eq.s32.totalorder %v3732_v11, %v4720_v52  ;;  %vm1506_vm6 = vcmp.eq.s32.totalorder %v3735_v12, %v4720_v52 }
 0x311   : > { %v828_v45 = vpop.xlane.xlu1 %827 }
 0x312   : > { %1401 = vmin.xlane.f32.xlu0 %v4704_v59 }
 0x313   : > { %v4689_v6 = vld [vmem:[#allocation1] sm:$0xff] }
 0x314   : > { %5559 = vst [vmem:[#allocation8_spill] sm:$0xff] %v4689_v6  ;;  %3174 = vmatmul.msk.f32.gmra.mxu2 %vm1505_vm5, %v5555_v46  ;;  %3206 = vmatmul.msk.f32.gmra.mxu3 %vm1506_vm6, %v5555_v46 }
 0x315   : > { %2274 = vst [vmem:[#allocation1] ss:$9 sm:$0xff] %v2005_v57  ;;  %v2012_v57 = vperm.slane %v4375_v1, 7 }
 0x316   : > { %2275 = vst [vmem:[#allocation1 + $0x1] ss:$9 sm:$0xff] %v2006_v38  ;;  %v955_v38 = vsel %vm891_vm1, %v3732_v11, 256 }
 0x317   : > { %2276 = vst [vmem:[#allocation1 + $0x2] ss:$9 sm:$0xff] %v2007_v36  ;;  %v1301_v36 = vand.u32 65535, %v4434_v25  ;;  %vm1411_vm3 = vcmp.lt.s32.totalorder %v955_v38, %v956_v2 }
 0x318   : > { %2277 = vst [vmem:[#allocation1 + $0x3] ss:$9 sm:$0xff] %v2008_v28  ;;  %v4715_v28 = vpop.xlane.xlu2 %1305  ;;  %v4724_v25 = vsel %vm1411_vm3, %v955_v38, %v956_v2  ;;  %v5563_v38 = vld [vmem:[#allocation13_spill] sm:$0xff]  ;;  %v2018_v2 = vperm.slane %v4396_v21, 5 }
 0x319   : > { %2278 = vst [vmem:[#allocation1 + $0x4] ss:$9 sm:$0xff] %v2009_v48  ;;  %v1303_v1 = vcvt.s32.f32 %v1301_v36  ;;  %vm1307_vm4 = vcmp.eq.f32.partialorder %v4444_v42, %v4715_v28  ;;  %v2013_v48 = vperm.slane %v4396_v21, 0  ;;  %v1414_v16 = vshra.s32 %v4724_v25, 16  ;;  %v1230_v36 = vpop.xlane.xlu0 %1229 }
 0x31a   : > { %2279 = vst [vmem:[#allocation1 + $0x5] ss:$9 sm:$0xff] %v2010_v50  ;;  %v2015_v42 = vperm.slane %v4396_v21, 2  ;;  %vm894_vm8 = vcmp.le.f32.partialorder %v5563_v38, %v828_v45  ;;  %v2021_v38 = vperm.slane %v4506_v58, 0 }
 0x31b   : > { %2280 = vst [vmem:[#allocation1 + $0x6] ss:$9 sm:$0xff] %v2011_v8  ;;  %v1308_v51 = vsel %vm1307_vm4, %v1303_v1, inf  ;;  %v2016_v8 = vperm.slane %v4396_v21, 3  ;;  %v4743_v39 = vcvt.s32.f32 %v1414_v16  ;;  %v1232_v1 = vcvt.f32.s32 %v4455_v47 }
 0x31c   : > { %2281 = vst [vmem:[#allocation1 + $0x7] ss:$9 sm:$0xff] %v2012_v57  ;;  %1309 = vmin.xlane.f32.xlu2 %v1308_v51  ;;  %v5562_v57 = vld [vmem:[#allocation14_spill] sm:$0xff]  ;;  %v2020_v51 = vperm.slane %v4396_v21, 7 }
 0x31d   : > { %vm893_vm7 = vcmp.le.f32.partialorder %v5562_v57, %v828_v45  ;;  %v1317_v45 = vand.u32 65535, %v4449_v33  ;;  %v2022_v33 = vperm.slane %v4506_v58, 1 }
 0x31f   : > { %v1319_v47 = vcvt.s32.f32 %v1317_v45 }
 0x320   : > { %v4752_v16 = vpop.xlane.xlu2 %1321 }
 0x321   : > { %vm1323_vm10 = vcmp.eq.f32.partialorder %v4459_v56, %v4752_v16  ;;  %v2023_v56 = vperm.slane %v4506_v58, 2 }
 0x322   : > { %v1324_v21 = vsel %vm1323_vm10, %v1319_v47, inf  ;;  %v2028_v47 = vperm.slane %v4506_v58, 7 }
 0x323   : > { %v4728_v50 = vld [vmem:[#allocation1] sm:$0xff]  ;;  %1325 = vmin.xlane.f32.xlu1 %v1324_v21 }
 0x324   : > { %2283 = vst [vmem:[#allocation1] ss:$9 sm:$0xff] %v2013_v48  ;;  %v957_v48 = vsel %vm893_vm7, %v3732_v11, 256  ;;  %1417 = vmin.xlane.f32.xlu2 %v4743_v39 }
 0x325   : > { %2284 = vst [vmem:[#allocation1 + $0x1] ss:$9 sm:$0xff] %v2014_v31  ;;  %v958_v31 = vsel %vm894_vm8, %v3735_v12, 256 }
 0x326   : > { %2285 = vst [vmem:[#allocation1 + $0x2] ss:$9 sm:$0xff] %v2015_v42  ;;  %v1231_v42 = vcvt.f32.s32 %v1230_v36  ;;  %vm1427_vm9 = vcmp.lt.s32.totalorder %v957_v48, %v958_v31 }
 0x327   : > { %2286 = vst [vmem:[#allocation1 + $0x3] ss:$9 sm:$0xff] %v2016_v8  ;;  %v1233_v8 = vshll.u32 %v1232_v1, 16  ;;  %v4758_v57 = vsel %vm1427_vm9, %v957_v48, %v958_v31  ;;  %v2024_v1 = vperm.slane %v4506_v58, 3  ;;  %v2026_v48 = vperm.slane %v4506_v58, 5  ;;  %v1246_v31 = vpop.xlane.xlu0 %1245 }
 0x328   : > { %2287 = vst [vmem:[#allocation1 + $0x4] ss:$9 sm:$0xff] %v2017_v26 }
 0x329   : > { %2288 = vst [vmem:[#allocation1 + $0x5] ss:$9 sm:$0xff] %v2018_v2  ;;  %v4754_v26 = vadd.s32 %v1233_v8, %v1231_v42  ;;  %v831_v2 = vpop.xlane.xlu1 %830  ;;  %v1248_v42 = vcvt.f32.s32 %v4468_v30  ;;  %v2027_v8 = vperm.slane %v4506_v58, 6 }
 0x32a   : > { %2289 = vst [vmem:[#allocation1 + $0x6] ss:$9 sm:$0xff] %v2019_v7  ;;  %v1430_v7 = vshra.s32 %v4758_v57, 16  ;;  %vm895_vm13 = vcmp.le.f32.partialorder %v4322_v41, %v831_v2  ;;  %vm896_vm14 = vcmp.le.f32.partialorder %v4319_v35, %v831_v2  ;;  %v1333_v35 = vand.u32 65535, %v4464_v63 }
 0x32b   : > { %2290 = vst [vmem:[#allocation1 + $0x7] ss:$9 sm:$0xff] %v2020_v51  ;;  %vm1507_vm11 = vcmp.eq.s32.totalorder %v3732_v11, %v4754_v26  ;;  %vm1508_vm12 = vcmp.eq.s32.totalorder %v3735_v12, %v4754_v26  ;;  %v2025_v51 = vperm.slane %v4506_v58, 4  ;;  %v959_v21 = vsel %vm895_vm13, %v3732_v11, 256 }
 0x32c   : > { %3175 = vmatmul.msk.f32.gmra.mxu2 %vm1507_vm11, %v5555_v46  ;;  %3207 = vmatmul.msk.f32.gmra.mxu3 %vm1508_vm12, %v5555_v46  ;;  %v4777_v45 = vcvt.s32.f32 %v1430_v7  ;;  %v960_v41 = vsel %vm896_vm14, %v3735_v12, 256  ;;  %v1249_v30 = vshll.u32 %v1248_v42, 16  ;;  %v1335_v2 = vcvt.s32.f32 %v1333_v35 }
 0x32d   : > { %vm1443_vm15 = vcmp.lt.s32.totalorder %v959_v21, %v960_v41  ;;  %v2029_v63 = vperm.slane %v4515_v29, 0  ;;  %v2032_v42 = vperm.slane %v4515_v29, 3  ;;  %v2089_v6 = vperm.slane %v4754_v26, 4 }
 0x32e   : > { %1433 = vmin.xlane.f32.xlu1 %v4777_v45 }
 0x332   : > { %v4762_v36 = vld [vmem:[#allocation1] sm:$0xff] }
 0x333   : > { %2292 = vst [vmem:[#allocation1] ss:$9 sm:$0xff] %v2021_v38  ;;  %v1247_v38 = vcvt.f32.s32 %v1246_v31 }
 0x334   : > { %2293 = vst [vmem:[#allocation1 + $0x1] ss:$9 sm:$0xff] %v2022_v33  ;;  %v4786_v33 = vpop.xlane.xlu2 %1337 }
 0x335   : > { %2294 = vst [vmem:[#allocation1 + $0x2] ss:$9 sm:$0xff] %v2023_v56  ;;  %v4788_v7 = vadd.s32 %v1249_v30, %v1247_v38  ;;  %vm1339_vm1 = vcmp.eq.f32.partialorder %v4470_v14, %v4786_v33  ;;  %v4792_v56 = vsel %vm1443_vm15, %v959_v21, %v960_v41  ;;  %v2031_v14 = vperm.slane %v4515_v29, 2 }
 0x336   : > { %2295 = vst [vmem:[#allocation1 + $0x3] ss:$9 sm:$0xff] %v2024_v1  ;;  %v1340_v58 = vsel %vm1339_vm1, %v1335_v2, inf  ;;  %v834_v1 = vpop.xlane.xlu1 %833  ;;  %v1446_v31 = vshra.s32 %v4792_v56, 16  ;;  %v2035_v41 = vperm.slane %v4515_v29, 6 }
 0x337   : > { %2296 = vst [vmem:[#allocation1 + $0x4] ss:$9 sm:$0xff] %v2025_v51  ;;  %1341 = vmin.xlane.f32.xlu0 %v1340_v58  ;;  %v2030_v51 = vperm.slane %v4515_v29, 1  ;;  %vm1509_vm2 = vcmp.eq.s32.totalorder %v3732_v11, %v4788_v7  ;;  %vm1510_vm3 = vcmp.eq.s32.totalorder %v3735_v12, %v4788_v7  ;;  %vm897_vm4 = vcmp.le.f32.partialorder %v4344_v55, %v834_v1 }
 0x338   : > { %2297 = vst [vmem:[#allocation1 + $0x5] ss:$9 sm:$0xff] %v2026_v48  ;;  %3176 = vmatmul.msk.f32.gmra.mxu2 %vm1509_vm2, %v5555_v46  ;;  %3208 = vmatmul.msk.f32.gmra.mxu3 %vm1510_vm3, %v5555_v46  ;;  %vm898_vm5 = vcmp.le.f32.partialorder %v4341_v49, %v834_v1  ;;  %v4811_v21 = vcvt.s32.f32 %v1446_v31  ;;  %v961_v35 = vsel %vm897_vm4, %v3732_v11, 256  ;;  %v1349_v55 = vand.u32 65535, %v4479_v53 }
 0x339   : > { %2298 = vst [vmem:[#allocation1 + $0x6] ss:$9 sm:$0xff] %v2027_v8  ;;  %v2033_v8 = vperm.slane %v4515_v29, 4  ;;  %v962_v38 = vsel %vm898_vm5, %v3735_v12, 256  ;;  %v2036_v49 = vperm.slane %v4515_v29, 7  ;;  %v1365_v53 = vand.u32 65535, %v4489_v23 }
 0x33a   : > { %2299 = vst [vmem:[#allocation1 + $0x7] ss:$9 sm:$0xff] %v2028_v47  ;;  %v2034_v47 = vperm.slane %v4515_v29, 5  ;;  %vm1459_vm6 = vcmp.lt.s32.totalorder %v961_v35, %v962_v38  ;;  %v1351_v2 = vcvt.s32.f32 %v1349_v55  ;;  %v2037_v29 = vperm.slane %v4536_v19, 0 }
 0x33b   : > { %v2044_v55 = vperm.slane %v4536_v19, 7 }
 0x33c   : > { %v4819_v30 = vpop.xlane.xlu2 %1353 }
 0x33d   : > { %vm1355_vm7 = vcmp.eq.f32.partialorder %v4482_v27, %v4819_v30 }
 0x33e   : > { %v1356_v58 = vsel %vm1355_vm7, %v1351_v2, inf }
 0x33f   : > { %1449 = vmin.xlane.f32.xlu0 %v4811_v21  ;;  %1357 = vmin.xlane.f32.xlu2 %v1356_v58 }
 0x341   : > { %v4796_v48 = vld [vmem:[#allocation1] sm:$0xff] }
 0x342   : > { %5564 = vst [vmem:[#allocation10_spill] sm:$0xff] %v4796_v48  ;;  %v3333_v48 = vld [vmem:[%s3597_s18 + $0x30] sm:$0xff] }
 0x343   : > { %2301 = vst [vmem:[#allocation1] ss:$9 sm:$0xff] %v2029_v63  ;;  %v4823_v63 = vsel %vm1459_vm6, %v961_v35, %v962_v38  ;;  %v2043_v38 = vperm.slane %v4536_v19, 6 }
 0x344   : > { %2302 = vst [vmem:[#allocation1 + $0x1] ss:$9 sm:$0xff] %v2030_v51  ;;  %v1462_v1 = vshra.s32 %v4823_v63, 16  ;;  %v2038_v51 = vperm.slane %v4536_v19, 1  ;;  %v4833_v27 = vpop.xlane.xlu2 %1369 }
 0x345   : > { %2303 = vst [vmem:[#allocation1 + $0x2] ss:$9 sm:$0xff] %v2031_v14  ;;  %v2039_v14 = vperm.slane %v4536_v19, 2  ;;  %vm1371_vm8 = vcmp.eq.f32.partialorder %v4492_v18, %v4833_v27  ;;  %v4845_v18 = vpop.xlane.xlu1 %1385 }
 0x346   : > { %2304 = vst [vmem:[#allocation1 + $0x3] ss:$9 sm:$0xff] %v2032_v42  ;;  %v2040_v42 = vperm.slane %v4536_v19, 3  ;;  %v4838_v23 = vcvt.s32.f32 %v1462_v1  ;;  %vm1387_vm9 = vcmp.eq.f32.partialorder %v4502_v4, %v4845_v18  ;;  %v2051_v4 = vperm.slane %v4550_v5, 6 }
 0x347   : > { %2305 = vst [vmem:[#allocation1 + $0x4] ss:$9 sm:$0xff] %v2033_v8  ;;  %v1367_v8 = vcvt.s32.f32 %v1365_v53  ;;  %v2045_v53 = vperm.slane %v4550_v5, 0 }
 0x348   : > { %2306 = vst [vmem:[#allocation1 + $0x5] ss:$9 sm:$0xff] %v2034_v47  ;;  %v2041_v47 = vperm.slane %v4536_v19, 4  ;;  %1465 = vmin.xlane.f32.xlu2 %v4838_v23 }
 0x349   : > { %2307 = vst [vmem:[#allocation1 + $0x6] ss:$9 sm:$0xff] %v2035_v41  ;;  %v2042_v41 = vperm.slane %v4536_v19, 5  ;;  %v1372_v35 = vsel %vm1371_vm8, %v1367_v8, inf  ;;  %v2047_v19 = vperm.slane %v4550_v5, 2  ;;  %v2053_v8 = vperm.slane %v4564_v61, 0 }
 0x34a   : > { %2308 = vst [vmem:[#allocation1 + $0x7] ss:$9 sm:$0xff] %v2036_v49  ;;  %1373 = vmin.xlane.f32.xlu1 %v1372_v35  ;;  %v1381_v49 = vand.u32 65535, %v4499_v60  ;;  %v2048_v60 = vperm.slane %v4550_v5, 3  ;;  %v2055_v35 = vperm.slane %v4564_v61, 2 }
 0x34c   : > { %v1383_v2 = vcvt.s32.f32 %v1381_v49  ;;  %v2059_v49 = vperm.slane %v4564_v61, 6 }
 0x34e   : > { %v1388_v58 = vsel %vm1387_vm9, %v1383_v2, inf  ;;  %v2060_v2 = vperm.slane %v4564_v61, 7 }
 0x34f   : > { %1389 = vmin.xlane.f32.xlu0 %v1388_v58  ;;  %v1740_v58 = vpop.f32.mrf.mxu2 }
 0x351   : > { %v4829_v31 = vld [vmem:[#allocation1] sm:$0xff] }
 0x352   : > { %2310 = vst [vmem:[#allocation1] ss:$9 sm:$0xff] %v2037_v29  ;;  %v2046_v29 = vperm.slane %v4550_v5, 1 }
 0x353   : > { %2311 = vst [vmem:[#allocation1 + $0x1] ss:$9 sm:$0xff] %v2038_v51  ;;  %v2049_v51 = vperm.slane %v4550_v5, 4 }
 0x354   : > { %2312 = vst [vmem:[#allocation1 + $0x2] ss:$9 sm:$0xff] %v2039_v14  ;;  %v2050_v14 = vperm.slane %v4550_v5, 5 }
 0x355   : > { %2313 = vst [vmem:[#allocation1 + $0x3] ss:$9 sm:$0xff] %v2040_v42  ;;  %v2052_v42 = vperm.slane %v4550_v5, 7  ;;  %v2058_v5 = vperm.slane %v4564_v61, 5 }
 0x356   : > { %2314 = vst [vmem:[#allocation1 + $0x4] ss:$9 sm:$0xff] %v2041_v47  ;;  %v2054_v47 = vperm.slane %v4564_v61, 1 }
 0x357   : > { %2315 = vst [vmem:[#allocation1 + $0x5] ss:$9 sm:$0xff] %v2042_v41 }
 0x358   : > { %2316 = vst [vmem:[#allocation1 + $0x6] ss:$9 sm:$0xff] %v2043_v38  ;;  %v2056_v38 = vperm.slane %v4564_v61, 3 }
 0x359   : > { %2317 = vst [vmem:[#allocation1 + $0x7] ss:$9 sm:$0xff] %v2044_v55  ;;  %v2057_v55 = vperm.slane %v4564_v61, 4  ;;  %v2063_v61 = vperm.slane %v4648_v15, 2 }
 0x360   : > { %v4851_v1 = vld [vmem:[#allocation1] sm:$0xff] }
 0x361   : > { %2319 = vst [vmem:[#allocation1] ss:$9 sm:$0xff] %v2045_v53  ;;  %v1853_v53 = vpop.f32.mrf.mxu3 }
 0x362   : > { %2320 = vst [vmem:[#allocation1 + $0x1] ss:$9 sm:$0xff] %v2046_v29  ;;  %v4869_v29 = vadd.f32 %v1853_v53, %v1740_v58  ;;  %v2069_v58 = vperm.slane %v4681_v17, 0  ;;  %v1262_v53 = vpop.xlane.xlu0 %1261 }
 0x363   : > { %2321 = vst [vmem:[#allocation1 + $0x2] ss:$9 sm:$0xff] %v2047_v19  ;;  %v2061_v19 = vperm.slane %v4648_v15, 0 }
 0x364   : > { %2322 = vst [vmem:[#allocation1 + $0x3] ss:$9 sm:$0xff] %v2048_v60 }
 0x365   : > { %2323 = vst [vmem:[#allocation1 + $0x4] ss:$9 sm:$0xff] %v2049_v51  ;;  %v2062_v51 = vperm.slane %v4648_v15, 1 }
 0x366   : > { %2324 = vst [vmem:[#allocation1 + $0x5] ss:$9 sm:$0xff] %v2050_v14  ;;  %v1743_v14 = vpop.f32.mrf.mxu2 }
 0x367   : > { %2325 = vst [vmem:[#allocation1 + $0x6] ss:$9 sm:$0xff] %v2051_v4 }
 0x368   : > { %2326 = vst [vmem:[#allocation1 + $0x7] ss:$9 sm:$0xff] %v2052_v42  ;;  %v2064_v42 = vperm.slane %v4648_v15, 3 }
 0x369   : > { %1933 = vst.msk [vmem:[%s4523_s27 + $0x40] sm:$0xff] %vm344_vm0, %v4869_v29  ;;  %v1856_v4 = vpop.f32.mrf.mxu3 }
 0x36f   : > { %v4861_v41 = vld [vmem:[#allocation1] sm:$0xff] }
 0x370   : > { %5565 = vst [vmem:[#allocation9_spill] sm:$0xff] %v4861_v41 }
 0x371   : > { %2328 = vst [vmem:[#allocation1] ss:$9 sm:$0xff] %v2053_v8  ;;  %v2065_v8 = vperm.slane %v4648_v15, 4 }
 0x372   : > { %2329 = vst [vmem:[#allocation1 + $0x1] ss:$9 sm:$0xff] %v2054_v47  ;;  %v2066_v47 = vperm.slane %v4648_v15, 5 }
 0x373   : > { %2330 = vst [vmem:[#allocation1 + $0x2] ss:$9 sm:$0xff] %v2055_v35  ;;  %v2067_v35 = vperm.slane %v4648_v15, 6 }
 0x374   : > { %2331 = vst [vmem:[#allocation1 + $0x3] ss:$9 sm:$0xff] %v2056_v38  ;;  %v4883_v38 = vadd.f32 %v1856_v4, %v1743_v14  ;;  %v2071_v14 = vperm.slane %v4681_v17, 2  ;;  %v2072_v4 = vperm.slane %v4681_v17, 3 }
 0x375   : > { %2332 = vst [vmem:[#allocation1 + $0x4] ss:$9 sm:$0xff] %v2057_v55  ;;  %v2068_v55 = vperm.slane %v4648_v15, 7  ;;  %v2070_v15 = vperm.slane %v4681_v17, 1 }
 0x376   : > { %2333 = vst [vmem:[#allocation1 + $0x5] ss:$9 sm:$0xff] %v2058_v5  ;;  %v1746_v5 = vpop.f32.mrf.mxu2 }
 0x377   : > { %2334 = vst [vmem:[#allocation1 + $0x6] ss:$9 sm:$0xff] %v2059_v49  ;;  %v1859_v49 = vpop.f32.mrf.mxu3 }
 0x378   : > { %2335 = vst [vmem:[#allocation1 + $0x7] ss:$9 sm:$0xff] %v2060_v2  ;;  %v4889_v2 = vadd.f32 %v1859_v49, %v1746_v5 }
 0x379   : > { %1934 = vst.msk [vmem:[%s4523_s27 + $0x48] sm:$0xff] %vm344_vm0, %v4883_v38 }
 0x37a   : > { %1935 = vst.msk [vmem:[%s4523_s27 + $0x50] sm:$0xff] %vm344_vm0, %v4889_v2 }
 0x37e   : > { %v1749_v5 = vpop.f32.mrf.mxu2 }
 0x37f   : > { %v4875_v60 = vld [vmem:[#allocation1] sm:$0xff]  ;;  %v1862_v49 = vpop.f32.mrf.mxu3 }
 0x380   : > { %2337 = vst [vmem:[#allocation1] ss:$9 sm:$0xff] %v2061_v19  ;;  %v1264_v19 = vcvt.f32.s32 %v4619_v9  ;;  %v2075_v9 = vperm.slane %v4681_v17, 6 }
 0x381   : > { %2338 = vst [vmem:[#allocation1 + $0x1] ss:$9 sm:$0xff] %v2062_v51 }
 0x382   : > { %2339 = vst [vmem:[#allocation1 + $0x2] ss:$9 sm:$0xff] %v2063_v61  ;;  %v1263_v61 = vcvt.f32.s32 %v1262_v53  ;;  %v1278_v53 = vpop.xlane.xlu0 %1277 }
 0x383   : > { %2340 = vst [vmem:[#allocation1 + $0x3] ss:$9 sm:$0xff] %v2064_v42  ;;  %v2073_v42 = vperm.slane %v4681_v17, 4 }
 0x384   : > { %2341 = vst [vmem:[#allocation1 + $0x4] ss:$9 sm:$0xff] %v2065_v8  ;;  %v1265_v8 = vshll.u32 %v1264_v19, 16  ;;  %v1280_v19 = vcvt.f32.s32 %v4643_v37  ;;  %v2083_v37 = vperm.slane %v4720_v52, 6 }
 0x385   : > { %2342 = vst [vmem:[#allocation1 + $0x5] ss:$9 sm:$0xff] %v2066_v47  ;;  %v2074_v47 = vperm.slane %v4681_v17, 5 }
 0x386   : > { %2343 = vst [vmem:[#allocation1 + $0x6] ss:$9 sm:$0xff] %v2067_v35  ;;  %v2076_v35 = vperm.slane %v4681_v17, 7  ;;  %v2077_v17 = vperm.slane %v4720_v52, 0 }
 0x387   : > { %2344 = vst [vmem:[#allocation1 + $0x7] ss:$9 sm:$0xff] %v2068_v55  ;;  %v4905_v55 = vadd.s32 %v1265_v8, %v1263_v61  ;;  %v2080_v61 = vperm.slane %v4720_v52, 3  ;;  %v2081_v8 = vperm.slane %v4720_v52, 4 }
 0x389   : > { %vm1511_vm10 = vcmp.eq.s32.totalorder %v3732_v11, %v4905_v55  ;;  %vm1512_vm11 = vcmp.eq.s32.totalorder %v3735_v12, %v4905_v55 }
 0x38a   : > { %3177 = vmatmul.msk.f32.gmra.mxu2 %vm1511_vm10, %v5555_v46  ;;  %3209 = vmatmul.msk.f32.gmra.mxu3 %vm1512_vm11, %v5555_v46 }
 0x38e   : > { %v4896_v51 = vld [vmem:[#allocation1] sm:$0xff] }
 0x38f   : > { %2346 = vst [vmem:[#allocation1] ss:$9 sm:$0xff] %v2069_v58  ;;  %v4907_v58 = vadd.f32 %v1862_v49, %v1749_v5  ;;  %v3327_v49 = vld [vmem:[%s3597_s18 + $0x8] sm:$0xff] }
 0x390   : > { %2347 = vst [vmem:[#allocation1 + $0x1] ss:$9 sm:$0xff] %v2070_v15 }
 0x391   : > { %2348 = vst [vmem:[#allocation1 + $0x2] ss:$9 sm:$0xff] %v2071_v14  ;;  %v2078_v14 = vperm.slane %v4720_v52, 1 }
 0x392   : > { %2349 = vst [vmem:[#allocation1 + $0x3] ss:$9 sm:$0xff] %v2072_v4  ;;  %v2079_v4 = vperm.slane %v4720_v52, 2 }
 0x393   : > { %2350 = vst [vmem:[#allocation1 + $0x4] ss:$9 sm:$0xff] %v2073_v42  ;;  %v1279_v42 = vcvt.f32.s32 %v1278_v53  ;;  %v1716_v53 = vpop.f32.mrf.mxu0 }
 0x394   : > { %2351 = vst [vmem:[#allocation1 + $0x5] ss:$9 sm:$0xff] %v2074_v47  ;;  %v1281_v47 = vshll.u32 %v1280_v19, 16  ;;  %v1752_v19 = vpop.f32.mrf.mxu2 }
 0x395   : > { %2352 = vst [vmem:[#allocation1 + $0x6] ss:$9 sm:$0xff] %v2075_v9  ;;  %v2082_v9 = vperm.slane %v4720_v52, 5 }
 0x396   : > { %2353 = vst [vmem:[#allocation1 + $0x7] ss:$9 sm:$0xff] %v2076_v35  ;;  %v2084_v35 = vperm.slane %v4720_v52, 7  ;;  %v4929_v5 = vadd.s32 %v1281_v47, %v1279_v42  ;;  %v1865_v52 = vpop.f32.mrf.mxu3  ;;  %v3329_v47 = vld [vmem:[%s3597_s18 + $0x18] sm:$0xff] }
 0x397   : > { %1936 = vst.msk [vmem:[%s4523_s27 + $0x58] sm:$0xff] %vm344_vm0, %v4907_v58  ;;  %v4935_v42 = vadd.f32 %v1865_v52, %v1752_v19 }
 0x398   : > { %vm1513_vm12 = vcmp.eq.s32.totalorder %v3732_v11, %v4929_v5  ;;  %vm1514_vm13 = vcmp.eq.s32.totalorder %v3735_v12, %v4929_v5 }
 0x399   : > { %3178 = vmatmul.msk.f32.gmra.mxu2 %vm1513_vm12, %v5555_v46  ;;  %3210 = vmatmul.msk.f32.gmra.mxu3 %vm1514_vm13, %v5555_v46  ;;  %1937 = vst.msk [vmem:[%s4523_s27 + $0x60] sm:$0xff] %vm344_vm0, %v4935_v42 }
 0x39d   : > { %v4920_v15 = vld [vmem:[#allocation1] sm:$0xff] }
 0x39e   : > { %5566 = vst [vmem:[#allocation12_spill] sm:$0xff] %v4920_v15  ;;  %v2087_v15 = vperm.slane %v4754_v26, 2 }
 0x39f   : > { %2355 = vst [vmem:[#allocation1] ss:$9 sm:$0xff] %v2077_v17  ;;  %v2705_v17 = vsub.f32 %v4525_v24, %v3327_v49  ;;  %v3331_v49 = vld [vmem:[%s3597_s18 + $0x20] sm:$0xff] }
 0x3a0   : > { %2356 = vst [vmem:[#allocation1 + $0x1] ss:$9 sm:$0xff] %v2078_v14  ;;  %v3328_v14 = vld [vmem:[%s3597_s18 + $0x10] sm:$0xff] }
 0x3a1   : > { %2357 = vst [vmem:[#allocation1 + $0x2] ss:$9 sm:$0xff] %v2079_v4  ;;  %v2706_v4 = vsub.f32 %v4539_v43, %v3328_v14  ;;  %v2737_v24 = vmul.f32 %v2705_v17, %v2705_v17  ;;  %v2707_v43 = vsub.f32 %v4553_v34, %v3329_v47  ;;  %v2085_v17 = vperm.slane %v4754_v26, 0  ;;  %v1294_v14 = vpop.xlane.xlu0 %1293 }
 0x3a2   : > { %2358 = vst [vmem:[#allocation1 + $0x3] ss:$9 sm:$0xff] %v2080_v61  ;;  %v1829_v61 = vpop.f32.mrf.mxu1  ;;  %v1296_v34 = vcvt.f32.s32 %v4676_v0 }
 0x3a3   : > { %2359 = vst [vmem:[#allocation1 + $0x4] ss:$9 sm:$0xff] %v2081_v8  ;;  %v1830_v8 = vadd.f32 %v1829_v61, %v1716_v53  ;;  %v2708_v53 = vsub.f32 %v4567_v62, %v3331_v49  ;;  %v2769_v61 = vsel %vm344_vm0, %v2737_v24, 0.0  ;;  %v2739_v47 = vmul.f32 %v2707_v43, %v2707_v43 }
 0x3a4   : > { %2360 = vst [vmem:[#allocation1 + $0x5] ss:$9 sm:$0xff] %v2082_v9  ;;  %v3330_v9 = vld [vmem:[%s3597_s18] sm:$0xff]  ;;  %v1295_v49 = vcvt.f32.s32 %v1294_v14  ;;  %v2710_v43 = vsub.f32 %v4670_v10, %v3333_v48  ;;  %v2092_v10 = vperm.slane %v4754_v26, 7 }
 0x3a5   : > { %2361 = vst [vmem:[#allocation1 + $0x6] ss:$9 sm:$0xff] %v2083_v37  ;;  %v2704_v37 = vsub.f32 %v1830_v8, %v3330_v9  ;;  %v3332_v9 = vld [vmem:[%s3597_s18 + $0x28] sm:$0xff]  ;;  %v2740_v41 = vmul.f32 %v2708_v53, %v2708_v53 }
 0x3a6   : > { %2362 = vst [vmem:[#allocation1 + $0x7] ss:$9 sm:$0xff] %v2084_v35  ;;  %v2738_v35 = vmul.f32 %v2706_v4, %v2706_v4  ;;  %v2709_v4 = vsub.f32 %v4639_v22, %v3332_v9  ;;  %v1297_v22 = vshll.u32 %v1296_v34, 16  ;;  %v2773_v9 = vsel %vm344_vm0, %v2739_v47, 0.0  ;;  %v3335_v47 = vld [vmem:[%s3597_s18 + $0x40] sm:$0xff] }
 0x3a7   : > { %1925 = vst.msk [vmem:[%s4523_s27] sm:$0xff] %vm344_vm0, %v1830_v8  ;;  %v2736_v19 = vmul.f32 %v2704_v37, %v2704_v37  ;;  %v2086_v8 = vperm.slane %v4754_v26, 1  ;;  %v2088_v37 = vperm.slane %v4754_v26, 3  ;;  %v2775_v53 = vsel %vm344_vm0, %v2740_v41, 0.0 }
 0x3a8   : > { %v2771_v0 = vsel %vm344_vm0, %v2738_v35, 0.0  ;;  %v2091_v35 = vperm.slane %v4754_v26, 6  ;;  %v2742_v34 = vmul.f32 %v2710_v43, %v2710_v43 }
 0x3a9   : > { %v2768_v62 = vsel %vm344_vm0, %v2736_v19, 0.0 }
 0x3aa   : > { %v2770_v24 = vadd.f32 %v2769_v61, %v2768_v62  ;;  %v3334_v61 = vld [vmem:[%s3597_s18 + $0x38] sm:$0xff]  ;;  %v2779_v41 = vsel %vm344_vm0, %v2742_v34, 0.0 }
 0x3ab   : > { %v2711_v14 = vsub.f32 %v4708_v32, %v3334_v61 }
 0x3ac   : > { %v2772_v19 = vadd.f32 %v2771_v0, %v2770_v24 }
 0x3ad   : > { %v4956_v52 = vld [vmem:[#allocation1] sm:$0xff] }
 0x3ae   : > { %2364 = vst [vmem:[#allocation1] ss:$9 sm:$0xff] %v2085_v17  ;;  %v2090_v17 = vperm.slane %v4754_v26, 5  ;;  %v2774_v48 = vadd.f32 %v2773_v9, %v2772_v19  ;;  %v1312_v9 = vcvt.f32.s32 %v4715_v28  ;;  %v1397_v28 = vand.u32 65535, %v4685_v3 }
 0x3af   : > { %2365 = vst [vmem:[#allocation1 + $0x1] ss:$9 sm:$0xff] %v2086_v8  ;;  %v2741_v8 = vmul.f32 %v2709_v4, %v2709_v4  ;;  %v2712_v4 = vsub.f32 %v4869_v29, %v3335_v47  ;;  %v3337_v29 = vld [vmem:[%s3597_s18 + $0x50] sm:$0xff]  ;;  %v2095_v47 = vperm.slane %v4788_v7, 2  ;;  %v2099_v3 = vperm.slane %v4788_v7, 6 }
 0x3b0   : > { %2366 = vst [vmem:[#allocation1 + $0x2] ss:$9 sm:$0xff] %v2087_v15  ;;  %v4974_v15 = vadd.s32 %v1297_v22, %v1295_v49  ;;  %v2776_v32 = vadd.f32 %v2775_v53, %v2774_v48  ;;  %v2714_v0 = vsub.f32 %v4889_v2, %v3337_v29  ;;  %v2094_v2 = vperm.slane %v4788_v7, 1  ;;  %v3339_v53 = vld [vmem:[%s3597_s18 + $0x60] sm:$0xff] }
 0x3b1   : > { %2367 = vst [vmem:[#allocation1 + $0x3] ss:$9 sm:$0xff] %v2088_v37  ;;  %v2777_v62 = vsel %vm344_vm0, %v2741_v8, 0.0  ;;  %v3336_v37 = vld [vmem:[%s3597_s18 + $0x48] sm:$0xff]  ;;  %v2744_v49 = vmul.f32 %v2712_v4, %v2712_v4  ;;  %v2093_v8 = vperm.slane %v4788_v7, 0  ;;  %v2716_v34 = vsub.f32 %v4935_v42, %v3339_v53 }
 0x3b2   : > { %2368 = vst [vmem:[#allocation1 + $0x4] ss:$9 sm:$0xff] %v2089_v6  ;;  %v2743_v6 = vmul.f32 %v2711_v14, %v2711_v14  ;;  %v2713_v26 = vsub.f32 %v4883_v38, %v3336_v37  ;;  %v2778_v24 = vadd.f32 %v2777_v62, %v2776_v32  ;;  %vm1515_vm14 = vcmp.eq.s32.totalorder %v3732_v11, %v4974_v15  ;;  %v1310_v14 = vpop.xlane.xlu2 %1309 }
 0x3b3   : > { %2369 = vst [vmem:[#allocation1 + $0x5] ss:$9 sm:$0xff] %v2090_v17  ;;  %vm1516_vm15 = vcmp.eq.s32.totalorder %v3735_v12, %v4974_v15  ;;  %3179 = vmatmul.msk.f32.gmra.mxu2 %vm1515_vm14, %v5555_v46  ;;  %v3338_v17 = vld [vmem:[%s3597_s18 + $0x58] sm:$0xff]  ;;  %v2746_v48 = vmul.f32 %v2714_v0, %v2714_v0  ;;  %v2096_v4 = vperm.slane %v4788_v7, 3  ;;  %v2097_v37 = vperm.slane %v4788_v7, 4  ;;  %v5010_v0 = vpop.xlane.xlu0 %1401 }
 0x3b4   : > { %2370 = vst [vmem:[#allocation1 + $0x6] ss:$9 sm:$0xff] %v2091_v35  ;;  %3211 = vmatmul.msk.f32.gmra.mxu3 %vm1516_vm15, %v5555_v46  ;;  %v2780_v43 = vadd.f32 %v2779_v41, %v2778_v24  ;;  %v2781_v38 = vsel %vm344_vm0, %v2743_v6, 0.0  ;;  %v2745_v22 = vmul.f32 %v2713_v26, %v2713_v26  ;;  %v2715_v19 = vsub.f32 %v4907_v58, %v3338_v17 }
 0x3b5   : > { %2371 = vst [vmem:[#allocation1 + $0x7] ss:$9 sm:$0xff] %v2092_v10  ;;  %v2783_v10 = vsel %vm344_vm0, %v2744_v49, 0.0  ;;  %v1311_v6 = vcvt.f32.s32 %v1310_v14  ;;  %v1313_v24 = vshll.u32 %v1312_v9, 16  ;;  %v2098_v42 = vperm.slane %v4788_v7, 5  ;;  %v1868_v14 = vpop.f32.mrf.mxu3 }
 0x3b6   : > { %v2782_v61 = vadd.f32 %v2781_v38, %v2780_v43  ;;  %v2785_v32 = vsel %vm344_vm0, %v2745_v22, 0.0  ;;  %v2747_v62 = vmul.f32 %v2715_v19, %v2715_v19  ;;  %v2787_v41 = vsel %vm344_vm0, %v2746_v48, 0.0 }
 0x3b7   : > { %v2748_v49 = vmul.f32 %v2716_v34, %v2716_v34  ;;  %v1399_v43 = vcvt.s32.f32 %v1397_v28  ;;  %v2100_v38 = vperm.slane %v4788_v7, 7  ;;  %v5014_v17 = vadd.s32 %v1313_v24, %v1311_v6 }
 0x3b8   : > { %v2784_v58 = vadd.f32 %v2783_v10, %v2782_v61  ;;  %v2789_v22 = vsel %vm344_vm0, %v2747_v62, 0.0  ;;  %vm1403_vm1 = vcmp.eq.f32.partialorder %v4704_v59, %v5010_v0  ;;  %v1755_v61 = vpop.f32.mrf.mxu2  ;;  %v2101_v59 = vperm.slane %v4905_v55, 0  ;;  %v1326_v10 = vpop.xlane.xlu1 %1325 }
 0x3b9   : > { %v1404_v9 = vsel %vm1403_vm1, %v1399_v43, inf  ;;  %vm1517_vm2 = vcmp.eq.s32.totalorder %v3732_v11, %v5014_v17  ;;  %vm1518_vm3 = vcmp.eq.s32.totalorder %v3735_v12, %v5014_v17  ;;  %v1328_v48 = vcvt.f32.s32 %v4752_v16 }
 0x3ba   : > { %v2786_v26 = vadd.f32 %v2785_v32, %v2784_v58  ;;  %1405 = vmin.xlane.f32.xlu1 %v1404_v9  ;;  %v2102_v34 = vperm.slane %v4905_v55, 1  ;;  %v2103_v28 = vperm.slane %v4905_v55, 2  ;;  %v2104_v32 = vperm.slane %v4905_v55, 3 }
 0x3bb   : > { %3180 = vmatmul.msk.f32.gmra.mxu2 %vm1517_vm2, %v5555_v46  ;;  %v1327_v62 = vcvt.f32.s32 %v1326_v10  ;;  %v2105_v6 = vperm.slane %v4905_v55, 4  ;;  %v1329_v16 = vshll.u32 %v1328_v48, 16  ;;  %v1429_v10 = vand.u32 65535, %v4758_v57 }
 0x3bc   : > { %v4996_v35 = vld [vmem:[#allocation1] sm:$0xff]  ;;  %v2788_v29 = vadd.f32 %v2787_v41, %v2786_v26  ;;  %3212 = vmatmul.msk.f32.gmra.mxu3 %vm1518_vm3, %v5555_v46  ;;  %v2106_v26 = vperm.slane %v4905_v55, 5  ;;  %v2112_v48 = vperm.slane %v4929_v5, 3 }
 0x3bd   : > { %2373 = vst [vmem:[#allocation1] ss:$9 sm:$0xff] %v2093_v8  ;;  %v2791_v8 = vsel %vm344_vm0, %v2748_v49, 0.0  ;;  %v5042_v49 = vadd.s32 %v1329_v16, %v1327_v62  ;;  %v1431_v57 = vcvt.s32.f32 %v1429_v10  ;;  %v3343_v10 = vld [vmem:[%s3597_s18 + $0x80] sm:$0xff] }
 0x3be   : > { %2374 = vst [vmem:[#allocation1 + $0x1] ss:$9 sm:$0xff] %v2094_v2  ;;  %v2790_v19 = vadd.f32 %v2789_v22, %v2788_v29  ;;  %v1869_v2 = vadd.f32 %v1868_v14, %v1755_v61  ;;  %v1342_v61 = vpop.xlane.xlu0 %1341  ;;  %v1344_v14 = vcvt.f32.s32 %v4786_v33 }
 0x3bf   : > { %2375 = vst [vmem:[#allocation1 + $0x2] ss:$9 sm:$0xff] %v2095_v47  ;;  %v3340_v47 = vld [vmem:[%s3597_s18 + $0x68] sm:$0xff]  ;;  %vm1519_vm5 = vcmp.eq.s32.totalorder %v3732_v11, %v5042_v49  ;;  %vm1520_vm6 = vcmp.eq.s32.totalorder %v3735_v12, %v5042_v49 }
 0x3c0   : > { %2376 = vst [vmem:[#allocation1 + $0x3] ss:$9 sm:$0xff] %v2096_v4  ;;  %v2792_v7 = vadd.f32 %v2791_v8, %v2790_v19  ;;  %v2717_v58 = vsub.f32 %v1869_v2, %v3340_v47  ;;  %v1413_v4 = vand.u32 65535, %v4724_v25  ;;  %v2108_v25 = vperm.slane %v4905_v55, 7  ;;  %v1758_v43 = vpop.f32.mrf.mxu2  ;;  %v5068_v62 = vpop.xlane.xlu1 %1433 }
 0x3c1   : > { %2377 = vst [vmem:[#allocation1 + $0x4] ss:$9 sm:$0xff] %v2097_v37  ;;  %v5037_v37 = vpop.xlane.xlu2 %1417  ;;  %v2109_v8 = vperm.slane %v4929_v5, 0  ;;  %v1343_v47 = vcvt.f32.s32 %v1342_v61  ;;  %v1345_v33 = vshll.u32 %v1344_v14, 16  ;;  %vm1435_vm7 = vcmp.eq.f32.partialorder %v4777_v45, %v5068_v62 }
 0x3c2   : > { %2378 = vst [vmem:[#allocation1 + $0x5] ss:$9 sm:$0xff] %v2098_v42  ;;  %v2749_v24 = vmul.f32 %v2717_v58, %v2717_v58  ;;  %v2107_v42 = vperm.slane %v4905_v55, 6  ;;  %v1415_v41 = vcvt.s32.f32 %v1413_v4  ;;  %vm1419_vm4 = vcmp.eq.f32.partialorder %v4743_v39, %v5037_v37  ;;  %v3341_v55 = vld [vmem:[%s3597_s18 + $0x70] sm:$0xff] }
 0x3c3   : > { %2379 = vst [vmem:[#allocation1 + $0x6] ss:$9 sm:$0xff] %v2099_v3  ;;  %3181 = vmatmul.msk.f32.gmra.mxu2 %vm1519_vm5, %v5555_v46  ;;  %v2113_v58 = vperm.slane %v4929_v5, 4  ;;  %v2114_v4 = vperm.slane %v4929_v5, 5  ;;  %v5071_v16 = vadd.s32 %v1345_v33, %v1343_v47  ;;  %v2120_v14 = vperm.slane %v4974_v15, 3 }
 0x3c4   : > { %2380 = vst [vmem:[#allocation1 + $0x7] ss:$9 sm:$0xff] %v2100_v38  ;;  %v1420_v3 = vsel %vm1419_vm4, %v1415_v41, inf  ;;  %v2793_v29 = vsel %vm344_vm0, %v2749_v24, 0.0  ;;  %v1871_v38 = vpop.f32.mrf.mxu3  ;;  %3213 = vmatmul.msk.f32.gmra.mxu3 %vm1520_vm6, %v5555_v46 }
 0x3c5   : > { %1938 = vst.msk [vmem:[%s4523_s27 + $0x68] sm:$0xff] %vm344_vm0, %v1869_v2  ;;  %1421 = vmin.xlane.f32.xlu2 %v1420_v3  ;;  %v2794_v22 = vadd.f32 %v2793_v29, %v2792_v7  ;;  %v1872_v19 = vadd.f32 %v1871_v38, %v1758_v43  ;;  %v2110_v2 = vperm.slane %v4929_v5, 1  ;;  %vm1521_vm8 = vcmp.eq.s32.totalorder %v3732_v11, %v5071_v16 }
 0x3c6   : > { %vm1522_vm9 = vcmp.eq.s32.totalorder %v3735_v12, %v5071_v16  ;;  %v5085_v29 = vpop.xlane.xlu0 %1449 }
 0x3c7   : > { %1939 = vst.msk [vmem:[%s4523_s27 + $0x70] sm:$0xff] %vm344_vm0, %v1872_v19  ;;  %v2718_v39 = vsub.f32 %v1872_v19, %v3341_v55  ;;  %vm1451_vm10 = vcmp.eq.f32.partialorder %v4811_v21, %v5085_v29  ;;  %v2121_v21 = vperm.slane %v4974_v15, 4 }
 0x3c8   : > { %v1761_v24 = vpop.f32.mrf.mxu2 }
 0x3c9   : > { %v2750_v9 = vmul.f32 %v2718_v39, %v2718_v39  ;;  %v2119_v39 = vperm.slane %v4974_v15, 2  ;;  %v1358_v47 = vpop.xlane.xlu2 %1357 }
 0x3cb   : > { %v5029_v53 = vld [vmem:[#allocation1] sm:$0xff]  ;;  %3182 = vmatmul.msk.f32.gmra.mxu2 %vm1521_vm8, %v5555_v46 }
 0x3cc   : > { %2382 = vst [vmem:[#allocation1] ss:$9 sm:$0xff] %v2101_v59  ;;  %v2111_v59 = vperm.slane %v4929_v5, 2  ;;  %3214 = vmatmul.msk.f32.gmra.mxu3 %vm1522_vm9, %v5555_v46 }
 0x3cd   : > { %2383 = vst [vmem:[#allocation1 + $0x1] ss:$9 sm:$0xff] %v2102_v34  ;;  %v2795_v34 = vsel %vm344_vm0, %v2750_v9, 0.0 }
 0x3ce   : > { %2384 = vst [vmem:[#allocation1 + $0x2] ss:$9 sm:$0xff] %v2103_v28  ;;  %v2796_v28 = vadd.f32 %v2795_v34, %v2794_v22  ;;  %v2118_v22 = vperm.slane %v4974_v15, 1  ;;  %v2123_v34 = vperm.slane %v4974_v15, 6 }
 0x3cf   : > { %2385 = vst [vmem:[#allocation1 + $0x3] ss:$9 sm:$0xff] %v2104_v32  ;;  %v2115_v32 = vperm.slane %v4929_v5, 6 }
 0x3d0   : > { %2386 = vst [vmem:[#allocation1 + $0x4] ss:$9 sm:$0xff] %v2105_v6  ;;  %v2116_v6 = vperm.slane %v4929_v5, 7  ;;  %v3342_v5 = vld [vmem:[%s3597_s18 + $0x78] sm:$0xff] }
 0x3d1   : > { %2387 = vst [vmem:[#allocation1 + $0x5] ss:$9 sm:$0xff] %v2106_v26  ;;  %v1436_v26 = vsel %vm1435_vm7, %v1431_v57, inf }
 0x3d2   : > { %2388 = vst [vmem:[#allocation1 + $0x6] ss:$9 sm:$0xff] %v2107_v42  ;;  %v1874_v42 = vpop.f32.mrf.mxu3  ;;  %1437 = vmin.xlane.f32.xlu0 %v1436_v26 }
 0x3d3   : > { %2389 = vst [vmem:[#allocation1 + $0x7] ss:$9 sm:$0xff] %v2108_v25  ;;  %v1875_v41 = vadd.f32 %v1874_v42, %v1761_v24  ;;  %v1445_v25 = vand.u32 65535, %v4792_v56  ;;  %v2117_v56 = vperm.slane %v4974_v15, 0  ;;  %v2125_v24 = vperm.slane %v5014_v17, 0 }
 0x3d5   : > { %1940 = vst.msk [vmem:[%s4523_s27 + $0x78] sm:$0xff] %vm344_vm0, %v1875_v41  ;;  %v2719_v3 = vsub.f32 %v1875_v41, %v3342_v5  ;;  %v1447_v43 = vcvt.s32.f32 %v1445_v25  ;;  %v2128_v5 = vperm.slane %v5014_v17, 3 }
 0x3d7   : > { %v2751_v45 = vmul.f32 %v2719_v3, %v2719_v3  ;;  %v1452_v55 = vsel %vm1451_vm10, %v1447_v43, inf  ;;  %v2130_v43 = vperm.slane %v5014_v17, 5 }
 0x3d8   : > { %1453 = vmin.xlane.f32.xlu1 %v1452_v55  ;;  %v2131_v55 = vperm.slane %v5014_v17, 6 }
 0x3d9   : > { %v2797_v19 = vsel %vm344_vm0, %v2751_v45, 0.0  ;;  %v2129_v45 = vperm.slane %v5014_v17, 4 }
 0x3da   : > { %v5058_v7 = vld [vmem:[#allocation1] sm:$0xff]  ;;  %v2798_v9 = vadd.f32 %v2797_v19, %v2796_v28  ;;  %v1877_v61 = vpop.f32.mrf.mxu3  ;;  %v2124_v28 = vperm.slane %v4974_v15, 7  ;;  %v3472_v19 = vmov 0  }
 0x3db   : > { %2391 = vst [vmem:[#allocation1] ss:$9 sm:$0xff] %v2109_v8  ;;  %v1764_v8 = vpop.f32.mrf.mxu2  ;;  %3324 = vset.pattern.permute.xlu0 %v3472_v19  ;;  %3325 = vset.pattern.permute.xlu1 %v3472_v19 }
 0x3dc   : > { %2392 = vst [vmem:[#allocation1 + $0x1] ss:$9 sm:$0xff] %v2110_v2  ;;  %v1878_v2 = vadd.f32 %v1877_v61, %v1764_v8  ;;  %3326 = vset.pattern.permute.xlu2 %v3472_v19  ;;  %v2132_v8 = vperm.slane %v5014_v17, 7  ;;  %v1408_v19 = vcvt.f32.s32 %v5010_v0 }
 0x3dd   : > { %2393 = vst [vmem:[#allocation1 + $0x2] ss:$9 sm:$0xff] %v2111_v59  ;;  %v2122_v59 = vperm.slane %v4974_v15, 5  ;;  %v2127_v15 = vperm.slane %v5014_v17, 2 }
 0x3de   : > { %2394 = vst [vmem:[#allocation1 + $0x3] ss:$9 sm:$0xff] %v2112_v48  ;;  %v2720_v48 = vsub.f32 %v1878_v2, %v3343_v10  ;;  %v5132_v10 = vpop.xlane.xlu2 %1465 }
 0x3df   : > { %2395 = vst [vmem:[#allocation1 + $0x4] ss:$9 sm:$0xff] %v2113_v58  ;;  %v1360_v58 = vcvt.f32.s32 %v4819_v30  ;;  %v2126_v30 = vperm.slane %v5014_v17, 1  ;;  %vm1467_vm13 = vcmp.eq.f32.partialorder %v4838_v23, %v5132_v10  ;;  %v2133_v17 = vperm.slane %v5042_v49, 0 }
 0x3e0   : > { %2396 = vst [vmem:[#allocation1 + $0x5] ss:$9 sm:$0xff] %v2114_v4  ;;  %v2752_v33 = vmul.f32 %v2720_v48, %v2720_v48  ;;  %v2138_v23 = vperm.slane %v5042_v49, 5 }
 0x3e1   : > { %2397 = vst [vmem:[#allocation1 + $0x6] ss:$9 sm:$0xff] %v2115_v32  ;;  %v1359_v32 = vcvt.f32.s32 %v1358_v47  ;;  %v2134_v47 = vperm.slane %v5042_v49, 1 }
 0x3e2   : > { %2398 = vst [vmem:[#allocation1 + $0x7] ss:$9 sm:$0xff] %v2116_v6  ;;  %v2799_v4 = vsel %vm344_vm0, %v2752_v33, 0.0  ;;  %v1361_v6 = vshll.u32 %v1360_v58, 16  ;;  %v1880_v25 = vpop.f32.mrf.mxu3  ;;  %v2135_v58 = vperm.slane %v5042_v49, 2  ;;  %v1390_v33 = vpop.xlane.xlu0 %1389 }
 0x3e3   : > { %1941 = vst.msk [vmem:[%s4523_s27 + $0x80] sm:$0xff] %vm344_vm0, %v1878_v2  ;;  %v2800_v57 = vadd.f32 %v2799_v4, %v2798_v9  ;;  %v1767_v41 = vpop.f32.mrf.mxu2  ;;  %v1376_v9 = vcvt.f32.s32 %v4833_v27  ;;  %v1392_v4 = vcvt.f32.s32 %v4845_v18  ;;  %v2142_v18 = vperm.slane %v5071_v16, 1 }
 0x3e4   : > { %v5105_v26 = vadd.s32 %v1361_v6, %v1359_v32  ;;  %v1881_v3 = vadd.f32 %v1880_v25, %v1767_v41  ;;  %v2140_v32 = vperm.slane %v5042_v49, 7  ;;  %v2148_v41 = vperm.slane %v5071_v16, 7 }
 0x3e5   : > { %v1393_v6 = vshll.u32 %v1392_v4, 16 }
 0x3e6   : > { %vm1523_vm11 = vcmp.eq.s32.totalorder %v3732_v11, %v5105_v26  ;;  %vm1524_vm12 = vcmp.eq.s32.totalorder %v3735_v12, %v5105_v26  ;;  %2509 = vperm.xlu0 %3324, %v4590_v13   ;;  %1942 = vst.msk [vmem:[%s4523_s27 + $0x88] sm:$0xff] %vm344_vm0, %v1881_v3  ;;  %v1377_v13 = vshll.u32 %v1376_v9, 16  ;;  %v2149_v25 = vperm.slane %v5105_v26, 0 }
 0x3e7   : > { %3183 = vmatmul.msk.f32.gmra.mxu2 %vm1523_vm11, %v5555_v46  ;;  %3215 = vmatmul.msk.f32.gmra.mxu3 %vm1524_vm12, %v5555_v46  ;;  %vm2607_vm11 = vcmask 130112  }
 0x3e9   : > { %v5090_v38 = vld [vmem:[#allocation1] sm:$0xff] }
 0x3ea   : > { %2400 = vst [vmem:[#allocation1] ss:$9 sm:$0xff] %v2117_v56  ;;  %v3344_v56 = vld [vmem:[%s3597_s18 + $0x88] sm:$0xff] }
 0x3eb   : > { %2401 = vst [vmem:[#allocation1 + $0x1] ss:$9 sm:$0xff] %v2118_v22  ;;  %v2721_v22 = vsub.f32 %v1881_v3, %v3344_v56  ;;  %v2150_v3 = vperm.slane %v5105_v26, 1 }
 0x3ec   : > { %2402 = vst [vmem:[#allocation1 + $0x2] ss:$9 sm:$0xff] %v2119_v39  ;;  %v1374_v39 = vpop.xlane.xlu1 %1373 }
 0x3ed   : > { %2403 = vst [vmem:[#allocation1 + $0x3] ss:$9 sm:$0xff] %v2120_v14  ;;  %v2753_v61 = vmul.f32 %v2721_v22, %v2721_v22  ;;  %v1461_v14 = vand.u32 65535, %v4823_v63 }
 0x3ee   : > { %2404 = vst [vmem:[#allocation1 + $0x4] ss:$9 sm:$0xff] %v2121_v21  ;;  %v1375_v21 = vcvt.f32.s32 %v1374_v39  ;;  %2530 = vperm.xlu0 %3324, %v4762_v36   ;;  %v2137_v36 = vperm.slane %v5042_v49, 4 }
 0x3ef   : > { %2405 = vst [vmem:[#allocation1 + $0x5] ss:$9 sm:$0xff] %v2122_v59  ;;  %v2801_v2 = vsel %vm344_vm0, %v2753_v61, 0.0  ;;  %v1463_v48 = vcvt.s32.f32 %v1461_v14  ;;  %v5568_v61 = vld [vmem:[#allocation10_spill] sm:$0xff] }
 0x3f0   : > { %2406 = vst [vmem:[#allocation1 + $0x6] ss:$9 sm:$0xff] %v2123_v34  ;;  %v5130_v59 = vadd.f32 %v2801_v2, %v2800_v57  ;;  %v5135_v27 = vadd.s32 %v1377_v13, %v1375_v21  ;;  %v1391_v57 = vcvt.f32.s32 %v1390_v33  ;;  %v1409_v21 = vshll.u32 %v1408_v19, 16  ;;  %v3346_v33 = vld [vmem:[%s3597_s18 + $0x98] sm:$0xff]  ;;  %v3348_v19 = vld [vmem:[%s3597_s18 + $0xa8] sm:$0xff] }
 0x3f1   : > { %2407 = vst [vmem:[#allocation1 + $0x7] ss:$9 sm:$0xff] %v2124_v28  ;;  %2512 = vperm.xlu1 %3325, %v4600_v44   ;;  %v1468_v63 = vsel %vm1467_vm13, %v1463_v48, inf  ;;  %v2136_v44 = vperm.slane %v5042_v49, 3  ;;  %v2139_v28 = vperm.slane %v5042_v49, 6  ;;  %v2143_v49 = vperm.slane %v5071_v16, 2 }
 0x3f2   : > { %1469 = vmin.xlane.f32.xlu2 %v1468_v63  ;;  %vm1525_vm14 = vcmp.eq.s32.totalorder %v3732_v11, %v5135_v27  ;;  %vm1526_vm15 = vcmp.eq.s32.totalorder %v3735_v12, %v5135_v27  ;;  %v2157_v56 = vperm.slane %v5135_v27, 0  ;;  %v2159_v39 = vperm.slane %v5135_v27, 2 }
 0x3f3   : > { %3184 = vmatmul.msk.f32.gmra.mxu2 %vm1525_vm14, %v5555_v46  ;;  %3216 = vmatmul.msk.f32.gmra.mxu3 %vm1526_vm15, %v5555_v46  ;;  %v2161_v14 = vperm.slane %v5135_v27, 4  ;;  %v2162_v0 = vperm.slane %v5135_v27, 5  ;;  %v2163_v48 = vperm.slane %v5135_v27, 6  ;;  %vm2611_vm14 = vcmask 195712  }
 0x3f4   : > { %vm2615_vm15 = vcmask 261312  }
 0x3f6   : > { %2539 = vperm.xlu0 %3324, %v4851_v1   ;;  %v2144_v1 = vperm.slane %v5071_v16, 3 }
 0x3f8   : > { %v5108_v42 = vld [vmem:[#allocation1] sm:$0xff] }
 0x3f9   : > { %2409 = vst [vmem:[#allocation1] ss:$9 sm:$0xff] %v2125_v24  ;;  %2521 = vperm.xlu1 %3325, %v4654_v20   ;;  %v5159_v24 = vadd.s32 %v1393_v6, %v1391_v57  ;;  %v2141_v20 = vperm.slane %v5071_v16, 0  ;;  %v1424_v6 = vcvt.f32.s32 %v5037_v37 }
 0x3fa   : > { %2410 = vst [vmem:[#allocation1 + $0x1] ss:$9 sm:$0xff] %v2126_v30 }
 0x3fb   : > { %2411 = vst [vmem:[#allocation1 + $0x2] ss:$9 sm:$0xff] %v2127_v15  ;;  %vm1527_vm1 = vcmp.eq.s32.totalorder %v3732_v11, %v5159_v24  ;;  %vm1528_vm2 = vcmp.eq.s32.totalorder %v3735_v12, %v5159_v24  ;;  %v2147_v15 = vperm.slane %v5071_v16, 6 }
 0x3fc   : > { %2412 = vst [vmem:[#allocation1 + $0x3] ss:$9 sm:$0xff] %v2128_v5  ;;  %3185 = vmatmul.msk.f32.gmra.mxu2 %vm1527_vm1, %v5555_v46  ;;  %3217 = vmatmul.msk.f32.gmra.mxu3 %vm1528_vm2, %v5555_v46  ;;  %vm2619_vm1 = vcmask 326912   ;;  %vm2623_vm2 = vcmask 392512  }
 0x3fd   : > { %2413 = vst [vmem:[#allocation1 + $0x4] ss:$9 sm:$0xff] %v2129_v45  ;;  %v2156_v45 = vperm.slane %v5105_v26, 7 }
 0x3fe   : > { %2414 = vst [vmem:[#allocation1 + $0x5] ss:$9 sm:$0xff] %v2130_v43  ;;  %2548 = vperm.xlu0 %3324, %v4896_v51   ;;  %v2146_v51 = vperm.slane %v5071_v16, 5 }
 0x3ff   : > { %2415 = vst [vmem:[#allocation1 + $0x6] ss:$9 sm:$0xff] %v2131_v55 }
 0x400   : > { %2416 = vst [vmem:[#allocation1 + $0x7] ss:$9 sm:$0xff] %v2132_v8  ;;  %v2160_v8 = vperm.slane %v5135_v27, 3 }
 0x401   : > { %2527 = vperm.xlu1 %3325, %v4728_v50   ;;  %v2145_v50 = vperm.slane %v5071_v16, 4  ;;  %v2155_v16 = vperm.slane %v5105_v26, 6 }
 0x406   : > { %2557 = vperm.xlu0 %3324, %v4996_v35   ;;  %v2152_v35 = vperm.slane %v5105_v26, 3 }
 0x407   : > { %v5141_v34 = vld [vmem:[#allocation1] sm:$0xff] }
 0x408   : > { %2418 = vst [vmem:[#allocation1] ss:$9 sm:$0xff] %v2133_v17  ;;  %v2164_v17 = vperm.slane %v5135_v27, 7 }
 0x409   : > { %2419 = vst [vmem:[#allocation1 + $0x1] ss:$9 sm:$0xff] %v2134_v47  ;;  %2536 = vperm.xlu1 %3325, %v4829_v31   ;;  %v2151_v31 = vperm.slane %v5105_v26, 2 }
 0x40a   : > { %2420 = vst [vmem:[#allocation1 + $0x2] ss:$9 sm:$0xff] %v2135_v58  ;;  %2515 = vperm.xlu2 %3326, %v4610_v54   ;;  %v2153_v54 = vperm.slane %v5105_v26, 4 }
 0x40b   : > { %2421 = vst [vmem:[#allocation1 + $0x3] ss:$9 sm:$0xff] %v2136_v44 }
 0x40c   : > { %2422 = vst [vmem:[#allocation1 + $0x4] ss:$9 sm:$0xff] %v2137_v36 }
 0x40d   : > { %2423 = vst [vmem:[#allocation1 + $0x5] ss:$9 sm:$0xff] %v2138_v23  ;;  %v1883_v43 = vpop.f32.mrf.mxu3 }
 0x40e   : > { %2424 = vst [vmem:[#allocation1 + $0x6] ss:$9 sm:$0xff] %v2139_v28  ;;  %2566 = vperm.xlu0 %3324, %v5090_v38   ;;  %v1770_v38 = vpop.f32.mrf.mxu2  ;;  %v5569_v28 = vld [vmem:[#allocation9_spill] sm:$0xff] }
 0x40f   : > { %2425 = vst [vmem:[#allocation1 + $0x7] ss:$9 sm:$0xff] %v2140_v32  ;;  %v1884_v22 = vadd.f32 %v1883_v43, %v1770_v38 }
 0x411   : > { %2545 = vperm.xlu1 %3325, %v4875_v60   ;;  %v2154_v60 = vperm.slane %v5105_v26, 5  ;;  %v2158_v26 = vperm.slane %v5135_v27, 1  ;;  %1943 = vst.msk [vmem:[%s4523_s27 + $0x90] sm:$0xff] %vm344_vm0, %v1884_v22 }
 0x412   : > { %2518 = vperm.xlu2 %3326, %v4631_v40   ;;  %v5567_v40 = vld [vmem:[#allocation8_spill] sm:$0xff] }
 0x416   : > { %v2426_v30 = vld [vmem:[#allocation1] sm:$0xff] }
 0x417   : > { %2427 = vst [vmem:[#allocation1] ss:$9 sm:$0xff] %v2141_v20  ;;  %2575 = vperm.xlu0 %3324, %v2426_v30   ;;  %v2166_v30 = vperm.slane %v5159_v24, 1 }
 0x418   : > { %2428 = vst [vmem:[#allocation1 + $0x1] ss:$9 sm:$0xff] %v2142_v18 }
 0x419   : > { %2429 = vst [vmem:[#allocation1 + $0x2] ss:$9 sm:$0xff] %v2143_v49  ;;  %2554 = vperm.xlu1 %3325, %v4956_v52   ;;  %v3345_v52 = vld [vmem:[%s3597_s18 + $0x90] sm:$0xff] }
 0x41a   : > { %2430 = vst [vmem:[#allocation1 + $0x3] ss:$9 sm:$0xff] %v2144_v1  ;;  %2524 = vperm.xlu2 %3326, %v5567_v40   ;;  %v2722_v9 = vsub.f32 %v1884_v22, %v3345_v52  ;;  %v2167_v1 = vperm.slane %v5159_v24, 2 }
 0x41b   : > { %2431 = vst [vmem:[#allocation1 + $0x4] ss:$9 sm:$0xff] %v2145_v50  ;;  %v2168_v50 = vperm.slane %v5159_v24, 3 }
 0x41c   : > { %2432 = vst [vmem:[#allocation1 + $0x5] ss:$9 sm:$0xff] %v2146_v51  ;;  %v1773_v44 = vpop.f32.mrf.mxu2  ;;  %v1886_v36 = vpop.f32.mrf.mxu3  ;;  %v3347_v51 = vld [vmem:[%s3597_s18 + $0xa0] sm:$0xff] }
 0x41d   : > { %2433 = vst [vmem:[#allocation1 + $0x6] ss:$9 sm:$0xff] %v2147_v15  ;;  %v1887_v23 = vadd.f32 %v1886_v36, %v1773_v44  ;;  %v1456_v44 = vcvt.f32.s32 %v5085_v29  ;;  %v3349_v29 = vld [vmem:[%s3597_s18 + $0xb0] sm:$0xff] }
 0x41e   : > { %2434 = vst [vmem:[#allocation1 + $0x7] ss:$9 sm:$0xff] %v2148_v41  ;;  %v2169_v41 = vperm.slane %v5159_v24, 4 }
 0x41f   : > { %1944 = vst.msk [vmem:[%s4523_s27 + $0x98] sm:$0xff] %vm344_vm0, %v1887_v23  ;;  %v2723_v27 = vsub.f32 %v1887_v23, %v3346_v33  ;;  %v1457_v36 = vshll.u32 %v1456_v44, 16 }
 0x421   : > { %2563 = vperm.xlu1 %3325, %v5058_v7   ;;  %v2754_v7 = vmul.f32 %v2722_v9, %v2722_v9  ;;  %v1440_v9 = vcvt.f32.s32 %v5068_v62 }
 0x422   : > { %2533 = vperm.xlu2 %3326, %v5568_v61  }
 0x423   : > { %v2803_v63 = vsel %vm344_vm0, %v2754_v7, 0.0 }
 0x424   : > { %v2804_v47 = vadd.f32 %v2803_v63, %v5130_v59  ;;  %v2755_v59 = vmul.f32 %v2723_v27, %v2723_v27 }
 0x425   : > { %v5182_v5 = vld [vmem:[#allocation1] sm:$0xff] }
 0x426   : > { %2436 = vst [vmem:[#allocation1] ss:$9 sm:$0xff] %v2149_v25  ;;  %v2805_v4 = vsel %vm344_vm0, %v2755_v59, 0.0  ;;  %v5570_v25 = vld [vmem:[#allocation12_spill] sm:$0xff] }
 0x427   : > { %2437 = vst [vmem:[#allocation1 + $0x1] ss:$9 sm:$0xff] %v2150_v3  ;;  %v2806_v18 = vadd.f32 %v2805_v4, %v2804_v47  ;;  %v1425_v3 = vshll.u32 %v1424_v6, 16 }
 0x428   : > { %2438 = vst [vmem:[#allocation1 + $0x2] ss:$9 sm:$0xff] %v2151_v31  ;;  %v2170_v31 = vperm.slane %v5159_v24, 5 }
 0x429   : > { %2439 = vst [vmem:[#allocation1 + $0x3] ss:$9 sm:$0xff] %v2152_v35  ;;  %2572 = vperm.xlu1 %3325, %v5141_v34   ;;  %v2165_v34 = vperm.slane %v5159_v24, 0 }
 0x42a   : > { %2440 = vst [vmem:[#allocation1 + $0x4] ss:$9 sm:$0xff] %v2153_v54  ;;  %2542 = vperm.xlu2 %3326, %v5569_v28  }
 0x42b   : > { %2441 = vst [vmem:[#allocation1 + $0x5] ss:$9 sm:$0xff] %v2154_v60  ;;  %v2171_v60 = vperm.slane %v5159_v24, 6 }
 0x42c   : > { %2442 = vst [vmem:[#allocation1 + $0x6] ss:$9 sm:$0xff] %v2155_v16  ;;  %v2172_v16 = vperm.slane %v5159_v24, 7 }
 0x42d   : > { %2443 = vst [vmem:[#allocation1 + $0x7] ss:$9 sm:$0xff] %v2156_v45  ;;  %v1406_v2 = vpop.xlane.xlu1 %1405 }
 0x42e   : > { %v1407_v13 = vcvt.f32.s32 %v1406_v2 }
 0x430   : > { %v5209_v58 = vadd.s32 %v1409_v21, %v1407_v13  ;;  %v1441_v13 = vshll.u32 %v1440_v9, 16 }
 0x432   : > { %vm1529_vm3 = vcmp.eq.s32.totalorder %v3732_v11, %v5209_v58  ;;  %vm1530_vm4 = vcmp.eq.s32.totalorder %v3735_v12, %v5209_v58  ;;  %2551 = vperm.xlu2 %3326, %v5570_v25   ;;  %v2173_v22 = vperm.slane %v5209_v58, 0  ;;  %v2177_v61 = vperm.slane %v5209_v58, 4 }
 0x433   : > { %3186 = vmatmul.msk.f32.gmra.mxu2 %vm1529_vm3, %v5555_v46  ;;  %3218 = vmatmul.msk.f32.gmra.mxu3 %vm1530_vm4, %v5555_v46  ;;  %v2178_v7 = vperm.slane %v5209_v58, 5  ;;  %v2179_v21 = vperm.slane %v5209_v58, 6  ;;  %vm2627_vm3 = vcmask 458112   ;;  %vm2631_vm4 = vcmask 523712  }
 0x434   : > { %v2444_v55 = vld [vmem:[#allocation1] sm:$0xff] }
 0x435   : > { %2445 = vst [vmem:[#allocation1] ss:$9 sm:$0xff] %v2157_v56  ;;  %2581 = vperm.xlu1 %3325, %v2444_v55  }
 0x436   : > { %2446 = vst [vmem:[#allocation1 + $0x1] ss:$9 sm:$0xff] %v2158_v26  ;;  %v1776_v32 = vpop.f32.mrf.mxu2  ;;  %v2174_v26 = vperm.slane %v5209_v58, 1 }
 0x437   : > { %2447 = vst [vmem:[#allocation1 + $0x2] ss:$9 sm:$0xff] %v2159_v39  ;;  %v1889_v57 = vpop.f32.mrf.mxu3  ;;  %v2175_v39 = vperm.slane %v5209_v58, 2 }
 0x438   : > { %2448 = vst [vmem:[#allocation1 + $0x3] ss:$9 sm:$0xff] %v2160_v8  ;;  %v1890_v49 = vadd.f32 %v1889_v57, %v1776_v32  ;;  %v1422_v37 = vpop.xlane.xlu2 %1421 }
 0x439   : > { %2449 = vst [vmem:[#allocation1 + $0x4] ss:$9 sm:$0xff] %v2161_v14  ;;  %v1423_v35 = vcvt.f32.s32 %v1422_v37 }
 0x43a   : > { %2450 = vst [vmem:[#allocation1 + $0x5] ss:$9 sm:$0xff] %v2162_v0  ;;  %v2724_v15 = vsub.f32 %v1890_v49, %v3347_v51  ;;  %2560 = vperm.xlu2 %3326, %v5029_v53   ;;  %v2176_v53 = vperm.slane %v5209_v58, 3 }
 0x43b   : > { %2451 = vst [vmem:[#allocation1 + $0x6] ss:$9 sm:$0xff] %v2163_v48  ;;  %v5236_v45 = vadd.s32 %v1425_v3, %v1423_v35  ;;  %v2180_v48 = vperm.slane %v5209_v58, 7 }
 0x43c   : > { %2452 = vst [vmem:[#allocation1 + $0x7] ss:$9 sm:$0xff] %v2164_v17  ;;  %v2756_v54 = vmul.f32 %v2724_v15, %v2724_v15  ;;  %v3350_v15 = vld [vmem:[%s3597_s18 + $0xb8] sm:$0xff] }
 0x43d   : > { %1945 = vst.msk [vmem:[%s4523_s27 + $0xa0] sm:$0xff] %vm344_vm0, %v1890_v49  ;;  %vm1531_vm5 = vcmp.eq.s32.totalorder %v3732_v11, %v5236_v45  ;;  %vm1532_vm6 = vcmp.eq.s32.totalorder %v3735_v12, %v5236_v45  ;;  %v2181_v23 = vperm.slane %v5236_v45, 0  ;;  %v2182_v27 = vperm.slane %v5236_v45, 1 }
 0x43e   : > { %v2807_v40 = vsel %vm344_vm0, %v2756_v54, 0.0  ;;  %v1779_v43 = vpop.f32.mrf.mxu2  ;;  %3187 = vmatmul.msk.f32.gmra.mxu2 %vm1531_vm5, %v5555_v46  ;;  %3219 = vmatmul.msk.f32.gmra.mxu3 %vm1532_vm6, %v5555_v46  ;;  %v2183_v59 = vperm.slane %v5236_v45, 2  ;;  %v2184_v32 = vperm.slane %v5236_v45, 3  ;;  %v2185_v6 = vperm.slane %v5236_v45, 4 }
 0x43f   : > { %v2808_v38 = vadd.f32 %v2807_v40, %v2806_v18  ;;  %v1892_v56 = vpop.f32.mrf.mxu3  ;;  %v2188_v18 = vperm.slane %v5236_v45, 7  ;;  %vm2635_vm5 = vcmask 589312   ;;  %vm2639_vm6 = vcmask 654912  }
 0x440   : > { %v1893_v24 = vadd.f32 %v1892_v56, %v1779_v43  ;;  %v1472_v56 = vcvt.f32.s32 %v5132_v10 }
 0x442   : > { %1946 = vst.msk [vmem:[%s4523_s27 + $0xa8] sm:$0xff] %vm344_vm0, %v1893_v24  ;;  %v2725_v55 = vsub.f32 %v1893_v24, %v3348_v19  ;;  %2569 = vperm.xlu2 %3326, %v5108_v42   ;;  %v1473_v19 = vshll.u32 %v1472_v56, 16 }
 0x443   : > { %v2453_v20 = vld [vmem:[#allocation1] sm:$0xff] }
 0x444   : > { %2454 = vst [vmem:[#allocation1] ss:$9 sm:$0xff] %v2165_v34  ;;  %2584 = vperm.xlu0 %3324, %v2453_v20   ;;  %v2757_v52 = vmul.f32 %v2725_v55, %v2725_v55  ;;  %v2187_v20 = vperm.slane %v5236_v45, 6 }
 0x445   : > { %2455 = vst [vmem:[#allocation1 + $0x1] ss:$9 sm:$0xff] %v2166_v30  ;;  %v1438_v0 = vpop.xlane.xlu0 %1437 }
 0x446   : > { %2456 = vst [vmem:[#allocation1 + $0x2] ss:$9 sm:$0xff] %v2167_v1  ;;  %v2809_v14 = vsel %vm344_vm0, %v2757_v52, 0.0  ;;  %v1439_v62 = vcvt.f32.s32 %v1438_v0  ;;  %v1782_v17 = vpop.f32.mrf.mxu2 }
 0x447   : > { %2457 = vst [vmem:[#allocation1 + $0x3] ss:$9 sm:$0xff] %v2168_v50  ;;  %v2810_v2 = vadd.f32 %v2809_v14, %v2808_v38  ;;  %v1895_v47 = vpop.f32.mrf.mxu3 }
 0x448   : > { %2458 = vst [vmem:[#allocation1 + $0x4] ss:$9 sm:$0xff] %v2169_v41  ;;  %v5262_v63 = vadd.s32 %v1441_v13, %v1439_v62  ;;  %v1896_v42 = vadd.f32 %v1895_v47, %v1782_v17 }
 0x449   : > { %2459 = vst [vmem:[#allocation1 + $0x5] ss:$9 sm:$0xff] %v2170_v31 }
 0x44a   : > { %2460 = vst [vmem:[#allocation1 + $0x6] ss:$9 sm:$0xff] %v2171_v60  ;;  %vm1533_vm7 = vcmp.eq.s32.totalorder %v3732_v11, %v5262_v63  ;;  %vm1534_vm8 = vcmp.eq.s32.totalorder %v3735_v12, %v5262_v63  ;;  %2578 = vperm.xlu2 %3326, %v5182_v5   ;;  %v2726_v33 = vsub.f32 %v1896_v42, %v3349_v29  ;;  %v2186_v5 = vperm.slane %v5236_v45, 5 }
 0x44b   : > { %2461 = vst [vmem:[#allocation1 + $0x7] ss:$9 sm:$0xff] %v2172_v16  ;;  %3188 = vmatmul.msk.f32.gmra.mxu2 %vm1533_vm7, %v5555_v46  ;;  %3220 = vmatmul.msk.f32.gmra.mxu3 %vm1534_vm8, %v5555_v46  ;;  %v1454_v58 = vpop.xlane.xlu1 %1453  ;;  %v2189_v25 = vperm.slane %v5262_v63, 0  ;;  %v2190_v3 = vperm.slane %v5262_v63, 1  ;;  %v2191_v31 = vperm.slane %v5262_v63, 2  ;;  %v2192_v54 = vperm.slane %v5262_v63, 3 }
 0x44c   : > { %v1455_v28 = vcvt.f32.s32 %v1454_v58  ;;  %1947 = vst.msk [vmem:[%s4523_s27 + $0xb0] sm:$0xff] %vm344_vm0, %v1896_v42  ;;  %v2758_v4 = vmul.f32 %v2726_v33, %v2726_v33  ;;  %v2193_v45 = vperm.slane %v5262_v63, 4  ;;  %v2194_v40 = vperm.slane %v5262_v63, 5  ;;  %v3351_v42 = vld [vmem:[%s3597_s18 + $0xc0] sm:$0xff] }
 0x44d   : > { %v2195_v38 = vperm.slane %v5262_v63, 6  ;;  %v2196_v43 = vperm.slane %v5262_v63, 7  ;;  %v5340_v29 = vadd.s32 4294967272, %v3732_v11  ;;  %vm2643_vm7 = vcmask 720512  }
 0x44e   : > { %v5278_v34 = vadd.s32 %v1457_v36, %v1455_v28  ;;  %v2811_v30 = vsel %vm344_vm0, %v2758_v4, 0.0  ;;  %v1785_v1 = vpop.f32.mrf.mxu2  ;;  %vm2647_vm8 = vcmask 786112  }
 0x44f   : > { %v2812_v49 = vadd.f32 %v2811_v30, %v2810_v2  ;;  %v1898_v50 = vpop.f32.mrf.mxu3 }
 0x450   : > { %vm1535_vm9 = vcmp.eq.s32.totalorder %v3732_v11, %v5278_v34  ;;  %vm1536_vm10 = vcmp.eq.s32.totalorder %v3735_v12, %v5278_v34  ;;  %v1899_v51 = vadd.f32 %v1898_v50, %v1785_v1  ;;  %v2199_v14 = vperm.slane %v5278_v34, 2 }
 0x451   : > { %v2200_v2 = vperm.slane %v5278_v34, 3  ;;  %v2201_v13 = vperm.slane %v5278_v34, 4  ;;  %v2202_v62 = vperm.slane %v5278_v34, 5  ;;  %v2203_v47 = vperm.slane %v5278_v34, 6 }
 0x452   : > { %v2462_v8 = vld [vmem:[#allocation1] sm:$0xff]  ;;  %1948 = vst.msk [vmem:[%s4523_s27 + $0xb8] sm:$0xff] %vm344_vm0, %v1899_v51  ;;  %v2727_v41 = vsub.f32 %v1899_v51, %v3350_v15  ;;  %v2204_v58 = vperm.slane %v5278_v34, 7  ;;  %v3352_v15 = vld [vmem:[%s3597_s18 + $0xc8] sm:$0xff] }
 0x453   : > { %2463 = vst [vmem:[#allocation1] ss:$9 sm:$0xff] %v2173_v22  ;;  %3189 = vmatmul.msk.f32.gmra.mxu2 %vm1535_vm9, %v5555_v46  ;;  %3221 = vmatmul.msk.f32.gmra.mxu3 %vm1536_vm10, %v5555_v46  ;;  %v5308_v22 = vadd.s32 4294967288, %v3732_v11  ;;  %vm2651_vm9 = vcmask 851712   ;;  %vm2655_vm10 = vcmask 917312  }
 0x454   : > { %2464 = vst [vmem:[#allocation1 + $0x1] ss:$9 sm:$0xff] %v2174_v26  ;;  %2587 = vperm.xlu2 %3326, %v2462_v8   ;;  %v2759_v37 = vmul.f32 %v2727_v41, %v2727_v41  ;;  %v2198_v8 = vperm.slane %v5278_v34, 1 }
 0x455   : > { %2465 = vst [vmem:[#allocation1 + $0x2] ss:$9 sm:$0xff] %v2175_v39  ;;  %v2197_v39 = vperm.slane %v5278_v34, 0 }
 0x456   : > { %2466 = vst [vmem:[#allocation1 + $0x3] ss:$9 sm:$0xff] %v2176_v53  ;;  %v2813_v35 = vsel %vm344_vm0, %v2759_v37, 0.0 }
 0x457   : > { %2467 = vst [vmem:[#allocation1 + $0x4] ss:$9 sm:$0xff] %v2177_v61  ;;  %v5300_v16 = vadd.f32 %v2813_v35, %v2812_v49 }
 0x458   : > { %2468 = vst [vmem:[#allocation1 + $0x5] ss:$9 sm:$0xff] %v2178_v7  ;;  %v2510_v52 = vpop.permute.xlu0 %2509  ;;  %v5317_v7 = vadd.s32 4294967280, %v3732_v11 }
 0x459   : > { %2469 = vst [vmem:[#allocation1 + $0x6] ss:$9 sm:$0xff] %v2179_v21  ;;  %v2604_v0 = vperm.slane %v2510_v52, %v3732_v11 }
 0x45a   : > { %2470 = vst [vmem:[#allocation1 + $0x7] ss:$9 sm:$0xff] %v2180_v48 }
 0x461   : > { %v2471_v57 = vld [vmem:[#allocation1] sm:$0xff] }
 0x462   : > { %2590 = vperm.xlu1 %3325, %v2471_v57   ;;  %2472 = vst [vmem:[#allocation1] ss:$9 sm:$0xff] %v2181_v23 }
 0x463   : > { %2473 = vst [vmem:[#allocation1 + $0x1] ss:$9 sm:$0xff] %v2182_v27  ;;  %v2513_v26 = vpop.permute.xlu1 %2512 }
 0x464   : > { %2474 = vst [vmem:[#allocation1 + $0x2] ss:$9 sm:$0xff] %v2183_v59  ;;  %v2606_v53 = vperm.slane %v2513_v26, %v5308_v22 }
 0x465   : > { %2475 = vst [vmem:[#allocation1 + $0x3] ss:$9 sm:$0xff] %v2184_v32  ;;  %v1470_v24 = vpop.xlane.xlu2 %1469 }
 0x466   : > { %2476 = vst [vmem:[#allocation1 + $0x4] ss:$9 sm:$0xff] %v2185_v6  ;;  %v1471_v55 = vcvt.f32.s32 %v1470_v24  ;;  %v2608_v17 = vsel %vm2607_vm11, %v2606_v53, %v2604_v0 }
 0x467   : > { %2477 = vst [vmem:[#allocation1 + $0x5] ss:$9 sm:$0xff] %v2186_v5 }
 0x468   : > { %2478 = vst [vmem:[#allocation1 + $0x6] ss:$9 sm:$0xff] %v2187_v20  ;;  %v5311_v9 = vadd.s32 %v1473_v19, %v1471_v55 }
 0x469   : > { %2479 = vst [vmem:[#allocation1 + $0x7] ss:$9 sm:$0xff] %v2188_v18 }
 0x46a   : > { %v1788_v10 = vpop.f32.mrf.mxu2  ;;  %v1901_v61 = vpop.f32.mrf.mxu3  ;;  %vm1537_vm12 = vcmp.eq.s32.totalorder %v3732_v11, %v5311_v9  ;;  %vm1538_vm13 = vcmp.eq.s32.totalorder %v3735_v12, %v5311_v9  ;;  %v2205_v32 = vperm.slane %v5311_v9, 0  ;;  %v2206_v57 = vperm.slane %v5311_v9, 1 }
 0x46b   : > { %v1902_v48 = vadd.f32 %v1901_v61, %v1788_v10  ;;  %3190 = vmatmul.msk.f32.gmra.mxu2 %vm1537_vm12, %v5555_v46  ;;  %3222 = vmatmul.msk.f32.gmra.mxu3 %vm1538_vm13, %v5555_v46  ;;  %v5336_v46 = vadd.s32 4294967264, %v3732_v11  ;;  %v2522_v33 = vpop.permute.xlu1 %2521  ;;  %v2207_v30 = vperm.slane %v5311_v9, 2  ;;  %v2208_v1 = vperm.slane %v5311_v9, 3 }
 0x46c   : > { %v2209_v51 = vperm.slane %v5311_v9, 4  ;;  %v2211_v37 = vperm.slane %v5311_v9, 6  ;;  %vm2697_vm12 = vcmask 1040384  }
 0x46d   : > { %v2516_v63 = vpop.permute.xlu2 %2515  ;;  %v2728_v12 = vsub.f32 %v1902_v48, %v3351_v42  ;;  %1949 = vst.msk [vmem:[%s4523_s27 + $0xc0] sm:$0xff] %vm344_vm0, %v1902_v48  ;;  %v2618_v34 = vperm.slane %v2522_v33, %v5336_v46 }
 0x46e   : > { %v2610_v44 = vperm.slane %v2516_v63, %v5317_v7 }
 0x46f   : > { %v2760_v36 = vmul.f32 %v2728_v12, %v2728_v12 }
 0x470   : > { %v2480_v60 = vld [vmem:[#allocation1] sm:$0xff]  ;;  %v2612_v23 = vsel %vm2611_vm14, %v2610_v44, %v2608_v17 }
 0x471   : > { %2593 = vperm.xlu0 %3324, %v2480_v60   ;;  %2481 = vst [vmem:[#allocation1] ss:$9 sm:$0xff] %v2189_v25  ;;  %v2815_v28 = vsel %vm344_vm0, %v2760_v36, 0.0  ;;  %v2210_v25 = vperm.slane %v5311_v9, 5 }
 0x472   : > { %2482 = vst [vmem:[#allocation1 + $0x1] ss:$9 sm:$0xff] %v2190_v3  ;;  %v2816_v27 = vadd.f32 %v2815_v28, %v5300_v16 }
 0x473   : > { %2483 = vst [vmem:[#allocation1 + $0x2] ss:$9 sm:$0xff] %v2191_v31  ;;  %v2212_v31 = vperm.slane %v5311_v9, 7  ;;  %v5369_v26 = vpop.permute.xlu1 %2527 }
 0x474   : > { %2484 = vst [vmem:[#allocation1 + $0x3] ss:$9 sm:$0xff] %v2192_v54 }
 0x475   : > { %2485 = vst [vmem:[#allocation1 + $0x4] ss:$9 sm:$0xff] %v2193_v45  ;;  %v2519_v59 = vpop.permute.xlu2 %2518 }
 0x476   : > { %2486 = vst [vmem:[#allocation1 + $0x5] ss:$9 sm:$0xff] %v2194_v40  ;;  %v2614_v4 = vperm.slane %v2519_v59, %v5340_v29  ;;  %v1791_v5 = vpop.f32.mrf.mxu2  ;;  %v1904_v20 = vpop.f32.mrf.mxu3 }
 0x477   : > { %2487 = vst [vmem:[#allocation1 + $0x6] ss:$9 sm:$0xff] %v2195_v38  ;;  %v1905_v49 = vadd.f32 %v1904_v20, %v1791_v5  ;;  %v3353_v38 = vld [vmem:[%s3597_s18 + $0xd0] sm:$0xff]  ;;  %v2625_v5 = vadd.s32 4294967248, %v3732_v11 }
 0x478   : > { %2488 = vst [vmem:[#allocation1 + $0x7] ss:$9 sm:$0xff] %v2196_v43  ;;  %v2616_v6 = vsel %vm2615_vm15, %v2614_v4, %v2612_v23  ;;  %v2621_v4 = vadd.s32 4294967256, %v3732_v11 }
 0x479   : > { %v5352_v18 = vsel %vm2619_vm1, %v2618_v34, %v2616_v6  ;;  %v2729_v41 = vsub.f32 %v1905_v49, %v3352_v15  ;;  %1950 = vst.msk [vmem:[%s4523_s27 + $0xc8] sm:$0xff] %vm344_vm0, %v1905_v49  ;;  %v2626_v15 = vperm.slane %v5369_v26, %v2625_v5 }
 0x47b   : > { %v2761_v3 = vmul.f32 %v2729_v41, %v2729_v41  ;;  %v5375_v10 = vpop.permute.xlu1 %2536  ;;  %v5415_v41 = vadd.s32 4294967232, %v3732_v11 }
 0x47d   : > { %v2817_v35 = vsel %vm344_vm0, %v2761_v3, 0.0  ;;  %v2525_v55 = vpop.permute.xlu2 %2524  ;;  %v3355_v3 = vld [vmem:[%s3597_s18 + $0xe0] sm:$0xff] }
 0x47e   : > { %v2818_v54 = vadd.f32 %v2817_v35, %v2816_v27  ;;  %v2629_v35 = vadd.s32 4294967240, %v3732_v11 }
 0x47f   : > { %v2489_v21 = vld [vmem:[#allocation1] sm:$0xff]  ;;  %v1794_v60 = vpop.f32.mrf.mxu2  ;;  %v1907_v16 = vpop.f32.mrf.mxu3 }
 0x480   : > { %2596 = vperm.xlu2 %3326, %v2489_v21   ;;  %2490 = vst [vmem:[#allocation1] ss:$9 sm:$0xff] %v2197_v39  ;;  %v1908_v45 = vadd.f32 %v1907_v16, %v1794_v60  ;;  %v5371_v39 = vpop.permute.xlu0 %2530 }
 0x481   : > { %2491 = vst [vmem:[#allocation1 + $0x1] ss:$9 sm:$0xff] %v2198_v8 }
 0x482   : > { %2492 = vst [vmem:[#allocation1 + $0x2] ss:$9 sm:$0xff] %v2199_v14  ;;  %v2730_v43 = vsub.f32 %v1908_v45, %v3353_v38  ;;  %v2637_v38 = vadd.s32 4294967224, %v3732_v11 }
 0x483   : > { %2493 = vst [vmem:[#allocation1 + $0x3] ss:$9 sm:$0xff] %v2200_v2  ;;  %v5383_v0 = vpop.permute.xlu1 %2545 }
 0x484   : > { %2494 = vst [vmem:[#allocation1 + $0x4] ss:$9 sm:$0xff] %v2201_v13  ;;  %v2762_v56 = vmul.f32 %v2730_v43, %v2730_v43 }
 0x485   : > { %2495 = vst [vmem:[#allocation1 + $0x5] ss:$9 sm:$0xff] %v2202_v62  ;;  %v5373_v52 = vpop.permute.xlu2 %2533 }
 0x486   : > { %2496 = vst [vmem:[#allocation1 + $0x6] ss:$9 sm:$0xff] %v2203_v47  ;;  %v2819_v24 = vsel %vm344_vm0, %v2762_v56, 0.0  ;;  %v2634_v56 = vperm.slane %v5373_v52, %v5415_v41  ;;  %v2645_v52 = vadd.s32 4294967208, %v3732_v11 }
 0x487   : > { %2497 = vst [vmem:[#allocation1 + $0x7] ss:$9 sm:$0xff] %v2204_v58  ;;  %v5367_v19 = vadd.f32 %v2819_v24, %v2818_v54 }
 0x488   : > { %1951 = vst.msk [vmem:[%s4523_s27 + $0xd0] sm:$0xff] %vm344_vm0, %v1908_v45  ;;  %v5379_v61 = vpop.permute.xlu0 %2539  ;;  %v3356_v45 = vld [vmem:[%s3597_s18 + $0xe8] sm:$0xff] }
 0x48b   : > { %v5391_v63 = vpop.permute.xlu1 %2554 }
 0x48d   : > { %v5381_v14 = vpop.permute.xlu2 %2542 }
 0x48e   : > { %v2498_v50 = vld [vmem:[#allocation1] sm:$0xff] }
 0x48f   : > { %2599 = vperm.xlu1 %3325, %v2498_v50   ;;  %2499 = vst [vmem:[#allocation1] ss:$9 sm:$0xff] %v2205_v32 }
 0x490   : > { %2500 = vst [vmem:[#allocation1 + $0x1] ss:$9 sm:$0xff] %v2206_v57  ;;  %v5387_v48 = vpop.permute.xlu0 %2548 }
 0x491   : > { %2501 = vst [vmem:[#allocation1 + $0x2] ss:$9 sm:$0xff] %v2207_v30  ;;  %v2622_v30 = vperm.slane %v2525_v55, %v2621_v4 }
 0x492   : > { %2502 = vst [vmem:[#allocation1 + $0x3] ss:$9 sm:$0xff] %v2208_v1  ;;  %v3354_v1 = vld [vmem:[%s3597_s18 + $0xd8] sm:$0xff] }
 0x493   : > { %2503 = vst [vmem:[#allocation1 + $0x4] ss:$9 sm:$0xff] %v2209_v51  ;;  %v2564_v58 = vpop.permute.xlu1 %2563  ;;  %v2624_v54 = vsel %vm2623_vm2, %v2622_v30, %v5352_v18  ;;  %v3357_v18 = vld [vmem:[%s3597_s18 + $0xf0] sm:$0xff] }
 0x494   : > { %2504 = vst [vmem:[#allocation1 + $0x5] ss:$9 sm:$0xff] %v2210_v25  ;;  %v2668_v6 = vperm.slane %v2564_v58, %v5317_v7  ;;  %v2628_v43 = vsel %vm2627_vm3, %v2626_v15, %v2624_v54 }
 0x495   : > { %2505 = vst [vmem:[#allocation1 + $0x6] ss:$9 sm:$0xff] %v2211_v37  ;;  %v5389_v62 = vpop.permute.xlu2 %2551 }
 0x496   : > { %2506 = vst [vmem:[#allocation1 + $0x7] ss:$9 sm:$0xff] %v2212_v31 }
 0x498   : > { %v2558_v44 = vpop.permute.xlu0 %2557 }
 0x499   : > { %v2665_v32 = vperm.slane %v2558_v44, %v3732_v11 }
 0x49b   : > { %v2573_v59 = vpop.permute.xlu1 %2572 }
 0x49d   : > { %v2507_v40 = vld [vmem:[#allocation1] sm:$0xff]  ;;  %v2561_v12 = vpop.permute.xlu2 %2560 }
 0x49e   : > { %2602 = vperm.xlu0 %3324, %v2507_v40   ;;  %v2666_v34 = vperm.slane %v2561_v12, %v5308_v22  ;;  %v3473_v22 = vmov 0.0  }
 0x49f   : > { %2841 = vst [vmem:[%s5408_s28] sm:$0xff] %v3473_v22 }
 0x4a0   : > { %v2567_v33 = vpop.permute.xlu0 %2566  ;;  %v2667_v20 = vsel %vm2607_vm11, %v2666_v34, %v2665_v32  ;;  %vm2663_vm11 = vcmask 1048512  }
 0x4a1   : > { %v2669_v51 = vsel %vm2611_vm14, %v2668_v6, %v2667_v20  ;;  %v2670_v25 = vperm.slane %v2567_v33, %v5340_v29 }
 0x4a3   : > { %v2671_v60 = vsel %vm2615_vm15, %v2670_v25, %v2669_v51 }
 0x4a5   : > { %v2570_v27 = vpop.permute.xlu2 %2569 }
 0x4a6   : > { %v2672_v7 = vperm.slane %v2570_v27, %v5336_v46  ;;  %v2674_v46 = vperm.slane %v2573_v59, %v2621_v4 }
 0x4a7   : > { %v2582_v37 = vpop.permute.xlu1 %2581 }
 0x4a8   : > { %v2576_v57 = vpop.permute.xlu0 %2575  ;;  %v2673_v29 = vsel %vm2619_vm1, %v2672_v7, %v2671_v60  ;;  %v2680_v33 = vperm.slane %v2582_v37, %v5415_v41  ;;  %v2657_v37 = vadd.s32 4294967184, %v3732_v11 }
 0x4a9   : > { %v2676_v44 = vperm.slane %v2576_v57, %v2625_v5  ;;  %v2646_v5 = vperm.slane %v5381_v14, %v2645_v52 }
 0x4ad   : > { %v2579_v49 = vpop.permute.xlu2 %2578 }
 0x4b6   : > { %v1797_v9 = vpop.f32.mrf.mxu2  ;;  %v1910_v8 = vpop.f32.mrf.mxu3 }
 0x4b7   : > { %v1911_v53 = vadd.f32 %v1910_v8, %v1797_v9  ;;  %v2585_v24 = vpop.permute.xlu0 %2584  ;;  %v2630_v9 = vperm.slane %v5371_v39, %v2629_v35  ;;  %v2641_v8 = vadd.s32 4294967216, %v3732_v11 }
 0x4b8   : > { %v2682_v14 = vperm.slane %v2585_v24, %v2637_v38 }
 0x4b9   : > { %1952 = vst.msk [vmem:[%s4523_s27 + $0xd8] sm:$0xff] %vm344_vm0, %v1911_v53  ;;  %v2731_v50 = vsub.f32 %v1911_v53, %v3354_v1  ;;  %v2675_v53 = vsel %vm2623_vm2, %v2674_v46, %v2673_v29  ;;  %v2642_v34 = vperm.slane %v5379_v61, %v2641_v8 }
 0x4bb   : > { %v2763_v16 = vmul.f32 %v2731_v50, %v2731_v50 }
 0x4c1   : > { %v1800_v2 = vpop.f32.mrf.mxu2  ;;  %v1913_v21 = vpop.f32.mrf.mxu3 }
 0x4c2   : > { %v1914_v13 = vadd.f32 %v1913_v21, %v1800_v2  ;;  %v2678_v2 = vperm.slane %v2579_v49, %v2629_v35  ;;  %v2821_v21 = vsel %vm344_vm0, %v2763_v16, 0.0  ;;  %v3358_v49 = vld [vmem:[%s3597_s18 + $0xf8] sm:$0xff]  ;;  %v2653_v35 = vadd.s32 4294967192, %v3732_v11  ;;  %s3225_s18 = sshll.u32 %s3461_s24, 1  ;;  %s2888_s24 = scalar_lea.hbm %s5533_s6, %s3226_s13 }
 0x4c3   : > { %s2874_s12 = scalar_lea.hbm %s5532_s5, %s3225_s18  ;;  %s2892_s18 = sshll.u32 %s2888_s24, 4  ;;  %s2893_s18 = int_to_ptr.hbm [resolvable:$true] %s2892_s18 }
 0x4c4   : > { %1953 = vst.msk [vmem:[%s4523_s27 + $0xe0] sm:$0xff] %vm344_vm0, %v1914_v13  ;;  %v2732_v31 = vsub.f32 %v1914_v13, %v3355_v3  ;;  %s2878_s19 = sshll.u32 %s2874_s12, 4  ;;  %s2879_s19 = int_to_ptr.hbm [resolvable:$true] %s2878_s19 }
 0x4c5   : > { %s3373_s8 = sshra.s32 %s2879_s19, 4  ;;  %s3374_s8 = int_to_ptr.hbm [resolvable:$true] %s3373_s8 }
 0x4c6   : > { %v2764_v55 = vmul.f32 %v2732_v31, %v2732_v31  ;;  %s3375_s11 = scalar_lea.hbm %s3374_s8, 2  ;;  %p3380_p1 = scmp.lt.s32.totalorder %s3374_s8, %s5532_s5 }
 0x4c7   : > { %p3376_p12 = scmp.ne.s32.totalorder %s3374_s8, %s3375_s11  ;;  %p3381_p2 = scmp.lt.s32.totalorder %s3379_s20, %s3375_s11 }
 0x4c8   : > { %v2823_v58 = vsel %vm344_vm0, %v2764_v55, 0.0 }
 0x4c9   : > { %p3377_p13 = pnand %p3376_p12, %p3549_p4  ;;  %p3382_p3 = por %p3381_p2, %p3380_p1 }
 0x4cb   : > { %p3378_p0 = pneg %p3377_p13 }
 0x4cd   : > { %p3383_p5 = pnand %p3382_p3, %p3378_p0 }
 0x4ce   : > { %v1803_v17 = vpop.f32.mrf.mxu2  ;;  %v1916_v47 = vpop.f32.mrf.mxu3 }
 0x4cf   : > { %v1917_v42 = vadd.f32 %v1916_v47, %v1803_v17  ;;  %v2632_v17 = vsel %vm2631_vm4, %v2630_v9, %v2628_v43  ;;  %v2638_v47 = vperm.slane %v5375_v10, %v2637_v38  ;;  %v2822_v10 = vadd.f32 %v2821_v21, %v5367_v19 }
 0x4d0   : > { %v2636_v12 = vsel %vm2635_vm5, %v2634_v56, %v2632_v17  ;;  %v2661_v38 = vadd.s32 4294967176, %v3732_v11  ;;  %v2658_v43 = vperm.slane %v5389_v62, %v2657_v37 }
 0x4d1   : > { %1954 = vst.msk [vmem:[%s4523_s27 + $0xe8] sm:$0xff] %vm344_vm0, %v1917_v42  ;;  %v2733_v40 = vsub.f32 %v1917_v42, %v3356_v45  ;;  %v2588_v42 = vpop.permute.xlu2 %2587  ;;  %v2640_v6 = vsel %vm2639_vm6, %v2638_v47, %v2636_v12  ;;  %v2824_v20 = vadd.f32 %v2823_v58, %v2822_v10 }
 0x4d2   : > { %v2684_v22 = vperm.slane %v2588_v42, %v2641_v8  ;;  %v2644_v7 = vsel %vm2643_vm7, %v2642_v34, %v2640_v6 }
 0x4d3   : > { %v2765_v13 = vmul.f32 %v2733_v40, %v2733_v40  ;;  %v2648_v25 = vsel %vm2647_vm8, %v2646_v5, %v2644_v7 }
 0x4d4   : > { %v2591_v39 = vpop.permute.xlu1 %2590 }
 0x4d5   : > { %v2825_v32 = vsel %vm344_vm0, %v2765_v13, 0.0  ;;  %v2686_v15 = vperm.slane %v2591_v39, %v2645_v52  ;;  %v2842_v39 = vld [vmem:[%s5408_s28] sm:$0x1] }
 0x4d6   : > { %v1806_v36 = vpop.f32.mrf.mxu2  ;;  %v1919_v23 = vpop.f32.mrf.mxu3  ;;  %v2826_v51 = vadd.f32 %v2825_v32, %v2824_v20 }
 0x4d7   : > { %v1920_v28 = vadd.f32 %v1919_v23, %v1806_v36  ;;  %v2649_v23 = vadd.s32 4294967200, %v3732_v11 }
 0x4d9   : > { %1955 = vst.msk [vmem:[%s4523_s27 + $0xf0] sm:$0xff] %vm344_vm0, %v1920_v28  ;;  %v2734_v26 = vsub.f32 %v1920_v28, %v3357_v18  ;;  %v2677_v28 = vsel %vm2627_vm3, %v2676_v44, %v2675_v53  ;;  %v2650_v1 = vperm.slane %v5383_v0, %v2649_v23  ;;  %v2654_v18 = vperm.slane %v5387_v48, %v2653_v35 }
 0x4da   : > { %v2679_v4 = vsel %vm2631_vm4, %v2678_v2, %v2677_v28  ;;  %v2597_v16 = vpop.permute.xlu2 %2596  ;;  %v2662_v53 = vperm.slane %v5391_v63, %v2661_v38  ;;  %v5571_v44 = vlaneseq }
 0x4db   : > { %v2766_v36 = vmul.f32 %v2734_v26, %v2734_v26  ;;  %v2681_v50 = vsel %vm2635_vm5, %v2680_v33, %v2679_v4  ;;  %v2652_v40 = vsel %vm2651_vm9, %v2650_v1, %v2648_v25  ;;  %v2690_v26 = vperm.slane %v2597_v16, %v2653_v35 }
 0x4dc   : > { %v2683_v0 = vsel %vm2639_vm6, %v2682_v14, %v2681_v50  ;;  %v2656_v8 = vsel %vm2655_vm10, %v2654_v18, %v2652_v40  ;;  %vm2701_vm13 = vcmp.lt.s32.totalorder %v5571_v44, 256 }
 0x4dd   : > { %v2827_v19 = vsel %vm344_vm0, %v2766_v36, 0.0  ;;  %v2685_v46 = vsel %vm2643_vm7, %v2684_v22, %v2683_v0 }
 0x4de   : > { %v2828_v31 = vadd.f32 %v2827_v19, %v2826_v51  ;;  %v2687_v29 = vsel %vm2647_vm8, %v2686_v15, %v2685_v46 }
 0x4e3   : > { %v2594_v30 = vpop.permute.xlu0 %2593 }
 0x4e4   : > { %v2688_v3 = vperm.slane %v2594_v30, %v2649_v23 }
 0x4e6   : > { %v2689_v56 = vsel %vm2651_vm9, %v2688_v3, %v2687_v29 }
 0x4e7   : > { %v2691_v62 = vsel %vm2655_vm10, %v2690_v26, %v2689_v56 }
 0x4ee   : > { %v1809_v27 = vpop.f32.mrf.mxu2  ;;  %v1922_v59 = vpop.f32.mrf.mxu3 }
 0x4ef   : > { %v1923_v57 = vadd.f32 %v1922_v59, %v1809_v27 }
 0x4f1   : > { %1956 = vst.msk [vmem:[%s4523_s27 + $0xf8] sm:$0xff] %vm344_vm0, %v1923_v57  ;;  %v2735_v61 = vsub.f32 %v1923_v57, %v3358_v49 }
 0x4f3   : > { %v2767_v41 = vmul.f32 %v2735_v61, %v2735_v61 }
 0x4f5   : > { %v2829_v60 = vsel %vm344_vm0, %v2767_v41, 0.0  ;;  %vm2659_vm0 = vcmask 982912  }
 0x4f6   : > { %v2830_v45 = vadd.f32 %v2829_v60, %v2828_v31  ;;  %v2660_v21 = vsel %vm2659_vm0, %v2658_v43, %v2656_v8 }
 0x4f7   : > { %v2664_v63 = vsel %vm2663_vm11, %v2662_v53, %v2660_v21 }
 0x4f8   : > { %v2831_v55 = vrot.slane %v2830_v45, 4 }
 0x4fa   : > { %v2832_v11 = vadd.f32 %v2831_v55, %v2830_v45 }
 0x4fc   : > { %v2833_v48 = vrot.slane %v2832_v11, 2 }
 0x4fe   : > { %v2834_v52 = vadd.f32 %v2833_v48, %v2832_v11 }
 0x500   : > { %v2835_v42 = vrot.slane %v2834_v52, 1 }
 0x501   : > { %v2600_v54 = vpop.permute.xlu1 %2599 }
 0x502   : > { %v2692_v24 = vperm.slane %v2600_v54, %v2657_v37  ;;  %v2836_v58 = vadd.f32 %v2835_v42, %v2834_v52 }
 0x504   : > { %v2693_v13 = vsel %vm2659_vm0, %v2692_v24, %v2691_v62 }
 0x510   : > { %v2603_v9 = vpop.permute.xlu0 %2602 }
 0x511   : > { %v2694_v2 = vperm.slane %v2603_v9, %v2661_v38 }
 0x513   : > { %v2695_v17 = vsel %vm2663_vm11, %v2694_v2, %v2693_v13 }
 0x514   : > { %v2696_v47 = vrot.slane %v2695_v17, 7 }
 0x516   : > { %v2698_v12 = vsel %vm2697_vm12, %v2664_v63, %v2696_v47 }
 0x517   : > { %2703 = vst.msk [vmem:[%s278_s15] sm:$0x3] %vm2701_vm13, %v2698_v12 }
 0x518   : > { %3386 = shalt.err (!%p3383_p5)
}
 0x519   : > { %3261 = dma.vmem_to_hbm [thread:$0]  (%p3549_p4), %s2877_s16, 32, %s2879_s19, %s2853_s30   ;;  %vm2844_vm14 = vcmask 253952   ;;  %v2843_v36 = vadd.f32 %v2842_v39, %v2836_v58 }
 0x51a   : > { %s2858_s15 = scalar_lea.sflag [#allocation5], %s5398_s17  ;;  %s3401_s24 = sshra.s32 %s2893_s18, 4  ;;  %s3402_s24 = int_to_ptr.hbm [resolvable:$true] %s3401_s24 }
 0x51b   : > { %2845 = vst.msk [vmem:[%s5408_s28] sm:$0x1] %vm2844_vm14, %v2843_v36  ;;  %s3403_s0 = scalar_lea.hbm %s3402_s24, 8  ;;  %s3407_s12 = scalar_lea.hbm %s5533_s6, 16 }
 0x51c   : > { %p3404_p6 = scmp.ne.s32.totalorder %s3402_s24, %s3403_s0  ;;  %p3408_p10 = scmp.lt.s32.totalorder %s3402_s24, %s5533_s6 }
 0x51d   : > { %p3409_p11 = scmp.lt.s32.totalorder %s3407_s12, %s3403_s0 }
 0x51e   : > { %p3405_p7 = pnand %p3404_p6, %p3549_p4 }
 0x51f   : > { %p3410_p12 = por %p3409_p11, %p3408_p10 }
 0x520   : > { %p3406_p9 = pneg %p3405_p7 }
 0x522   : > { %p3411_p13 = pnand %p3410_p12, %p3406_p9 }
 0x524   : > { %3414 = shalt.err (!%p3411_p13)
}
 0x525   : > { %3262 = dma.vmem_to_hbm [thread:$0]  (%p3549_p4), %s2891_s14, 128, %s2893_s18, %s2858_s15  }
 0x526 PF: > { %p3272_p0 = scmp.ge.s32.totalorder %s3469_s26, 2  ;;  %s2913_s17 = sand.u32 1, %s3449_s21  }
 0x527   : > { %s2914_s28 = scalar_lea.sflag [#allocation3], %s2913_s17 }
 0x528   : > { %p3266_p1 = pnand %p3272_p0, %p3556_p8 }
 0x52a   : > { %p3267_p2 = pneg %p3266_p1 }
 0x52c   : > { %3440 = dma.done.wait (%p3267_p2), %s2914_s28, 32  }
 0x52d   : > { %3442 = vsyncadd (%p3267_p2), %s2914_s28, 4294967264  ;;  %s2924_s16 = scalar_lea.sflag [#allocation5], %s2913_s17 }
 0x52e   : > { %3444 = dma.done.wait (%p3267_p2), %s2924_s16, 128  }
 0x52f   : > { %3446 = vsyncadd (%p3267_p2), %s2924_s16, 4294967168  ;;  %s23_s26 = sadd.s32 1, %s3469_s26   ;;  %s5572_s21 = smov %s3453_s22 }
 0x530   : > { %p20_p3 = scmp.ge.s32.totalorder %s23_s26, 4   ;;  %s5573_s22 = smov %s3457_s23 }
 0x531   : > { %s5574_s23 = smov %s3562_s10  ;;  %s5575_s24 = smov %s3465_s25 }
 0x532   : > { %s5576_s25 = smov %s5578_s29  ;;  %22 = sbr.rel (!%p20_p3) target bundleno = 8 (0x8), region = 111 }
 0x537   :  { %2930 = vsyncpa [#allocation3], 1 }
 0x538   :  { %2932 = vsyncpa [#allocation3 + $0x1], 1 }
 0x539   :  { %2933 = vsyncpa [#allocation5], 1 }
 0x53a   :  { %2935 = vsyncpa [#allocation5 + $0x1], 1 }

</bundles_post_ra>
